<compile_context>
chip_gen: v5e
topology: v5e:2x2
jax: 0.10.0
libtpu: 0.0.40
codegen_flags: <defaults>
</compile_context>

<pallas_src>
import functools

import jax
import jax.numpy as jnp
from jax.experimental import pallas as pl
from jax.experimental.pallas import tpu as pltpu


# ------------------------------ Pallas kernel --------------------------------

def _make_gvae_kernel(tb):
    def kernel(scal_ref,            # SMEM (3,): [prelu_alpha, pos_weight, norm]
               x_ref,               # (N, FT)  bf16
               adj_ref,             # (N, N)   bf16 normalized adjacency (GCN prop)
               org_adj_ref,         # (TB, TB) bf16 binary adjacency block (i, j)
               wcat_ref,            # (FT, 2*HID) bf16 = [W_mu || W_lv]
               bcat_ref,            # (1, 2*HID)  f32  = [b_mu || b_lv]
               eps_ref,             # (N, HID) f32 reparameterization noise
               w1_ref, b1_ref,      # decoder layer 1: (HID,HID) bf16, (1,HID) f32
               w2_ref, b2_ref,      # decoder layer 2: (HID,FT)  bf16, (1,FT)  f32
               loss_ref,            # SMEM (1,1) f32 output
               recon_scr,           # VMEM (N, FT) bf16 scratch (persists over grid)
               acc_scr):            # SMEM (2,) f32: [kl, bce_sum]
        f32 = jnp.float32
        bf16 = jnp.bfloat16

        i = pl.program_id(0)
        j = pl.program_id(1)
        n = x_ref.shape[0]
        hid = wcat_ref.shape[1] // 2
        n2 = f32(n * n)

        alpha = scal_ref[0]
        pos_w = scal_ref[1]
        norm = scal_ref[2]

        # ---- one-time encoder -> KL -> reparameterize -> decoder at (0, 0) ----
        @pl.when(jnp.logical_and(i == 0, j == 0))
        def _():
            # fused GCN heads: one feature matmul + one aggregation matmul
            h = jnp.dot(x_ref[...], wcat_ref[...], preferred_element_type=f32)
            agg = jnp.dot(adj_ref[...], h.astype(bf16),
                          preferred_element_type=f32) + bcat_ref[...]
            act = jnp.where(agg > 0, agg, alpha * agg)          # PReLU
            mu = act[:, :hid]
            logvar = act[:, hid:]

            # KL: -0.5 * mean_over_nodes( sum_over_features(1 + 2*lv - mu^2 - exp(lv)^2) )
            std = jnp.exp(logvar)                               # exp computed once
            kl = -0.5 * (jnp.sum(1.0 + 2.0 * logvar - mu * mu - std * std) / f32(n))

            # reparameterize (training=True): z = eps * exp(logvar) + mu
            z = eps_ref[...] * std + mu

            # decoder: Linear -> ReLU -> Linear
            h1 = jnp.maximum(
                jnp.dot(z.astype(bf16), w1_ref[...],
                        preferred_element_type=f32) + b1_ref[...], 0.0)
            recon = jnp.dot(h1.astype(bf16), w2_ref[...],
                            preferred_element_type=f32) + b2_ref[...]

            recon_scr[...] = recon.astype(bf16)
            acc_scr[0] = kl
            acc_scr[1] = 0.0

        # ---- (i, j) block of recon @ recon.T + weighted BCE accumulation ----
        r_i = recon_scr[pl.ds(pl.multiple_of(i * tb, tb), tb), :]
        r_j = recon_scr[pl.ds(pl.multiple_of(j * tb, tb), tb), :]
        # contract last axis of both operands -> no explicit transpose
        scores = jax.lax.dot_general(
            r_i, r_j, dimension_numbers=(((1,), (1,)), ((), ())),
            preferred_element_type=f32)

        # reference quirk: sigmoid(scores) itself is fed to BCEWithLogits
        sig = pl.reciprocal(1.0 + jnp.exp(-scores), approx=True)

        y = org_adj_ref[...].astype(f32)
        one_m_y = 1.0 - y
        # BCEWithLogits (sum over block) with pos_weight, factored:
        #   l = softplus(-x) * (pos_w*y + (1-y)) + (1-y) * x ,   x = sig in (0,1)
        sp = jnp.log1p(jnp.exp(-sig))
        acc_scr[1] += jnp.sum(sp * (pos_w * y + one_m_y) + one_m_y * sig)

        # ---- finalize at the last grid point ----
        @pl.when(jnp.logical_and(i == pl.num_programs(0) - 1,
                                 j == pl.num_programs(1) - 1))
        def _():
            loss_ref[0, 0] = acc_scr[0] + norm * (acc_scr[1] / n2)

    return kernel


# ------------------------------ wrappers --------------------------------------

def prepare_params(w_mu, w_lv, b_mu, b_lv, alpha, w1, b1, w2, b2):
    """Fuse the two GCN heads and cast weights to bf16 ONCE (outside the step)."""
    bf16 = jnp.bfloat16
    return dict(
        wcat=jnp.concatenate([w_mu, w_lv], axis=1).astype(bf16),
        bcat=jnp.concatenate([b_mu, b_lv], axis=1).astype(jnp.float32),
        alpha=jnp.asarray(alpha, jnp.float32).reshape(()),
        w1=w1.astype(bf16), b1=b1.astype(jnp.float32),
        w2=w2.astype(bf16), b2=b2.astype(jnp.float32),
    )


def gcn_infomax_forward(params, seq1, org_adj, adj, eps, *, tb=128):
    bf16 = jnp.bfloat16
    # squeeze the size-1 batch dimension (glue, not compute); ship big tensors bf16
    x = seq1[0].astype(bf16)
    a = adj[0].astype(bf16)
    oa_f32 = org_adj[0]
    oa = oa_f32.astype(bf16)                 # binary {0,1} -> exact in bf16

    n, ft = x.shape
    assert n % tb == 0, "node count must be a multiple of the node-block size"
    n2 = float(n * n)

    # adjacency statistics hoisted out of the kernel (global, not per-tile)
    s = jnp.sum(oa_f32)
    pos_weight = (n2 - s) / s
    norm = n2 / ((n2 - s) * 2.0)
    scalars = jnp.stack([params["alpha"], pos_weight, norm]).astype(jnp.float32)

    grid = (n // tb, n // tb)
    smem = pl.BlockSpec(memory_space=pltpu.MemorySpace.SMEM)

    def full2d(shape):
        # whole-array VMEM block, constant index -> fetched once, resident
        return pl.BlockSpec(shape, lambda i, j: (0, 0))

    loss = pl.pallas_call(
        _make_gvae_kernel(tb),
        out_shape=jax.ShapeDtypeStruct((1, 1), jnp.float32),
        grid=grid,
        in_specs=[
            smem,                                               # scalars
            full2d(x.shape),                                    # x
            full2d(a.shape),                                    # adj (GCN prop)
            pl.BlockSpec((tb, tb), lambda i, j: (i, j)),        # org_adj block
            full2d(params["wcat"].shape),
            full2d(params["bcat"].shape),
            full2d(eps.shape),
            full2d(params["w1"].shape),
            full2d(params["b1"].shape),
            full2d(params["w2"].shape),
            full2d(params["b2"].shape),
        ],
        out_specs=smem,
        scratch_shapes=[
            pltpu.VMEM((n, ft), jnp.bfloat16),                  # recon
            pltpu.SMEM((2,), jnp.float32),                      # [kl, bce_sum]
        ],
        compiler_params=pltpu.CompilerParams(
            dimension_semantics=("arbitrary", "arbitrary"),
            vmem_limit_bytes=48 * 1024 * 1024,
        ),
    )(scalars, x, a, oa, params["wcat"], params["bcat"], eps,
      params["w1"], params["b1"], params["w2"], params["b2"])
    return loss[0, 0]


# ------------------------------ setup / main ----------------------------------

def xavier_uniform(key, fan_in, fan_out):
    bound = (6.0 / (fan_in + fan_out)) ** 0.5
    return jax.random.uniform(key, (fan_in, fan_out), jnp.float32, -bound, bound)


if __name__ == "__main__":
    key = jax.random.PRNGKey(0)
    # lane-dense small shapes: nodes, ft_size, hid_units; node-block TB=128
    N, FT, HID, TB = 256, 128, 128, 128

    k_feat, k_adj, k_wmu, k_wlv, k_w1, k_w2, k_eps = jax.random.split(key, 7)

    # features: (1, N, FT) as in features[np.newaxis]
    features = jax.random.normal(k_feat, (1, N, FT), jnp.float32)

    # org_adj: binary symmetric adjacency with self-loops, shape (1, N, N)
    a = (jax.random.uniform(k_adj, (N, N)) < 0.1).astype(jnp.float32)
    a = jnp.maximum(a, a.T)
    org_adj = jnp.maximum(a, jnp.eye(N, dtype=jnp.float32))[None]

    # adj: row-normalized adjacency used for GCN propagation, shape (1, N, N)
    deg = jnp.sum(org_adj[0], axis=1, keepdims=True)
    adj_norm = (org_adj[0] / deg)[None]

    # parameters (xavier-uniform Linear weights, zero biases, PReLU alpha = 0.25)
    w_mu = xavier_uniform(k_wmu, FT, HID)
    w_lv = xavier_uniform(k_wlv, FT, HID)
    b_mu = jnp.zeros((1, HID), jnp.float32)
    b_lv = jnp.zeros((1, HID), jnp.float32)
    alpha = jnp.float32(0.25)

    w1 = xavier_uniform(k_w1, HID, HID)
    b1 = jnp.zeros((1, HID), jnp.float32)
    w2 = xavier_uniform(k_w2, HID, FT)
    b2 = jnp.zeros((1, FT), jnp.float32)

    # reparameterization noise (deterministic stand-in for torch.randn_like)
    eps = jax.random.normal(k_eps, (N, HID), jnp.float32)

    params = prepare_params(w_mu, w_lv, b_mu, b_lv, alpha, w1, b1, w2, b2)
    loss = gcn_infomax_forward(params, features, org_adj, adj_norm, eps, tb=TB)
    loss = jax.block_until_ready(loss)
    assert bool(jnp.isfinite(loss)), "loss is not finite"
    print("KERNEL_OK")
</pallas_src>

<mosaic_0001>
module attributes {stable_mosaic.version = 11 : i64} {
  func.func @kernel(%arg0: i32, %arg1: i32, %arg2: memref<3xf32, #tpu.memory_space<smem>>, %arg3: memref<256x128xbf16, #tpu.memory_space<vmem>>, %arg4: memref<256x256xbf16, #tpu.memory_space<vmem>>, %arg5: memref<128x128xbf16, #tpu.memory_space<vmem>>, %arg6: memref<128x256xbf16, #tpu.memory_space<vmem>>, %arg7: memref<1x256xf32, #tpu.memory_space<vmem>>, %arg8: memref<256x128xf32, #tpu.memory_space<vmem>>, %arg9: memref<128x128xbf16, #tpu.memory_space<vmem>>, %arg10: memref<1x128xf32, #tpu.memory_space<vmem>>, %arg11: memref<128x128xbf16, #tpu.memory_space<vmem>>, %arg12: memref<1x128xf32, #tpu.memory_space<vmem>>, %arg13: memref<1x1xf32, #tpu.memory_space<smem>>, %arg14: memref<256x128xbf16, #tpu.memory_space<vmem>>, %arg15: memref<2xf32, #tpu.memory_space<smem>>) attributes {dimension_semantics = [#tpu.dimension_semantics<arbitrary>, #tpu.dimension_semantics<arbitrary>], iteration_bounds = array<i64: 2, 2>, scalar_prefetch = 0 : i64, scratch_operands = 2 : i64, tpu.core_type = #tpu.core_type<tc>, window_params = [{transform_indices = @transform_0, window_bounds = array<i64: 3>}, {pipeline_mode = #tpu.pipeline_mode<synchronous>, transform_indices = @transform_1, window_bounds = array<i64: 256, 128>}, {pipeline_mode = #tpu.pipeline_mode<synchronous>, transform_indices = @transform_2, window_bounds = array<i64: 256, 256>}, {transform_indices = @transform_3, window_bounds = array<i64: 128, 128>}, {pipeline_mode = #tpu.pipeline_mode<synchronous>, transform_indices = @transform_4, window_bounds = array<i64: 128, 256>}, {pipeline_mode = #tpu.pipeline_mode<synchronous>, transform_indices = @transform_5, window_bounds = array<i64: 1, 256>}, {pipeline_mode = #tpu.pipeline_mode<synchronous>, transform_indices = @transform_6, window_bounds = array<i64: 256, 128>}, {pipeline_mode = #tpu.pipeline_mode<synchronous>, transform_indices = @transform_7, window_bounds = array<i64: 128, 128>}, {pipeline_mode = #tpu.pipeline_mode<synchronous>, transform_indices = @transform_8, window_bounds = array<i64: 1, 128>}, {pipeline_mode = #tpu.pipeline_mode<synchronous>, transform_indices = @transform_9, window_bounds = array<i64: 128, 128>}, {pipeline_mode = #tpu.pipeline_mode<synchronous>, transform_indices = @transform_10, window_bounds = array<i64: 1, 128>}, {transform_indices = @transform_11, window_bounds = array<i64: 1, 1>}]} {
    %c0 = arith.constant 0 : index
    %0 = memref.load %arg2[%c0] : memref<3xf32, #tpu.memory_space<smem>>
    %c1 = arith.constant 1 : index
    %1 = memref.load %arg2[%c1] : memref<3xf32, #tpu.memory_space<smem>>
    %c2 = arith.constant 2 : index
    %2 = memref.load %arg2[%c2] : memref<3xf32, #tpu.memory_space<smem>>
    %c0_i32 = arith.constant 0 : i32
    %3 = arith.cmpi eq, %arg0, %c0_i32 : i32
    %c0_i32_0 = arith.constant 0 : i32
    %4 = arith.cmpi eq, %arg1, %c0_i32_0 : i32
    %5 = arith.andi %3, %4 : i1
    %6 = arith.extui %5 : i1 to i32
    %c0_i32_1 = arith.constant 0 : i32
    %7 = arith.cmpi ne, %6, %c0_i32_1 : i32
    scf.if %7 {
      %c0_17 = arith.constant 0 : index
      %c0_18 = arith.constant 0 : index
      %49 = vector.load %arg3[%c0_17, %c0_18] : memref<256x128xbf16, #tpu.memory_space<vmem>>, vector<256x128xbf16>
      %c0_19 = arith.constant 0 : index
      %c0_20 = arith.constant 0 : index
      %50 = vector.load %arg6[%c0_19, %c0_20] : memref<128x256xbf16, #tpu.memory_space<vmem>>, vector<128x256xbf16>
      %cst_21 = arith.constant dense<0.000000e+00> : vector<256x256xf32>
      %51 = tpu.matmul %49, %50, %cst_21 {dimension_numbers = #tpu.dot_dimension_numbers<[1], [0], [0], [1], [0, 0, 1, 1], [], []>} : vector<256x128xbf16>, vector<128x256xbf16>, vector<256x256xf32> -> vector<256x256xf32>
      %c0_22 = arith.constant 0 : index
      %c0_23 = arith.constant 0 : index
      %52 = vector.load %arg4[%c0_22, %c0_23] : memref<256x256xbf16, #tpu.memory_space<vmem>>, vector<256x256xbf16>
      %53 = arith.truncf %51 : vector<256x256xf32> to vector<256x256xbf16>
      %cst_24 = arith.constant dense<0.000000e+00> : vector<256x256xf32>
      %54 = tpu.matmul %52, %53, %cst_24 {dimension_numbers = #tpu.dot_dimension_numbers<[1], [0], [0], [1], [0, 0, 1, 1], [], []>} : vector<256x256xbf16>, vector<256x256xbf16>, vector<256x256xf32> -> vector<256x256xf32>
      %c0_25 = arith.constant 0 : index
      %c0_26 = arith.constant 0 : index
      %55 = vector.load %arg7[%c0_25, %c0_26] : memref<1x256xf32, #tpu.memory_space<vmem>>, vector<1x256xf32>
      %56 = vector.broadcast %55 : vector<1x256xf32> to vector<256x256xf32>
      %57 = arith.addf %54, %56 : vector<256x256xf32>
      %cst_27 = arith.constant 0.000000e+00 : f32
      %58 = vector.broadcast %cst_27 : f32 to vector<256x256xf32>
      %59 = arith.cmpf ogt, %57, %58 : vector<256x256xf32>
      %60 = vector.broadcast %0 : f32 to vector<256x256xf32>
      %61 = arith.mulf %60, %57 : vector<256x256xf32>
      %62 = arith.select %59, %57, %61 : vector<256x256xi1>, vector<256x256xf32>
      %63 = vector.extract_strided_slice %62 {offsets = [0, 0], sizes = [256, 128], strides = [1, 1]} : vector<256x256xf32> to vector<256x128xf32>
      %64 = vector.extract_strided_slice %62 {offsets = [0, 128], sizes = [256, 128], strides = [1, 1]} : vector<256x256xf32> to vector<256x128xf32>
      %65 = math.exp %64 : vector<256x128xf32>
      %cst_28 = arith.constant 2.000000e+00 : f32
      %66 = vector.broadcast %cst_28 : f32 to vector<256x128xf32>
      %67 = arith.mulf %66, %64 : vector<256x128xf32>
      %cst_29 = arith.constant 1.000000e+00 : f32
      %68 = vector.broadcast %cst_29 : f32 to vector<256x128xf32>
      %69 = arith.addf %68, %67 : vector<256x128xf32>
      %70 = arith.mulf %63, %63 : vector<256x128xf32>
      %71 = arith.subf %69, %70 : vector<256x128xf32>
      %72 = arith.mulf %65, %65 : vector<256x128xf32>
      %73 = arith.subf %71, %72 : vector<256x128xf32>
      %74 = vector.shape_cast %73 : vector<256x128xf32> to vector<1x256x128xf32>
      %cst_30 = arith.constant dense<0.000000e+00> : vector<1xf32>
      %75 = vector.multi_reduction <add>, %74, %cst_30 [1, 2] : vector<1x256x128xf32> to vector<1xf32>
      %76 = vector.shape_cast %75 : vector<1xf32> to vector<1x1x1xf32>
      %77 = vector.extract %76[0, 0, 0] : f32 from vector<1x1x1xf32>
      %cst_31 = arith.constant 2.560000e+02 : f32
      %78 = arith.divf %77, %cst_31 : f32
      %cst_32 = arith.constant -5.000000e-01 : f32
      %79 = arith.mulf %cst_32, %78 : f32
      %c0_33 = arith.constant 0 : index
      %c0_34 = arith.constant 0 : index
      %80 = vector.load %arg8[%c0_33, %c0_34] : memref<256x128xf32, #tpu.memory_space<vmem>>, vector<256x128xf32>
      %81 = arith.mulf %80, %65 : vector<256x128xf32>
      %82 = arith.addf %81, %63 : vector<256x128xf32>
      %83 = arith.truncf %82 : vector<256x128xf32> to vector<256x128xbf16>
      %c0_35 = arith.constant 0 : index
      %c0_36 = arith.constant 0 : index
      %84 = vector.load %arg9[%c0_35, %c0_36] : memref<128x128xbf16, #tpu.memory_space<vmem>>, vector<128x128xbf16>
      %cst_37 = arith.constant dense<0.000000e+00> : vector<256x128xf32>
      %85 = tpu.matmul %83, %84, %cst_37 {dimension_numbers = #tpu.dot_dimension_numbers<[1], [0], [0], [1], [0, 0, 1, 1], [], []>} : vector<256x128xbf16>, vector<128x128xbf16>, vector<256x128xf32> -> vector<256x128xf32>
      %c0_38 = arith.constant 0 : index
      %c0_39 = arith.constant 0 : index
      %86 = vector.load %arg10[%c0_38, %c0_39] : memref<1x128xf32, #tpu.memory_space<vmem>>, vector<1x128xf32>
      %87 = vector.broadcast %86 : vector<1x128xf32> to vector<256x128xf32>
      %88 = arith.addf %85, %87 : vector<256x128xf32>
      %cst_40 = arith.constant 0.000000e+00 : f32
      %89 = vector.broadcast %cst_40 : f32 to vector<256x128xf32>
      %90 = arith.maximumf %88, %89 : vector<256x128xf32>
      %91 = arith.truncf %90 : vector<256x128xf32> to vector<256x128xbf16>
      %c0_41 = arith.constant 0 : index
      %c0_42 = arith.constant 0 : index
      %92 = vector.load %arg11[%c0_41, %c0_42] : memref<128x128xbf16, #tpu.memory_space<vmem>>, vector<128x128xbf16>
      %cst_43 = arith.constant dense<0.000000e+00> : vector<256x128xf32>
      %93 = tpu.matmul %91, %92, %cst_43 {dimension_numbers = #tpu.dot_dimension_numbers<[1], [0], [0], [1], [0, 0, 1, 1], [], []>} : vector<256x128xbf16>, vector<128x128xbf16>, vector<256x128xf32> -> vector<256x128xf32>
      %c0_44 = arith.constant 0 : index
      %c0_45 = arith.constant 0 : index
      %94 = vector.load %arg12[%c0_44, %c0_45] : memref<1x128xf32, #tpu.memory_space<vmem>>, vector<1x128xf32>
      %95 = vector.broadcast %94 : vector<1x128xf32> to vector<256x128xf32>
      %96 = arith.addf %93, %95 : vector<256x128xf32>
      %97 = arith.truncf %96 : vector<256x128xf32> to vector<256x128xbf16>
      %c0_46 = arith.constant 0 : index
      %c0_47 = arith.constant 0 : index
      %98 = vector.load %arg14[%c0_46, %c0_47] : memref<256x128xbf16, #tpu.memory_space<vmem>>, vector<256x128xbf16>
      tpu.vector_store %arg14[%c0_46, %c0_47], %97 {strides = array<i32>} : memref<256x128xbf16, #tpu.memory_space<vmem>>, vector<256x128xbf16>,
      %c0_48 = arith.constant 0 : index
      %99 = memref.load %arg15[%c0_48] : memref<2xf32, #tpu.memory_space<smem>>
      memref.store %79, %arg15[%c0_48] : memref<2xf32, #tpu.memory_space<smem>>
      %cst_49 = arith.constant 0.000000e+00 : f32
      %c1_50 = arith.constant 1 : index
      %100 = memref.load %arg15[%c1_50] : memref<2xf32, #tpu.memory_space<smem>>
      memref.store %cst_49, %arg15[%c1_50] : memref<2xf32, #tpu.memory_space<smem>>
    } else {
    }
    %c128_i32 = arith.constant 128 : i32
    %8 = arith.muli %arg0, %c128_i32 : i32
    %9 = tpu.assume_multiple %8, 128 : i32
    %10 = arith.index_cast %9 : i32 to index
    %c0_2 = arith.constant 0 : index
    %11 = vector.load %arg14[%10, %c0_2] : memref<256x128xbf16, #tpu.memory_space<vmem>>, vector<128x128xbf16>
    %c128_i32_3 = arith.constant 128 : i32
    %12 = arith.muli %arg1, %c128_i32_3 : i32
    %13 = tpu.assume_multiple %12, 128 : i32
    %14 = arith.index_cast %13 : i32 to index
    %c0_4 = arith.constant 0 : index
    %15 = vector.load %arg14[%14, %c0_4] : memref<256x128xbf16, #tpu.memory_space<vmem>>, vector<128x128xbf16>
    %cst = arith.constant dense<0.000000e+00> : vector<128x128xf32>
    %16 = tpu.matmul %11, %15, %cst {dimension_numbers = #tpu.dot_dimension_numbers<[1], [1], [0], [0], [0, 0, 1, 0], [], []>} : vector<128x128xbf16>, vector<128x128xbf16>, vector<128x128xf32> -> vector<128x128xf32>
    %cst_5 = arith.constant 0.000000e+00 : f32
    %17 = vector.broadcast %cst_5 : f32 to vector<128x128xf32>
    %18 = arith.subf %17, %16 : vector<128x128xf32>
    %19 = math.exp %18 : vector<128x128xf32>
    %cst_6 = arith.constant 1.000000e+00 : f32
    %20 = vector.broadcast %cst_6 : f32 to vector<128x128xf32>
    %21 = arith.addf %20, %19 : vector<128x128xf32>
    %22 = tpu.reciprocal %21 {approx = true} : vector<128x128xf32> -> vector<128x128xf32>
    %c0_7 = arith.constant 0 : index
    %c0_8 = arith.constant 0 : index
    %23 = vector.load %arg5[%c0_7, %c0_8] : memref<128x128xbf16, #tpu.memory_space<vmem>>, vector<128x128xbf16>
    %24 = arith.extf %23 : vector<128x128xbf16> to vector<128x128xf32>
    %cst_9 = arith.constant 1.000000e+00 : f32
    %25 = vector.broadcast %cst_9 : f32 to vector<128x128xf32>
    %26 = arith.subf %25, %24 : vector<128x128xf32>
    %cst_10 = arith.constant 0.000000e+00 : f32
    %27 = vector.broadcast %cst_10 : f32 to vector<128x128xf32>
    %28 = arith.subf %27, %22 : vector<128x128xf32>
    %29 = math.exp %28 : vector<128x128xf32>
    %30 = math.log1p %29 : vector<128x128xf32>
    %c1_11 = arith.constant 1 : index
    %31 = memref.load %arg15[%c1_11] : memref<2xf32, #tpu.memory_space<smem>>
    %32 = vector.broadcast %1 : f32 to vector<128x128xf32>
    %33 = arith.mulf %32, %24 : vector<128x128xf32>
    %34 = arith.addf %33, %26 : vector<128x128xf32>
    %35 = arith.mulf %30, %34 : vector<128x128xf32>
    %36 = arith.mulf %26, %22 : vector<128x128xf32>
    %37 = arith.addf %35, %36 : vector<128x128xf32>
    %38 = vector.shape_cast %37 : vector<128x128xf32> to vector<1x128x128xf32>
    %cst_12 = arith.constant dense<0.000000e+00> : vector<1xf32>
    %39 = vector.multi_reduction <add>, %38, %cst_12 [1, 2] : vector<1x128x128xf32> to vector<1xf32>
    %40 = vector.shape_cast %39 : vector<1xf32> to vector<1x1x1xf32>
    %41 = vector.extract %40[0, 0, 0] : f32 from vector<1x1x1xf32>
    %42 = arith.addf %31, %41 : f32
    %c1_13 = arith.constant 1 : index
    %43 = memref.load %arg15[%c1_13] : memref<2xf32, #tpu.memory_space<smem>>
    memref.store %42, %arg15[%c1_13] : memref<2xf32, #tpu.memory_space<smem>>
    %c1_i32 = arith.constant 1 : i32
    %44 = arith.cmpi eq, %arg0, %c1_i32 : i32
    %c1_i32_14 = arith.constant 1 : i32
    %45 = arith.cmpi eq, %arg1, %c1_i32_14 : i32
    %46 = arith.andi %44, %45 : i1
    %47 = arith.extui %46 : i1 to i32
    %cst_15 = arith.constant 6.553600e+04 : f32
    %c0_i32_16 = arith.constant 0 : i32
    %48 = arith.cmpi ne, %47, %c0_i32_16 : i32
    scf.if %48 {
      %c0_17 = arith.constant 0 : index
      %49 = memref.load %arg15[%c0_17] : memref<2xf32, #tpu.memory_space<smem>>
      %c1_18 = arith.constant 1 : index
      %50 = memref.load %arg15[%c1_18] : memref<2xf32, #tpu.memory_space<smem>>
      %51 = arith.divf %50, %cst_15 : f32
      %52 = arith.mulf %2, %51 : f32
      %53 = arith.addf %49, %52 : f32
      %c0_19 = arith.constant 0 : index
      %c0_20 = arith.constant 0 : index
      %54 = memref.load %arg13[%c0_19, %c0_20] : memref<1x1xf32, #tpu.memory_space<smem>>
      memref.store %53, %arg13[%c0_19, %c0_20] : memref<1x1xf32, #tpu.memory_space<smem>>
    } else {
    }
    return
  }
  func.func @transform_0(%arg0: i32, %arg1: i32) -> i32 {
    %c0_i32 = arith.constant 0 : i32
    %c0_i32_0 = arith.constant 0 : i32
    return %c0_i32 : i32
  }
  func.func @transform_1(%arg0: i32, %arg1: i32) -> (i32, i32) {
    %c0_i32 = arith.constant 0 : i32
    %c0_i32_0 = arith.constant 0 : i32
    %c0_i32_1 = arith.constant 0 : i32
    return %c0_i32, %c0_i32_0 : i32, i32
  }
  func.func @transform_2(%arg0: i32, %arg1: i32) -> (i32, i32) {
    %c0_i32 = arith.constant 0 : i32
    %c0_i32_0 = arith.constant 0 : i32
    %c0_i32_1 = arith.constant 0 : i32
    return %c0_i32, %c0_i32_0 : i32, i32
  }
  func.func @transform_3(%arg0: i32, %arg1: i32) -> (i32, i32) {
    %c0_i32 = arith.constant 0 : i32
    return %arg0, %arg1 : i32, i32
  }
  func.func @transform_4(%arg0: i32, %arg1: i32) -> (i32, i32) {
    %c0_i32 = arith.constant 0 : i32
    %c0_i32_0 = arith.constant 0 : i32
    %c0_i32_1 = arith.constant 0 : i32
    return %c0_i32, %c0_i32_0 : i32, i32
  }
  func.func @transform_5(%arg0: i32, %arg1: i32) -> (i32, i32) {
    %c0_i32 = arith.constant 0 : i32
    %c0_i32_0 = arith.constant 0 : i32
    %c0_i32_1 = arith.constant 0 : i32
    return %c0_i32, %c0_i32_0 : i32, i32
  }
  func.func @transform_6(%arg0: i32, %arg1: i32) -> (i32, i32) {
    %c0_i32 = arith.constant 0 : i32
    %c0_i32_0 = arith.constant 0 : i32
    %c0_i32_1 = arith.constant 0 : i32
    return %c0_i32, %c0_i32_0 : i32, i32
  }
  func.func @transform_7(%arg0: i32, %arg1: i32) -> (i32, i32) {
    %c0_i32 = arith.constant 0 : i32
    %c0_i32_0 = arith.constant 0 : i32
    %c0_i32_1 = arith.constant 0 : i32
    return %c0_i32, %c0_i32_0 : i32, i32
  }
  func.func @transform_8(%arg0: i32, %arg1: i32) -> (i32, i32) {
    %c0_i32 = arith.constant 0 : i32
    %c0_i32_0 = arith.constant 0 : i32
    %c0_i32_1 = arith.constant 0 : i32
    return %c0_i32, %c0_i32_0 : i32, i32
  }
  func.func @transform_9(%arg0: i32, %arg1: i32) -> (i32, i32) {
    %c0_i32 = arith.constant 0 : i32
    %c0_i32_0 = arith.constant 0 : i32
    %c0_i32_1 = arith.constant 0 : i32
    return %c0_i32, %c0_i32_0 : i32, i32
  }
  func.func @transform_10(%arg0: i32, %arg1: i32) -> (i32, i32) {
    %c0_i32 = arith.constant 0 : i32
    %c0_i32_0 = arith.constant 0 : i32
    %c0_i32_1 = arith.constant 0 : i32
    return %c0_i32, %c0_i32_0 : i32, i32
  }
  func.func @transform_11(%arg0: i32, %arg1: i32) -> (i32, i32) {
    %c0_i32 = arith.constant 0 : i32
    %c0_i32_0 = arith.constant 0 : i32
    %c0_i32_1 = arith.constant 0 : i32
    return %c0_i32, %c0_i32_0 : i32, i32
  }
}

</mosaic_0001>

<bundles_post_ra>
// kernel: tpu_custom_call.1
= control target key start
LH: loop header
LB: loop body
LE: loop exit
PB: predicated region body
PF: predicated region fallthrough
CT: control target
= control target key end

     0   :  { %s5954_s0 = inlined_call_operand.hbm [shape: f32[3], index: 0, kind: input, shape index: {}]   ;;  %s5955_s1 = inlined_call_operand.hbm [shape: bf16[256,128], index: 1, kind: input, shape index: {}]   ;;  %s5956_s2 = inlined_call_operand.hbm [shape: bf16[256,256], index: 2, kind: input, shape index: {}]   ;;  %s5957_s3 = inlined_call_operand.hbm [shape: bf16[256,256], index: 3, kind: input, shape index: {}]   ;;  %s5958_s4 = inlined_call_operand.hbm [shape: bf16[128,256], index: 4, kind: input, shape index: {}]   ;;  %s5959_s5 = inlined_call_operand.vmem [shape: f32[1,256], index: 5, kind: input, shape index: {}]   ;;  %s5960_s6 = inlined_call_operand.hbm [shape: f32[256,128], index: 6, kind: input, shape index: {}]   ;;  %s5961_s7 = inlined_call_operand.hbm [shape: bf16[128,128], index: 7, kind: input, shape index: {}]   ;;  %s5962_s8 = inlined_call_operand.vmem [shape: f32[1,128], index: 8, kind: input, shape index: {}]   ;;  %s5963_s9 = inlined_call_operand.hbm [shape: bf16[128,128], index: 9, kind: input, shape index: {}]   ;;  %s5964_s10 = inlined_call_operand.vmem [shape: f32[1,128], index: 10, kind: input, shape index: {}]   ;;  %s5965_s11 = inlined_call_operand.hbm [shape: f32[1,1], index: 11, kind: output, shape index: {}]  }
   0x1   :  { %5974 = sst [smem:[#allocation29_spill]] %s5954_s0 }
   0x2   :  { %5975 = sst [smem:[#allocation30_spill]] %s5955_s1 }
   0x3   :  { %5976 = sst [smem:[#allocation31_spill]] %s5956_s2 }
   0x4   :  { %5977 = sst [smem:[#allocation32_spill]] %s5958_s4 }
   0x5   :  { %5978 = sst [smem:[#allocation33_spill]] %s5959_s5 }
   0x6   :  { %5979 = sst [smem:[#allocation34_spill]] %s5960_s6 }
   0x7   :  { %5980 = sst [smem:[#allocation35_spill]] %s5961_s7 }
   0x8   :  { %5981 = sst [smem:[#allocation36_spill]] %s5962_s8 }
   0x9   :  { %5982 = sst [smem:[#allocation37_spill]] %s5963_s9 }
   0xa   :  { %5983 = sst [smem:[#allocation38_spill]] %s5964_s10 }
   0xb   :  { %5984 = sst [smem:[#allocation39_spill]] %s5965_s11 }
   0xc   :  { %16 = vsyncpa [#allocation6], 0 }
   0xd   :  { %17 = vsyncpa [#allocation5], 0 }
   0xe   :  { %18 = vsyncpa [#allocation10], 0 }
   0xf   :  { %19 = vsyncpa [#allocation14], 0 }
  0x10   :  { %20 = vsyncpa [#allocation17], 0 }
  0x11   :  { %21 = vsyncpa [#allocation7], 0  ;;  %s4790_s17 = smov 0   ;;  %s4792_s18 = smov 0  }
  0x12   :  { %s4794_s19 = smov 0   ;;  %s4796_s20 = smov 0  }
  0x13   :  { %s4798_s21 = smov 0   ;;  %s4800_s22 = smov 0  }
  0x14   :  { %s4802_s23 = smov 0   ;;  %s4804_s24 = smov 0  }
  0x15 LB: > { %s5985_s1 = sld [smem:[#allocation30_spill]]  ;;  %s4834_s28 = sadd.s32 4294967295, %s4713_s24   ;;  %s4713_s24 = sphi %s4804_s24, %s27_s24   ;;  %s4709_s23 = sphi %s4802_s23, %s6041_s23   ;;  %s4705_s22 = sphi %s4800_s22, %s6040_s22   ;;  %s4701_s21 = sphi %s4798_s21, %s6039_s21   ;;  %s4697_s20 = sphi %s4796_s20, %s6038_s20   ;;  %s4693_s19 = sphi %s4794_s19, %s6037_s19   ;;  %s4689_s18 = sphi %s4792_s18, %s6036_s18   ;;  %s4685_s17 = sphi %s4790_s17, %s6035_s17  }
  0x16   : > { %p3344_p0 = scmp.ge.s32.totalorder %s4713_s24, 1  ;;  %p125_p1 = scmp.eq.s32.totalorder %s4834_s28, 0 }
  0x17   : > { %p303_p2 = scmp.lt.s32.totalorder %s4713_s24, 5  ;;  %s4715_s30 = smov [#allocation8]  }
  0x18   : > { %s326_s12 = sshll.u32 %s4715_s30, 4  ;;  %s5987_s2 = sld [smem:[#allocation31_spill]]  ;;  %s327_s12 = int_to_ptr.vmem [resolvable:$true] %s326_s12 }
  0x19   : > { %p4839_p3 = pnand %p3344_p0, %p303_p2  ;;  %s4716_s25 = smov [#allocation9]  }
  0x1a   : > { %s340_s26 = sshll.u32 %s4716_s25, 4  ;;  %s5969_s30 = smov 4   ;;  %s341_s26 = int_to_ptr.vmem [resolvable:$true] %s340_s26 }
  0x1b   : > { %s324_s27 = sshll.u32 %s5985_s1, 4  ;;  %p4059_p4 = pneg %p4839_p3  ;;  %s325_s27 = int_to_ptr.hbm [resolvable:$true] %s324_s27 }
  0x1c   : > { %s5967_s1 = smov 64   ;;  %s5971_s13 = smov 128  }
  0x1d   : > { %p4850_p5 = pnand %p4059_p4, %p125_p1  ;;  %s4720_s14 = smov 8  }
  0x1e   : > { %s338_s15 = sshll.u32 %s5987_s2, 4  ;;  %s5989_s6 = sld [smem:[#allocation34_spill]]  ;;  %s339_s15 = int_to_ptr.hbm [resolvable:$true] %s338_s15 }
  0x1f   : > { %4065 = dma.hbm_to_vmem [thread:$0]  (!%p4850_p5), %s325_s27, 2048, %s327_s12, [#allocation5], %s5967_s1, %s5967_s1, %s5969_s30  }
  0x20   : > { %4068 = dma.hbm_to_vmem [thread:$0]  (!%p4850_p5), %s339_s15, 4096, %s341_s26, [#allocation10], %s5971_s13, %s5971_s13, %s4720_s14  }
  0x21   : > { %s4721_s25 = smov [#allocation13]   ;;  %s5990_s0 = sld [smem:[#allocation29_spill]] }
  0x22   : > { %s371_s8 = sshll.u32 %s4721_s25, 4  ;;  %s4722_s15 = smov [#allocation4]   ;;  %s372_s8 = int_to_ptr.vmem [resolvable:$true] %s371_s8 }
  0x23   : > { %s5991_s4 = sld [smem:[#allocation32_spill]]  ;;  %s4723_s25 = smov [#allocation12]  }
  0x24   : > { %s369_s10 = sshll.u32 %s5989_s6, 4  ;;  %s354_s30 = sshll.u32 %s4723_s25, 4  ;;  %s370_s10 = int_to_ptr.hbm [resolvable:$true] %s369_s10  ;;  %s355_s30 = int_to_ptr.vmem [resolvable:$true] %s354_s30 }
  0x25   : > { %4074 = dma.hbm_to_vmem [thread:$0]  (!%p4850_p5), %s370_s10, 4096, %s372_s8, [#allocation14], %s5971_s13, %s5971_s13, %s4720_s14  }
  0x26   : > { %s5992_s7 = sld [smem:[#allocation35_spill]]  ;;  %s5994_s25 = smov 4  }
  0x27   : > { %s315_s1 = sshll.u32 %s5990_s0, 4  ;;  %s5993_s9 = sld [smem:[#allocation37_spill]]  ;;  %s316_s1 = int_to_ptr.hbm [resolvable:$true] %s315_s1 }
  0x28   : > { %4062 = dma.hbm_to_smem (!%p4850_p5), %s316_s1, 16, %s4722_s15, [#allocation6]  }
  0x29   : > { %s352_s26 = sshll.u32 %s5991_s4, 4  ;;  %s4724_s1 = smov [#allocation15]   ;;  %s353_s26 = int_to_ptr.hbm [resolvable:$true] %s352_s26 }
  0x2a   : > { %4071 = dma.hbm_to_vmem [thread:$0]  (!%p4850_p5), %s353_s26, 2048, %s355_s30, [#allocation10], %s5971_s13, %s5971_s13, %s4720_s14  }
  0x2b   : > { %s385_s12 = sshll.u32 %s4724_s1, 4  ;;  %s5995_s8 = smov 64   ;;  %s386_s12 = int_to_ptr.vmem [resolvable:$true] %s385_s12 }
  0x2c   : > { %s383_s27 = sshll.u32 %s5992_s7, 4  ;;  %s4725_s30 = smov [#allocation16]   ;;  %s384_s27 = int_to_ptr.hbm [resolvable:$true] %s383_s27 }
  0x2d   : > { %s400_s11 = sshll.u32 %s5993_s9, 4  ;;  %s402_s14 = sshll.u32 %s4725_s30, 4  ;;  %s401_s11 = int_to_ptr.hbm [resolvable:$true] %s400_s11  ;;  %s403_s14 = int_to_ptr.vmem [resolvable:$true] %s402_s14 }
  0x2e   : > { %4077 = dma.hbm_to_vmem [thread:$0]  (!%p4850_p5), %s384_s27, 1024, %s386_s12, [#allocation14], %s5995_s8, %s5995_s8, %s5994_s25  }
  0x2f   : > { %4080 = dma.hbm_to_vmem [thread:$0]  (!%p4850_p5), %s401_s11, 1024, %s403_s14, [#allocation17], %s5995_s8, %s5995_s8, %s5994_s25  }
  0x30   : > { %s36_s26 = sadd.s32 1, %s4705_s22  ;;  %s39_s10 = sadd.s32 1, %s4709_s23 }
  0x31   : > { %p37_p6 = scmp.ge.s32.totalorder %s36_s26, 2  ;;  %s111_s1 = sadd.s32 1, %s4693_s19 }
  0x32   : > { %p118_p7 = scmp.ne.s32.totalorder %s4693_s19, %s4689_s18  ;;  %p119_p8 = scmp.eq.s32.totalorder %s4713_s24, 0 }
  0x33   : > { %s6043_s26 = smov (%p37_p6, %s36_s26), 0  ;;  %s6045_s10 = smov (!%p37_p6, %s39_s10), %s4709_s23 }
  0x34   : > { %5996 = sst [smem:[#allocation27_spill]] %s6043_s26  ;;  %s107_s16 = ssub.s32 %s4705_s22, %s6043_s26 }
  0x35   : > { %p41_p9 = scmp.ge.s32.totalorder %s6045_s10, 2  ;;  %p124_p10 = scmp.ne.s32.totalorder %s4689_s18, %s4685_s17 }
  0x36   : > { %p4911_p11 = por %p119_p8, %p118_p7  ;;  %p4092_p12 = scmp.lt.s32.totalorder %s4713_s24, 4 }
  0x37   : > { %s6047_s10 = smov (%p41_p9, %s6045_s10), 0  ;;  %p4920_p13 = por %p125_p1, %p124_p10 }
  0x38   : > { %5998 = sst [smem:[#allocation28_spill]] %s6047_s10  ;;  %s419_s15 = sand.u32 1, %s4713_s24  }
  0x39   : > { %s106_s2 = ssub.s32 %s4709_s23, %s6047_s10  ;;  %s421_s30 = sand.u32 1, %s4693_s19  }
  0x3a   : > { %s108_s11 = sor.u32 %s107_s16, %s106_s2  ;;  %s3353_s17 = sshll.u32 %s421_s30, 6 }
  0x3b   : > { %p109_p0 = scmp.eq.s32.totalorder %s108_s11, 0  ;;  %s3762_s14 = sshll.u32 %s4709_s23, 5 }
  0x3c   : > { %s428_s0 = sadd.s32 %s4705_s22, %s3762_s14  ;;  %s423_s4 = scalar_lea.vmem [#allocation11], %s3353_s17 }
  0x3d   : > { %s4930_s13 = scalar_select %p109_p0, %s4693_s19, %s111_s1  }
  0x3e   : > { %s433_s6 = sshll.u32 %s423_s4, 4  ;;  %s3356_s7 = sshll.u32 %s428_s0, 2  ;;  %s434_s6 = int_to_ptr.vmem [resolvable:$true] %s433_s6 }
  0x3f   : > { %s430_s5 = scalar_lea.hbm %s5957_s3, %s3356_s7  ;;  %p4082_p2 = pnand %p4092_p12, %p4911_p11 }
  0x40   : > { %s431_s10 = sshll.u32 %s430_s5, 4  ;;  %s420_s16 = scalar_lea.sflag [#allocation5], %s419_s15  ;;  %s432_s10 = int_to_ptr.hbm [resolvable:$true] %s431_s10 }
  0x41   : > { %s6000_s2 = smov 128   ;;  %445 = sbr.rel (%p4839_p3) target bundleno = 1804 (0x70c), region = 64 }
  0x42   : > { %4084 = dma.hbm_to_vmem [thread:$0]  (!%p4082_p2), %s432_s10, 1024, %s434_s6, %s420_s16, %s6000_s2, %s5995_s8, %s5994_s25  }
  0x46   : > { %4652 = dma.done.wait (%p125_p1), [#allocation6], 16  }
  0x47   : > { %4654 = vsyncadd (%p125_p1), [#allocation6], 4294967280 }
  0x48   : > { %4656 = dma.done.wait (%p125_p1), [#allocation5], 2048  }
  0x49   : > { %4658 = vsyncadd (%p125_p1), [#allocation5], 4294965248 }
  0x4a   : > { %4660 = dma.done.wait (%p125_p1), [#allocation10], 4096  }
  0x4b   : > { %4662 = vsyncadd (%p125_p1), [#allocation10], 4294963200  ;;  %s462_s0 = sand.u32 1, %s4834_s28   ;;  %s464_s4 = sand.u32 1, %s4689_s18  }
  0x4c   : > { %s3361_s5 = sshll.u32 %s464_s4, 6  ;;  %s463_s6 = scalar_lea.sflag [#allocation5], %s462_s0 }
  0x4d   : > { %s4959_s7 = scalar_lea.vmem [#allocation11], %s3361_s5 }
  0x4e   : > { %4664 = dma.done.wait (%p4920_p13), %s463_s6, 1024  }
  0x4f   : > { %4666 = vsyncadd (%p4920_p13), %s463_s6, 4294966272 }
  0x50   : > { %4668 = dma.done.wait (%p125_p1), [#allocation10], 2048  }
  0x51   : > { %4670 = vsyncadd (%p125_p1), [#allocation10], 4294965248 }
  0x52   : > { %4672 = dma.done.wait (%p125_p1), [#allocation14], 5120  }
  0x53   : > { %4674 = vsyncadd (%p125_p1), [#allocation14], 4294962176 }
  0x54   : > { %4676 = dma.done.wait (%p125_p1), [#allocation17], 1024  }
  0x55   : > { %4678 = vsyncadd (%p125_p1), [#allocation17], 4294966272 }
  0x56   : > { %492 = sfence }
  0x57   : > { %s4977_s9 = sld [smem:[#allocation4]]  ;;  %p526_p3 = scmp.eq.s32.totalorder %s4701_s21, 0 }
  0x58   : > { %s4980_s29 = sld [smem:[#allocation4 + $0x1]]  ;;  %p527_p4 = scmp.eq.s32.totalorder %s4697_s20, 0 }
  0x59   : > { %s4983_s25 = sld [smem:[#allocation4 + $0x2]] }
  0x5a   : > { %p528_p5 = pnand %p527_p4, %p526_p3 }
  0x5b   : > { %s6001_s10 = sld [smem:[#allocation33_spill]] (!%p528_p5)  ;;  %s4727_s16 = smov (!%p528_p5), 0.0  }
  0x5c   : > { %531 = sbr.rel (%p528_p5) target bundleno = 1224 (0x4c8), region = 100  ;;  %s6002_s12 = sld [smem:[#allocation36_spill]] (!%p528_p5) }
  0x5d   : > { %s6003_s30 = sld [smem:[#allocation38_spill]] (!%p528_p5) }
  0x5e   : > { %2560 = sst [smem:[#allocation3 + $0x1]] (!%p528_p5), %s4727_s16 }
  0x61   : > { %v3793_v0 = vld [vmem:[#allocation12 + $0x74] sm:$0xf]  ;;  %v3492_v1 = vld [vmem:[#allocation12 + $0x78] sm:$0xf0]  ;;  %v3490_v2 = vld [vmem:[#allocation12 + $0x70] sm:$0xf] }
  0x62   : > { %v3495_v3 = vor.u32 %v3793_v0, %v3492_v1  ;;  %v3794_v4 = vld [vmem:[#allocation12 + $0x74] sm:$0xf0]  ;;  %v3791_v5 = vld [vmem:[#allocation12 + $0x64] sm:$0xf]  ;;  %v3484_v6 = vld [vmem:[#allocation12 + $0x68] sm:$0xf0] }
  0x63   : > { %v3491_v7 = vor.u32 %v3794_v4, %v3490_v2  ;;  %v3482_v8 = vld [vmem:[#allocation12 + $0x60] sm:$0xf]  ;;  %v3792_v9 = vld [vmem:[#allocation12 + $0x64] sm:$0xf0]  ;;  %v3487_v10 = vor.u32 %v3791_v5, %v3484_v6  ;;  %v3789_v12 = vld [vmem:[#allocation12 + $0x54] sm:$0xf] }
  0x64   : > { %845 = vmatpush.bf16.msra.mxu1 %v3495_v3  ;;  %v3483_v11 = vor.u32 %v3792_v9, %v3482_v8  ;;  %v3476_v13 = vld [vmem:[#allocation12 + $0x58] sm:$0xf0]  ;;  %v3474_v14 = vld [vmem:[#allocation12 + $0x50] sm:$0xf]  ;;  %v3790_v15 = vld [vmem:[#allocation12 + $0x54] sm:$0xf0] }
  0x65   : > { %756 = vmatpush.bf16.msra.mxu0 %v3491_v7  ;;  %v3479_v16 = vor.u32 %v3789_v12, %v3476_v13  ;;  %v3475_v17 = vor.u32 %v3790_v15, %v3474_v14  ;;  %v3787_v18 = vld [vmem:[#allocation12 + $0x44] sm:$0xf]  ;;  %v3468_v19 = vld [vmem:[#allocation12 + $0x48] sm:$0xf0]  ;;  %v3466_v20 = vld [vmem:[#allocation12 + $0x40] sm:$0xf] }
  0x66   : > { %v3788_v21 = vld [vmem:[#allocation12 + $0x44] sm:$0xf0]  ;;  %v3471_v22 = vor.u32 %v3787_v18, %v3468_v19  ;;  %v3785_v24 = vld [vmem:[#allocation12 + $0x34] sm:$0xf]  ;;  %v3460_v25 = vld [vmem:[#allocation12 + $0x38] sm:$0xf0] }
  0x67   : > { %v3467_v23 = vor.u32 %v3788_v21, %v3466_v20  ;;  %v3458_v26 = vld [vmem:[#allocation12 + $0x30] sm:$0xf]  ;;  %v3786_v27 = vld [vmem:[#allocation12 + $0x34] sm:$0xf0]  ;;  %v3463_v28 = vor.u32 %v3785_v24, %v3460_v25  ;;  %v3783_v30 = vld [vmem:[#allocation12 + $0x24] sm:$0xf] }
  0x68   : > { %846 = vmatpush.bf16.msra.mxu1 %v3487_v10  ;;  %v3459_v29 = vor.u32 %v3786_v27, %v3458_v26  ;;  %v3452_v31 = vld [vmem:[#allocation12 + $0x28] sm:$0xf0]  ;;  %v3450_v32 = vld [vmem:[#allocation12 + $0x20] sm:$0xf]  ;;  %v3784_v33 = vld [vmem:[#allocation12 + $0x24] sm:$0xf0] }
  0x69   : > { %757 = vmatpush.bf16.msra.mxu0 %v3483_v11  ;;  %v3455_v34 = vor.u32 %v3783_v30, %v3452_v31  ;;  %v3451_v35 = vor.u32 %v3784_v33, %v3450_v32  ;;  %v3781_v36 = vld [vmem:[#allocation12 + $0x14] sm:$0xf]  ;;  %v3444_v37 = vld [vmem:[#allocation12 + $0x18] sm:$0xf0]  ;;  %v3442_v38 = vld [vmem:[#allocation12 + $0x10] sm:$0xf] }
  0x6a   : > { %v3782_v39 = vld [vmem:[#allocation12 + $0x14] sm:$0xf0]  ;;  %v3447_v40 = vor.u32 %v3781_v36, %v3444_v37  ;;  %v3779_v42 = vld [vmem:[#allocation12 + $0x4] sm:$0xf]  ;;  %v3436_v43 = vld [vmem:[#allocation12 + $0x8] sm:$0xf0] }
  0x6b   : > { %v3443_v41 = vor.u32 %v3782_v39, %v3442_v38  ;;  %v3434_v44 = vld [vmem:[#allocation12] sm:$0xf]  ;;  %v3780_v45 = vld [vmem:[#allocation12 + $0x4] sm:$0xf0]  ;;  %v3439_v46 = vor.u32 %v3779_v42, %v3436_v43  ;;  %v3765_v50 = vld [vmem:[#allocation8 + $0x10] sm:$0xff] }
  0x6c   : > { %847 = vmatpush.bf16.msra.mxu1 %v3479_v16  ;;  %v3435_v47 = vor.u32 %v3780_v45, %v3434_v44  ;;  %v3763_v48 = vld [vmem:[#allocation8] sm:$0xff]  ;;  %v3764_v49 = vld [vmem:[#allocation8 + $0x8] sm:$0xff]  ;;  %v3766_v51 = vld [vmem:[#allocation8 + $0x18] sm:$0xff] }
  0x6d   : > { %758 = vmatpush.bf16.msra.mxu0 %v3475_v17  ;;  %v3767_v52 = vld [vmem:[#allocation8 + $0x20] sm:$0xff]  ;;  %v3768_v53 = vld [vmem:[#allocation8 + $0x28] sm:$0xff]  ;;  %v3769_v54 = vld [vmem:[#allocation8 + $0x30] sm:$0xff] }
  0x6e   : > { %v3770_v55 = vld [vmem:[#allocation8 + $0x38] sm:$0xff]  ;;  %v3771_v56 = vld [vmem:[#allocation8 + $0x40] sm:$0xff]  ;;  %v3772_v63 = vld [vmem:[#allocation8 + $0x48] sm:$0xff] }
  0x6f   : > { %v3773_v6 = vld [vmem:[#allocation8 + $0x50] sm:$0xff]  ;;  %v3774_v13 = vld [vmem:[#allocation8 + $0x58] sm:$0xff]  ;;  %v3775_v20 = vld [vmem:[#allocation8 + $0x60] sm:$0xff] }
  0x70   : > { %848 = vmatpush.bf16.msra.mxu1 %v3471_v22  ;;  %v3776_v25 = vld [vmem:[#allocation8 + $0x68] sm:$0xff]  ;;  %v3777_v30 = vld [vmem:[#allocation8 + $0x70] sm:$0xff] }
  0x71   : > { %759 = vmatpush.bf16.msra.mxu0 %v3467_v23 }
  0x74   : > { %849 = vmatpush.bf16.msra.mxu1 %v3463_v28 }
  0x75   : > { %760 = vmatpush.bf16.msra.mxu0 %v3459_v29 }
  0x78   : > { %850 = vmatpush.bf16.msra.mxu1 %v3455_v34 }
  0x79   : > { %761 = vmatpush.bf16.msra.mxu0 %v3451_v35  ;;  %v3778_v35 = vld [vmem:[#allocation8 + $0x78] sm:$0xff] }
  0x7c   : > { %851 = vmatpush.bf16.msra.mxu1 %v3447_v40 }
  0x7d   : > { %762 = vmatpush.bf16.msra.mxu0 %v3443_v41 }
  0x80   : > { %852 = vmatpush.bf16.msra.mxu1 %v3439_v46 }
  0x81   : > { %763 = vmatpush.bf16.msra.mxu0 %v3435_v47 }
  0x83   : > { %853 = vmatmul.bf16.vlgmr.msra.gmra.mxu1 %v3763_v48 }
  0x84   : > { %764 = vmatmul.bf16.vlgmr.msra.gmra.mxu0 %v3763_v48 }
  0x93   : > { %858 = vmatmul.bf16.gmra.mxu1 %v3764_v49 }
  0x94   : > { %769 = vmatmul.bf16.gmra.mxu0 %v3764_v49 }
  0xa3   : > { %863 = vmatmul.bf16.gmra.mxu1 %v3765_v50 }
  0xa4   : > { %774 = vmatmul.bf16.gmra.mxu0 %v3765_v50 }
  0xb3   : > { %868 = vmatmul.bf16.gmra.mxu1 %v3766_v51 }
  0xb4   : > { %779 = vmatmul.bf16.gmra.mxu0 %v3766_v51 }
  0xc3   : > { %873 = vmatmul.bf16.gmra.mxu1 %v3767_v52 }
  0xc4   : > { %784 = vmatmul.bf16.gmra.mxu0 %v3767_v52 }
  0xd3   : > { %878 = vmatmul.bf16.gmra.mxu1 %v3768_v53 }
  0xd4   : > { %789 = vmatmul.bf16.gmra.mxu0 %v3768_v53 }
  0xe3   : > { %883 = vmatmul.bf16.gmra.mxu1 %v3769_v54 }
  0xe4   : > { %794 = vmatmul.bf16.gmra.mxu0 %v3769_v54  ;;  %v3498_v54 = vld [vmem:[#allocation9] sm:$0xf] }
  0xf3   : > { %888 = vmatmul.bf16.gmra.mxu1 %v3770_v55 }
  0xf4   : > { %799 = vmatmul.bf16.gmra.mxu0 %v3770_v55  ;;  %v3796_v55 = vld [vmem:[#allocation9 + $0x4] sm:$0xf0] }
 0x100   : > { %v4985_v57 = vpop.f32.mrf.mxu1 }
 0x101   : > { %v4987_v58 = vpop.f32.mrf.mxu0 }
 0x103   : > { %893 = vmatmul.bf16.gmra.mxu1 %v3771_v56 }
 0x104   : > { %804 = vmatmul.bf16.gmra.mxu0 %v3771_v56  ;;  %v3499_v56 = vor.u32 %v3796_v55, %v3498_v54 }
 0x108   : > { %v4989_v59 = vpop.f32.mrf.mxu1 }
 0x109   : > { %v4991_v60 = vpop.f32.mrf.mxu0  ;;  %v967_v61 = vpack.c.bf16 %v4989_v59, %v4985_v57 }
 0x10a   : > { %v966_v62 = vpack.c.bf16 %v4991_v60, %v4987_v58  ;;  %v3514_v60 = vld [vmem:[#allocation9 + $0x20] sm:$0xf] }
 0x110   : > { %v4997_v0 = vpop.f32.mrf.mxu1 }
 0x111   : > { %v4999_v1 = vpop.f32.mrf.mxu0 }
 0x113   : > { %898 = vmatmul.bf16.gmra.mxu1 %v3772_v63 }
 0x114   : > { %809 = vmatmul.bf16.gmra.mxu0 %v3772_v63 }
 0x118   : > { %v5001_v2 = vpop.f32.mrf.mxu1 }
 0x119   : > { %v5003_v3 = vpop.f32.mrf.mxu0  ;;  %v969_v4 = vpack.c.bf16 %v5001_v2, %v4997_v0  ;;  %v3506_v2 = vld [vmem:[#allocation9 + $0x10] sm:$0xf] }
 0x11a   : > { %v968_v5 = vpack.c.bf16 %v5003_v3, %v4999_v1  ;;  %v3798_v3 = vld [vmem:[#allocation9 + $0x14] sm:$0xf0] }
 0x120   : > { %v5009_v7 = vpop.f32.mrf.mxu1 }
 0x121   : > { %v5011_v8 = vpop.f32.mrf.mxu0 }
 0x123   : > { %903 = vmatmul.bf16.gmra.mxu1 %v3773_v6 }
 0x124   : > { %814 = vmatmul.bf16.gmra.mxu0 %v3773_v6 }
 0x128   : > { %v5013_v9 = vpop.f32.mrf.mxu1 }
 0x129   : > { %v5015_v10 = vpop.f32.mrf.mxu0  ;;  %v971_v11 = vpack.c.bf16 %v5013_v9, %v5009_v7 }
 0x12a   : > { %v970_v12 = vpack.c.bf16 %v5015_v10, %v5011_v8 }
 0x130   : > { %v869_v14 = vpop.f32.mrf.mxu1 }
 0x131   : > { %v780_v15 = vpop.f32.mrf.mxu0 }
 0x133   : > { %908 = vmatmul.bf16.gmra.mxu1 %v3774_v13 }
 0x134   : > { %819 = vmatmul.bf16.gmra.mxu0 %v3774_v13 }
 0x138   : > { %v871_v16 = vpop.f32.mrf.mxu1 }
 0x139   : > { %v782_v17 = vpop.f32.mrf.mxu0  ;;  %v973_v18 = vpack.c.bf16 %v871_v16, %v869_v14 }
 0x13a   : > { %v972_v19 = vpack.c.bf16 %v782_v17, %v780_v15 }
 0x140   : > { %v874_v21 = vpop.f32.mrf.mxu1 }
 0x141   : > { %v785_v22 = vpop.f32.mrf.mxu0 }
 0x143   : > { %913 = vmatmul.bf16.gmra.mxu1 %v3775_v20 }
 0x144   : > { %824 = vmatmul.bf16.gmra.mxu0 %v3775_v20 }
 0x148   : > { %v876_v23 = vpop.f32.mrf.mxu1 }
 0x149   : > { %v787_v24 = vpop.f32.mrf.mxu0  ;;  %v975_v48 = vpack.c.bf16 %v876_v23, %v874_v21 }
 0x14a   : > { %v974_v49 = vpack.c.bf16 %v787_v24, %v785_v22 }
 0x150   : > { %v879_v26 = vpop.f32.mrf.mxu1 }
 0x151   : > { %v790_v27 = vpop.f32.mrf.mxu0 }
 0x153   : > { %918 = vmatmul.bf16.gmra.mxu1 %v3776_v25 }
 0x154   : > { %829 = vmatmul.bf16.gmra.mxu0 %v3776_v25  ;;  %v3538_v25 = vld [vmem:[#allocation9 + $0x50] sm:$0xf] }
 0x158   : > { %v881_v28 = vpop.f32.mrf.mxu1 }
 0x159   : > { %v792_v29 = vpop.f32.mrf.mxu0  ;;  %v977_v46 = vpack.c.bf16 %v881_v28, %v879_v26  ;;  %v3806_v26 = vld [vmem:[#allocation9 + $0x54] sm:$0xf0] }
 0x15a   : > { %v976_v47 = vpack.c.bf16 %v792_v29, %v790_v27  ;;  %v3539_v27 = vor.u32 %v3806_v26, %v3538_v25  ;;  %v3594_v25 = vld [vmem:[#allocation9 + $0xc0] sm:$0xf]  ;;  %v3820_v26 = vld [vmem:[#allocation9 + $0xc4] sm:$0xf0] }
 0x160   : > { %v884_v31 = vpop.f32.mrf.mxu1 }
 0x161   : > { %v795_v32 = vpop.f32.mrf.mxu0 }
 0x163   : > { %923 = vmatmul.bf16.gmra.mxu1 %v3777_v30 }
 0x164   : > { %834 = vmatmul.bf16.gmra.mxu0 %v3777_v30 }
 0x168   : > { %v886_v33 = vpop.f32.mrf.mxu1 }
 0x169   : > { %v797_v34 = vpop.f32.mrf.mxu0  ;;  %v979_v42 = vpack.c.bf16 %v886_v33, %v884_v31  ;;  %v3808_v33 = vld [vmem:[#allocation9 + $0x64] sm:$0xf0] }
 0x16a   : > { %v978_v43 = vpack.c.bf16 %v797_v34, %v795_v32  ;;  %v3546_v32 = vld [vmem:[#allocation9 + $0x60] sm:$0xf] }
 0x16b   : > { %v3547_v34 = vor.u32 %v3808_v33, %v3546_v32  ;;  %v3540_v32 = vld [vmem:[#allocation9 + $0x58] sm:$0xf0]  ;;  %v3602_v33 = vld [vmem:[#allocation9 + $0xd0] sm:$0xf] }
 0x170   : > { %v889_v36 = vpop.f32.mrf.mxu1 }
 0x171   : > { %v800_v37 = vpop.f32.mrf.mxu0 }
 0x173   : > { %928 = vmatmul.bf16.gmra.mxu1 %v3778_v35 }
 0x174   : > { %839 = vmatmul.bf16.gmra.mxu0 %v3778_v35 }
 0x178   : > { %v891_v38 = vpop.f32.mrf.mxu1 }
 0x179   : > { %v802_v39 = vpop.f32.mrf.mxu0  ;;  %v981_v40 = vpack.c.bf16 %v891_v38, %v889_v36 }
 0x17a   : > { %v980_v41 = vpack.c.bf16 %v802_v39, %v800_v37 }
 0x17b   : > { %1342 = vmatpush.bf16.msrb.mxu0 %v981_v40 }
 0x17c   : > { %1164 = vmatpush.bf16.msra.mxu2 %v980_v41 }
 0x17f   : > { %1343 = vmatpush.bf16.msrb.mxu0 %v979_v42 }
 0x180   : > { %v5021_v44 = vpop.f32.mrf.mxu1  ;;  %1165 = vmatpush.bf16.msra.mxu2 %v978_v43  ;;  %v3554_v43 = vld [vmem:[#allocation9 + $0x70] sm:$0xf] }
 0x181   : > { %v5023_v45 = vpop.f32.mrf.mxu0 }
 0x183   : > { %1344 = vmatpush.bf16.msrb.mxu0 %v977_v46  ;;  %v3810_v46 = vld [vmem:[#allocation9 + $0x74] sm:$0xf0] }
 0x184   : > { %1166 = vmatpush.bf16.msra.mxu2 %v976_v47 }
 0x187   : > { %1345 = vmatpush.bf16.msrb.mxu0 %v975_v48 }
 0x188   : > { %v5025_v50 = vpop.f32.mrf.mxu1  ;;  %1167 = vmatpush.bf16.msra.mxu2 %v974_v49  ;;  %v3555_v49 = vor.u32 %v3810_v46, %v3554_v43  ;;  %v3610_v43 = vld [vmem:[#allocation9 + $0xe0] sm:$0xf]  ;;  %v3824_v46 = vld [vmem:[#allocation9 + $0xe4] sm:$0xf0] }
 0x189   : > { %v5027_v51 = vpop.f32.mrf.mxu0 }
 0x18b   : > { %1346 = vmatpush.bf16.msrb.mxu0 %v973_v18  ;;  %v3530_v18 = vld [vmem:[#allocation9 + $0x40] sm:$0xf] }
 0x18c   : > { %1168 = vmatpush.bf16.msra.mxu2 %v972_v19  ;;  %v3804_v19 = vld [vmem:[#allocation9 + $0x44] sm:$0xf0] }
 0x18d   : > { %v3531_v20 = vor.u32 %v3804_v19, %v3530_v18  ;;  %v3818_v18 = vld [vmem:[#allocation9 + $0xb4] sm:$0xf0] }
 0x18f   : > { %1347 = vmatpush.bf16.msrb.mxu0 %v971_v11  ;;  %v3522_v11 = vld [vmem:[#allocation9 + $0x30] sm:$0xf] }
 0x190   : > { %v5029_v52 = vpop.f32.mrf.mxu1  ;;  %1169 = vmatpush.bf16.msra.mxu2 %v970_v12  ;;  %v3802_v12 = vld [vmem:[#allocation9 + $0x34] sm:$0xf0] }
 0x191   : > { %v5031_v53 = vpop.f32.mrf.mxu0  ;;  %v3523_v13 = vor.u32 %v3802_v12, %v3522_v11 }
 0x193   : > { %1348 = vmatpush.bf16.msrb.mxu0 %v969_v4  ;;  %v3507_v4 = vor.u32 %v3798_v3, %v3506_v2 }
 0x194   : > { %1170 = vmatpush.bf16.msra.mxu2 %v968_v5 }
 0x197   : > { %1349 = vmatpush.bf16.msrb.mxu0 %v967_v61 }
 0x198   : > { %v5042_v63 = vpop.f32.mrf.mxu1  ;;  %1171 = vmatpush.bf16.msra.mxu2 %v966_v62  ;;  %v3800_v62 = vld [vmem:[#allocation9 + $0x24] sm:$0xf0] }
 0x199   : > { %v5047_v6 = vpop.f32.mrf.mxu0  ;;  %v3515_v5 = vor.u32 %v3800_v62, %v3514_v60  ;;  %v985_v3 = vpack.c.bf16 %v5042_v63, %v5029_v52  ;;  %v3562_v60 = vld [vmem:[#allocation9 + $0x80] sm:$0xf]  ;;  %v3812_v62 = vld [vmem:[#allocation9 + $0x84] sm:$0xf0]  ;;  %v3508_v63 = vld [vmem:[#allocation9 + $0x18] sm:$0xf0] }
 0x19a   : > { %1350 = vmatmul.bf16.vlgmr.msrb.gmra.mxu0 %v3499_v56 }
 0x19b   : > { %1172 = vmatmul.bf16.vlgmr.msra.gmra.mxu2 %v3499_v56 }
 0x1a0   : > { %v5049_v0 = vpop.f32.mrf.mxu1 }
 0x1a1   : > { %v5051_v1 = vpop.f32.mrf.mxu0 }
 0x1a8   : > { %v5053_v57 = vpop.f32.mrf.mxu1 }
 0x1a9   : > { %v5055_v59 = vpop.f32.mrf.mxu0  ;;  %v987_v56 = vpack.c.bf16 %v5053_v57, %v5049_v0  ;;  %v983_v0 = vpack.c.bf16 %v5025_v50, %v5021_v44  ;;  %v3799_v50 = vld [vmem:[#allocation9 + $0x24] sm:$0xf] }
 0x1aa   : > { %1355 = vmatmul.bf16.gmra.mxu0 %v3507_v4  ;;  %v986_v2 = vpack.c.bf16 %v5055_v59, %v5051_v1  ;;  %v982_v1 = vpack.c.bf16 %v5027_v51, %v5023_v45  ;;  %v3563_v59 = vor.u32 %v3812_v62, %v3562_v60  ;;  %v3516_v51 = vld [vmem:[#allocation9 + $0x28] sm:$0xf0]  ;;  %v3618_v60 = vld [vmem:[#allocation9 + $0xf0] sm:$0xf]  ;;  %v3826_v62 = vld [vmem:[#allocation9 + $0xf4] sm:$0xf0] }
 0x1ab   : > { %1177 = vmatmul.bf16.gmra.mxu2 %v3507_v4  ;;  %v984_v4 = vpack.c.bf16 %v5047_v6, %v5031_v53  ;;  %v3797_v53 = vld [vmem:[#allocation9 + $0x14] sm:$0xf]  ;;  %v3570_v6 = vld [vmem:[#allocation9 + $0x90] sm:$0xf]  ;;  %v3519_v11 = vor.u32 %v3799_v50, %v3516_v51  ;;  %v3827_v51 = vld [vmem:[#allocation15] sm:$0xff] }
 0x1b0   : > { %v5057_v61 = vpop.f32.mrf.mxu1 }
 0x1b1   : > { %v5059_v58 = vpop.f32.mrf.mxu0 }
 0x1b8   : > { %v911_v7 = vpop.f32.mrf.mxu1 }
 0x1b9   : > { %v5061_v8 = vpop.f32.mrf.mxu0  ;;  %v989_v54 = vpack.c.bf16 %v911_v7, %v5057_v61  ;;  %v3795_v61 = vld [vmem:[#allocation9 + $0x4] sm:$0xf]  ;;  %v3511_v7 = vor.u32 %v3797_v53, %v3508_v63  ;;  %v3619_v53 = vor.u32 %v3826_v62, %v3618_v60  ;;  %v3829_v63 = vld [vmem:[#allocation15 + $0x10] sm:$0xff] }
 0x1ba   : > { %1360 = vmatmul.bf16.gmra.mxu0 %v3515_v5  ;;  %v988_v55 = vpack.c.bf16 %v5061_v8, %v5059_v58  ;;  %v3500_v58 = vld [vmem:[#allocation9 + $0x8] sm:$0xf0] }
 0x1bb   : > { %1182 = vmatmul.bf16.gmra.mxu2 %v3515_v5  ;;  %v3503_v57 = vor.u32 %v3795_v61, %v3500_v58  ;;  %v3814_v5 = vld [vmem:[#allocation9 + $0x94] sm:$0xf0]  ;;  %v3809_v61 = vld [vmem:[#allocation9 + $0x74] sm:$0xf]  ;;  %v3556_v58 = vld [vmem:[#allocation9 + $0x78] sm:$0xf0] }
 0x1bc   : > { %v3571_v44 = vor.u32 %v3814_v5, %v3570_v6  ;;  %v3828_v6 = vld [vmem:[#allocation15 + $0x8] sm:$0xff] }
 0x1c0   : > { %v914_v9 = vpop.f32.mrf.mxu1 }
 0x1c1   : > { %v825_v10 = vpop.f32.mrf.mxu0 }
 0x1c8   : > { %v916_v14 = vpop.f32.mrf.mxu1 }
 0x1c9   : > { %v827_v15 = vpop.f32.mrf.mxu0  ;;  %v991_v47 = vpack.c.bf16 %v916_v14, %v914_v9  ;;  %v3578_v9 = vld [vmem:[#allocation9 + $0xa0] sm:$0xf] }
 0x1ca   : > { %1365 = vmatmul.bf16.gmra.mxu0 %v3523_v13  ;;  %v990_v48 = vpack.c.bf16 %v827_v15, %v825_v10  ;;  %v3816_v10 = vld [vmem:[#allocation9 + $0xa4] sm:$0xf0]  ;;  %v3801_v15 = vld [vmem:[#allocation9 + $0x34] sm:$0xf] }
 0x1cb   : > { %1187 = vmatmul.bf16.gmra.mxu2 %v3523_v13  ;;  %v3579_v13 = vor.u32 %v3816_v10, %v3578_v9  ;;  %v3811_v9 = vld [vmem:[#allocation9 + $0x84] sm:$0xf]  ;;  %v3564_v10 = vld [vmem:[#allocation9 + $0x88] sm:$0xf0] }
 0x1d0   : > { %v919_v16 = vpop.f32.mrf.mxu1 }
 0x1d1   : > { %v830_v17 = vpop.f32.mrf.mxu0 }
 0x1d8   : > { %v921_v21 = vpop.f32.mrf.mxu1 }
 0x1d9   : > { %v832_v22 = vpop.f32.mrf.mxu0  ;;  %v993_v41 = vpack.c.bf16 %v921_v21, %v919_v16  ;;  %v3524_v16 = vld [vmem:[#allocation9 + $0x38] sm:$0xf0] }
 0x1da   : > { %1370 = vmatmul.bf16.gmra.mxu0 %v3531_v20  ;;  %v992_v42 = vpack.c.bf16 %v832_v22, %v830_v17  ;;  %v3586_v17 = vld [vmem:[#allocation9 + $0xb0] sm:$0xf]  ;;  %v3527_v19 = vor.u32 %v3801_v15, %v3524_v16 }
 0x1db   : > { %1192 = vmatmul.bf16.gmra.mxu2 %v3531_v20  ;;  %v3587_v21 = vor.u32 %v3818_v18, %v3586_v17  ;;  %v5125_v18 = vstv %s4977_s9 }
 0x1e0   : > { %v924_v23 = vpop.f32.mrf.mxu1 }
 0x1e1   : > { %v835_v24 = vpop.f32.mrf.mxu0 }
 0x1e8   : > { %v926_v28 = vpop.f32.mrf.mxu1 }
 0x1e9   : > { %v837_v29 = vpop.f32.mrf.mxu0  ;;  %v995_v39 = vpack.c.bf16 %v926_v28, %v924_v23  ;;  %v3803_v23 = vld [vmem:[#allocation9 + $0x44] sm:$0xf] }
 0x1ea   : > { %1375 = vmatmul.bf16.gmra.mxu0 %v3539_v27  ;;  %v994_v40 = vpack.c.bf16 %v837_v29, %v835_v24  ;;  %v3532_v24 = vld [vmem:[#allocation9 + $0x48] sm:$0xf0]  ;;  %v3595_v29 = vor.u32 %v3820_v26, %v3594_v25 }
 0x1eb   : > { %1197 = vmatmul.bf16.gmra.mxu2 %v3539_v27  ;;  %v3535_v27 = vor.u32 %v3803_v23, %v3532_v24 }
 0x1f0   : > { %v929_v30 = vpop.f32.mrf.mxu1 }
 0x1f1   : > { %v840_v31 = vpop.f32.mrf.mxu0 }
 0x1f8   : > { %v931_v35 = vpop.f32.mrf.mxu1 }
 0x1f9   : > { %v842_v36 = vpop.f32.mrf.mxu0  ;;  %v997_v37 = vpack.c.bf16 %v931_v35, %v929_v30 }
 0x1fa   : > { %v996_v38 = vpack.c.bf16 %v842_v36, %v840_v31  ;;  %1380 = vmatmul.bf16.gmra.mxu0 %v3547_v34  ;;  %v3805_v31 = vld [vmem:[#allocation9 + $0x54] sm:$0xf] }
 0x1fb   : > { %1431 = vmatpush.bf16.msrb.mxu1 %v997_v37  ;;  %1202 = vmatmul.bf16.gmra.mxu2 %v3547_v34  ;;  %v3822_v34 = vld [vmem:[#allocation9 + $0xd4] sm:$0xf0]  ;;  %v3543_v35 = vor.u32 %v3805_v31, %v3540_v32 }
 0x1fc   : > { %1253 = vmatpush.bf16.msra.mxu3 %v996_v38  ;;  %v3603_v37 = vor.u32 %v3822_v34, %v3602_v33  ;;  %v3834_v38 = vld [vmem:[#allocation15 + $0x38] sm:$0xff] }
 0x1fd   : > { %2199 = vmatpush.bf16.msrb.mxu2 %v3834_v38 }
 0x1ff   : > { %1432 = vmatpush.bf16.msrb.mxu1 %v995_v39 }
 0x200   : > { %1254 = vmatpush.bf16.msra.mxu3 %v994_v40 }
 0x203   : > { %1433 = vmatpush.bf16.msrb.mxu1 %v993_v41  ;;  %v3807_v41 = vld [vmem:[#allocation9 + $0x64] sm:$0xf] }
 0x204   : > { %1255 = vmatpush.bf16.msra.mxu3 %v992_v42  ;;  %v3548_v42 = vld [vmem:[#allocation9 + $0x68] sm:$0xf0] }
 0x207   : > { %1434 = vmatpush.bf16.msrb.mxu1 %v991_v47  ;;  %v3551_v47 = vor.u32 %v3807_v41, %v3548_v42  ;;  %v3813_v41 = vld [vmem:[#allocation9 + $0x94] sm:$0xf]  ;;  %v3572_v42 = vld [vmem:[#allocation9 + $0x98] sm:$0xf0] }
 0x208   : > { %1256 = vmatpush.bf16.msra.mxu3 %v990_v48  ;;  %v3575_v60 = vor.u32 %v3813_v41, %v3572_v42 }
 0x20a   : > { %1385 = vmatmul.bf16.gmra.mxu0 %v3555_v49 }
 0x20b   : > { %1435 = vmatpush.bf16.msrb.mxu1 %v989_v54  ;;  %1207 = vmatmul.bf16.gmra.mxu2 %v3555_v49  ;;  %v3611_v54 = vor.u32 %v3824_v46, %v3610_v43 }
 0x20c   : > { %1257 = vmatpush.bf16.msra.mxu3 %v988_v55  ;;  %v3833_v55 = vld [vmem:[#allocation15 + $0x30] sm:$0xff] }
 0x20d   : > { %2200 = vmatpush.bf16.msrb.mxu2 %v3833_v55 }
 0x20f   : > { %1436 = vmatpush.bf16.msrb.mxu1 %v987_v56  ;;  %v3832_v56 = vld [vmem:[#allocation15 + $0x28] sm:$0xff] }
 0x210   : > { %1258 = vmatpush.bf16.msra.mxu3 %v986_v2 }
 0x211   : > { %2201 = vmatpush.bf16.msrb.mxu2 %v3832_v56 }
 0x213   : > { %1437 = vmatpush.bf16.msrb.mxu1 %v985_v3 }
 0x214   : > { %1259 = vmatpush.bf16.msra.mxu3 %v984_v4  ;;  %v3831_v4 = vld [vmem:[#allocation15 + $0x20] sm:$0xff] }
 0x215   : > { %2202 = vmatpush.bf16.msrb.mxu2 %v3831_v4 }
 0x217   : > { %1438 = vmatpush.bf16.msrb.mxu1 %v983_v0  ;;  %v1351_v39 = vpop.f32.mrf.mxu0  ;;  %v3830_v0 = vld [vmem:[#allocation15 + $0x18] sm:$0xff] }
 0x218   : > { %1260 = vmatpush.bf16.msra.mxu3 %v982_v1  ;;  %v3559_v1 = vor.u32 %v3809_v61, %v3556_v58 }
 0x219   : > { %2203 = vmatpush.bf16.msrb.mxu2 %v3830_v0 }
 0x21a   : > { %1439 = vmatmul.bf16.vlgmr.msrb.gmra.mxu1 %v3503_v57  ;;  %1390 = vmatmul.bf16.gmra.mxu0 %v3563_v59 }
 0x21b   : > { %1261 = vmatmul.bf16.vlgmr.msra.gmra.mxu3 %v3503_v57  ;;  %1212 = vmatmul.bf16.gmra.mxu2 %v3563_v59 }
 0x21d   : > { %2204 = vmatpush.bf16.msrb.mxu2 %v3829_v63 }
 0x21e   : > { %v5078_v52 = vpop.f32.mrf.mxu2 }
 0x21f   : > { %v1353_v48 = vpop.f32.mrf.mxu0 }
 0x221   : > { %2205 = vmatpush.bf16.msrb.mxu2 %v3828_v6 }
 0x225   : > { %2206 = vmatpush.bf16.msrb.mxu2 %v3827_v51 }
 0x226   : > { %v5080_v8 = vpop.f32.mrf.mxu2 }
 0x227   : > { %v5102_v2 = vpop.f32.mrf.mxu0 }
 0x22a   : > { %1444 = vmatmul.bf16.gmra.mxu1 %v3511_v7  ;;  %1395 = vmatmul.bf16.gmra.mxu0 %v3571_v44 }
 0x22b   : > { %1266 = vmatmul.bf16.gmra.mxu3 %v3511_v7  ;;  %1217 = vmatmul.bf16.gmra.mxu2 %v3571_v44  ;;  %v998_v44 = vld [vmem:[%s6001_s10] sm:$0x3] }
 0x22c   : > { %v5117_v50 = vperm.slane %v998_v44, 1 }
 0x22e   : > { %v5082_v45 = vpop.f32.mrf.mxu2 }
 0x22f   : > { %v5106_v57 = vpop.f32.mrf.mxu0 }
 0x236   : > { %v5084_v12 = vpop.f32.mrf.mxu2 }
 0x237   : > { %v5110_v5 = vpop.f32.mrf.mxu0 }
 0x23a   : > { %1449 = vmatmul.bf16.gmra.mxu1 %v3519_v11  ;;  %1400 = vmatmul.bf16.gmra.mxu0 %v3579_v13 }
 0x23b   : > { %1271 = vmatmul.bf16.gmra.mxu3 %v3519_v11  ;;  %1222 = vmatmul.bf16.gmra.mxu2 %v3579_v13  ;;  %v1352_v11 = vadd.f32 %v1351_v39, %v5117_v50  ;;  %v3567_v13 = vor.u32 %v3811_v9, %v3564_v10 }
 0x23e   : > { %v5086_v14 = vpop.f32.mrf.mxu2 }
 0x23f   : > { %v5120_v15 = vpop.f32.mrf.mxu0 }
 0x246   : > { %v5088_v20 = vpop.f32.mrf.mxu2 }
 0x247   : > { %v5133_v31 = vpop.f32.mrf.mxu0 }
 0x24a   : > { %1454 = vmatmul.bf16.gmra.mxu1 %v3527_v19  ;;  %1405 = vmatmul.bf16.gmra.mxu0 %v3587_v21 }
 0x24b   : > { %1276 = vmatmul.bf16.gmra.mxu3 %v3527_v19  ;;  %1227 = vmatmul.bf16.gmra.mxu2 %v3587_v21  ;;  %v5127_v21 = vperm.slane %v998_v44, 0  ;;  %v2019_v44 = vld [vmem:[#allocation13] sm:$0xff] }
 0x24d   : > { %v1174_v25 = vadd.f32 %v5078_v52, %v5127_v21  ;;  %v1176_v55 = vadd.f32 %v5080_v8, %v5127_v21 }
 0x24e   : > { %v5090_v22 = vpop.f32.mrf.mxu2 }
 0x24f   : > { %v5143_v62 = vpop.f32.mrf.mxu0 }
 0x256   : > { %v5092_v28 = vpop.f32.mrf.mxu2 }
 0x25a   : > { %1459 = vmatmul.bf16.gmra.mxu1 %v3535_v27  ;;  %1410 = vmatmul.bf16.gmra.mxu0 %v3595_v29 }
 0x25b   : > { %1281 = vmatmul.bf16.gmra.mxu3 %v3535_v27  ;;  %1232 = vmatmul.bf16.gmra.mxu2 %v3595_v29  ;;  %v1354_v27 = vadd.f32 %v1353_v48, %v5117_v50  ;;  %v1357_v48 = vadd.f32 %v5102_v2, %v5117_v50 }
 0x25e   : > { %v5094_v30 = vpop.f32.mrf.mxu2 }
 0x266   : > { %v5096_v36 = vpop.f32.mrf.mxu2 }
 0x26a   : > { %1464 = vmatmul.bf16.gmra.mxu1 %v3543_v35  ;;  %1415 = vmatmul.bf16.gmra.mxu0 %v3603_v37 }
 0x26b   : > { %1286 = vmatmul.bf16.gmra.mxu3 %v3543_v35  ;;  %1237 = vmatmul.bf16.gmra.mxu2 %v3603_v37 }
 0x26e   : > { %v5098_v40 = vpop.f32.mrf.mxu2 }
 0x276   : > { %v5100_v49 = vpop.f32.mrf.mxu2 }
 0x27a   : > { %1469 = vmatmul.bf16.gmra.mxu1 %v3551_v47  ;;  %1420 = vmatmul.bf16.gmra.mxu0 %v3611_v54 }
 0x27b   : > { %1291 = vmatmul.bf16.gmra.mxu3 %v3551_v47  ;;  %1242 = vmatmul.bf16.gmra.mxu2 %v3611_v54 }
 0x27e   : > { %v5104_v3 = vpop.f32.mrf.mxu2 }
 0x286   : > { %v5108_v59 = vpop.f32.mrf.mxu2 }
 0x28a   : > { %1474 = vmatmul.bf16.gmra.mxu1 %v3559_v1  ;;  %1425 = vmatmul.bf16.gmra.mxu0 %v3619_v53 }
 0x28b   : > { %1296 = vmatmul.bf16.gmra.mxu3 %v3559_v1  ;;  %1247 = vmatmul.bf16.gmra.mxu2 %v3619_v53 }
 0x28e   : > { %v5112_v7 = vpop.f32.mrf.mxu2 }
 0x296   : > { %v5122_v16 = vpop.f32.mrf.mxu2 }
 0x297   : > { %v1440_v17 = vpop.f32.mrf.mxu1 }
 0x298   : > { %v1441_v19 = vadd.f32 %v1440_v17, %v1352_v11 }
 0x29a   : > { %vm1521_vm0 = vcmp.gt.f32.partialorder %v1441_v19, 0.0  ;;  %v1586_v23 = vmul.f32 %v5125_v18, %v1441_v19  ;;  %1479 = vmatmul.bf16.gmra.mxu1 %v3567_v13 }
 0x29b   : > { %1301 = vmatmul.bf16.gmra.mxu3 %v3567_v13  ;;  %v2020_v13 = vld [vmem:[#allocation13 + $0x8] sm:$0xff] }
 0x29c   : > { %v1650_v24 = vsel %vm1521_vm0, %v1441_v19, %v1586_v23 }
 0x29d   : > { %v1713_v26 = vmul.f32 1.442695, %v1650_v24  ;;  %v1777_v35 = vmul.f32 2.0, %v1650_v24  ;;  %v1179_v24 = vadd.f32 %v5082_v45, %v5127_v21 }
 0x29e   : > { %v1262_v29 = vpop.f32.mrf.mxu3  ;;  %v5135_v34 = vpop.f32.mrf.mxu2 }
 0x29f   : > { %4183 = vpow2.f32 %v1713_v26  ;;  %v1263_v32 = vadd.f32 %v1262_v29, %v1174_v25  ;;  %v1442_v33 = vpop.f32.mrf.mxu1  ;;  %v1809_v43 = vadd.f32 1.0, %v1777_v35  ;;  %v5153_v35 = vpop.f32.mrf.mxu0 }
 0x2a0   : > { %v1443_v37 = vadd.f32 %v1442_v33, %v1354_v27 }
 0x2a1   : > { %vm1520_vm1 = vcmp.gt.f32.partialorder %v1263_v32, 0.0  ;;  %v1585_v38 = vmul.f32 %v5125_v18, %v1263_v32 }
 0x2a2   : > { %vm1523_vm2 = vcmp.gt.f32.partialorder %v1443_v37, 0.0  ;;  %v1588_v39 = vmul.f32 %v5125_v18, %v1443_v37 }
 0x2a3   : > { %v1649_v52 = vsel %vm1520_vm1, %v1263_v32, %v1585_v38  ;;  %v1359_v32 = vadd.f32 %v5106_v57, %v5117_v50 }
 0x2a4   : > { %v1841_v46 = vmul.f32 %v1649_v52, %v1649_v52  ;;  %v1652_v47 = vsel %vm1523_vm2, %v1443_v37, %v1588_v39 }
 0x2a5   : > { %v4184_v54 = vpop.eup %4183  ;;  %v1715_v56 = vmul.f32 1.442695, %v1652_v47  ;;  %v1778_v2 = vmul.f32 2.0, %v1652_v47 }
 0x2a6   : > { %v1873_v4 = vsub.f32 %v1809_v43, %v1841_v46  ;;  %v1905_v61 = vmul.f32 %v4184_v54, %v4184_v54  ;;  %v1264_v58 = vpop.f32.mrf.mxu3  ;;  %v5145_v63 = vpop.f32.mrf.mxu2  ;;  %v2051_v10 = vmul.f32 %v4184_v54, %v2019_v44 }
 0x2a7   : > { %4185 = vpow2.f32 %v1715_v56  ;;  %v1265_v0 = vadd.f32 %v1264_v58, %v1176_v55  ;;  %v1445_v1 = vpop.f32.mrf.mxu1  ;;  %v1810_v53 = vadd.f32 1.0, %v1778_v2  ;;  %v3815_v56 = vld [vmem:[#allocation9 + $0xa4] sm:$0xf] }
 0x2a8   : > { %v1937_v6 = vsub.f32 %v1873_v4, %v1905_v61  ;;  %v1446_v51 = vadd.f32 %v1445_v1, %v1357_v48  ;;  %v2083_v37 = vadd.f32 %v2051_v10, %v1649_v52  ;;  %v3580_v52 = vld [vmem:[#allocation9 + $0xa8] sm:$0xf0]  ;;  %v1181_v1 = vadd.f32 %v5084_v12, %v5127_v21 }
 0x2a9   : > { %vm1522_vm3 = vcmp.gt.f32.partialorder %v1265_v0, 0.0  ;;  %v1587_v8 = vmul.f32 %v5125_v18, %v1265_v0 }
 0x2aa   : > { %vm1525_vm4 = vcmp.gt.f32.partialorder %v1446_v51, 0.0  ;;  %v1590_v9 = vmul.f32 %v5125_v18, %v1446_v51  ;;  %1484 = vmatmul.bf16.gmra.mxu1 %v3575_v60 }
 0x2ab   : > { %v1651_v11 = vsel %vm1522_vm3, %v1265_v0, %v1587_v8  ;;  %1306 = vmatmul.bf16.gmra.mxu3 %v3575_v60  ;;  %v1362_v60 = vadd.f32 %v5110_v5, %v5117_v50  ;;  %v3583_v8 = vor.u32 %v3815_v56, %v3580_v52 }
 0x2ac   : > { %v1842_v17 = vmul.f32 %v1651_v11, %v1651_v11  ;;  %v1654_v19 = vsel %vm1525_vm4, %v1446_v51, %v1590_v9  ;;  %v5163_v9 = vpop.f32.mrf.mxu0 }
 0x2ad   : > { %v4186_v23 = vpop.eup %4185  ;;  %v1717_v25 = vmul.f32 1.442695, %v1654_v19  ;;  %v1779_v46 = vmul.f32 2.0, %v1654_v19  ;;  %v2021_v19 = vld [vmem:[#allocation13 + $0x10] sm:$0xff] }
 0x2ae   : > { %v1874_v26 = vsub.f32 %v1810_v53, %v1842_v17  ;;  %v1906_v27 = vmul.f32 %v4186_v23, %v4186_v23  ;;  %v2052_v29 = vmul.f32 %v4186_v23, %v2020_v13  ;;  %v1267_v33 = vpop.f32.mrf.mxu3  ;;  %v5155_v41 = vpop.f32.mrf.mxu2 }
 0x2af   : > { %4187 = vpow2.f32 %v1717_v25  ;;  %v1268_v38 = vadd.f32 %v1267_v33, %v1179_v24  ;;  %v1447_v39 = vpop.f32.mrf.mxu1  ;;  %v1811_v4 = vadd.f32 1.0, %v1779_v46  ;;  %v1364_v46 = vadd.f32 %v5120_v15, %v5117_v50 }
 0x2b0   : > { %v1938_v42 = vsub.f32 %v1874_v26, %v1906_v27  ;;  %v2084_v43 = vadd.f32 %v2052_v29, %v1651_v11  ;;  %v1448_v45 = vadd.f32 %v1447_v39, %v1359_v32  ;;  %v2022_v26 = vld [vmem:[#allocation13 + $0x18] sm:$0xff] }
 0x2b1   : > { %vm1524_vm5 = vcmp.gt.f32.partialorder %v1268_v38, 0.0  ;;  %v1589_v47 = vmul.f32 %v5125_v18, %v1268_v38 }
 0x2b2   : > { %v1969_v48 = vadd.f32 %v1938_v42, %v1937_v6  ;;  %vm1527_vm6 = vcmp.gt.f32.partialorder %v1448_v45, 0.0  ;;  %v1592_v57 = vmul.f32 %v5125_v18, %v1448_v45  ;;  %v2115_v54 = vpack.c.bf16 %v2084_v43, %v2083_v37 }
 0x2b3   : > { %v1653_v55 = vsel %vm1524_vm5, %v1268_v38, %v1589_v47  ;;  %v1184_v38 = vadd.f32 %v5086_v14, %v5127_v21 }
 0x2b4   : > { %v1843_v61 = vmul.f32 %v1653_v55, %v1653_v55  ;;  %v1656_v58 = vsel %vm1527_vm6, %v1448_v45, %v1592_v57  ;;  %2207 = vmatmul.bf16.vlgmr.msrb.gmra.mxu2 %v2115_v54  ;;  %v5173_v47 = vpop.f32.mrf.mxu0 }
 0x2b5   : > { %v4188_v0 = vpop.eup %4187  ;;  %v1719_v44 = vmul.f32 1.442695, %v1656_v58  ;;  %v1780_v17 = vmul.f32 2.0, %v1656_v58 }
 0x2b6   : > { %v1875_v6 = vsub.f32 %v1811_v4, %v1843_v61  ;;  %v1907_v2 = vmul.f32 %v4188_v0, %v4188_v0  ;;  %v1269_v51 = vpop.f32.mrf.mxu3  ;;  %v5165_v13 = vpop.f32.mrf.mxu2  ;;  %v2053_v27 = vmul.f32 %v4188_v0, %v2021_v19 }
 0x2b7   : > { %4189 = vpow2.f32 %v1719_v44  ;;  %v1270_v10 = vadd.f32 %v1269_v51, %v1181_v1  ;;  %v1450_v11 = vpop.f32.mrf.mxu1  ;;  %v1812_v29 = vadd.f32 1.0, %v1780_v17 }
 0x2b8   : > { %v1939_v53 = vsub.f32 %v1875_v6, %v1907_v2  ;;  %v1451_v5 = vadd.f32 %v1450_v11, %v1362_v60  ;;  %v2085_v56 = vadd.f32 %v2053_v27, %v1653_v55  ;;  %v3817_v6 = vld [vmem:[#allocation9 + $0xb4] sm:$0xf]  ;;  %v3588_v2 = vld [vmem:[#allocation9 + $0xb8] sm:$0xf0] }
 0x2b9   : > { %vm1526_vm7 = vcmp.gt.f32.partialorder %v1270_v10, 0.0  ;;  %v1591_v23 = vmul.f32 %v5125_v18, %v1270_v10 }
 0x2ba   : > { %v1970_v12 = vadd.f32 %v1969_v48, %v1939_v53  ;;  %vm1529_vm8 = vcmp.gt.f32.partialorder %v1451_v5, 0.0  ;;  %v1594_v24 = vmul.f32 %v5125_v18, %v1451_v5  ;;  %1489 = vmatmul.bf16.gmra.mxu1 %v3583_v8  ;;  %v1186_v53 = vadd.f32 %v5088_v20, %v5127_v21 }
 0x2bb   : > { %v1655_v25 = vsel %vm1526_vm7, %v1270_v10, %v1591_v23  ;;  %1311 = vmatmul.bf16.gmra.mxu3 %v3583_v8  ;;  %v1367_v10 = vadd.f32 %v5133_v31, %v5117_v50 }
 0x2bc   : > { %v1844_v32 = vmul.f32 %v1655_v25, %v1655_v25  ;;  %v1658_v33 = vsel %vm1529_vm8, %v1451_v5, %v1594_v24  ;;  %v5183_v24 = vpop.f32.mrf.mxu0 }
 0x2bd   : > { %v4190_v37 = vpop.eup %4189  ;;  %v1721_v39 = vmul.f32 1.442695, %v1658_v33  ;;  %v1781_v4 = vmul.f32 2.0, %v1658_v33  ;;  %v2023_v33 = vld [vmem:[#allocation13 + $0x20] sm:$0xff] }
 0x2be   : > { %v1876_v42 = vsub.f32 %v1812_v29, %v1844_v32  ;;  %v1908_v43 = vmul.f32 %v4190_v37, %v4190_v37  ;;  %v1272_v45 = vpop.f32.mrf.mxu3  ;;  %v2054_v48 = vmul.f32 %v4190_v37, %v2022_v26  ;;  %v5176_v60 = vpop.f32.mrf.mxu2 }
 0x2bf   : > { %4191 = vpow2.f32 %v1721_v39  ;;  %v1273_v57 = vadd.f32 %v1272_v45, %v1184_v38  ;;  %v1452_v54 = vpop.f32.mrf.mxu1  ;;  %v1813_v51 = vadd.f32 1.0, %v1781_v4  ;;  %v2024_v39 = vld [vmem:[#allocation13 + $0x28] sm:$0xff] }
 0x2c0   : > { %v1940_v52 = vsub.f32 %v1876_v42, %v1908_v43  ;;  %v1453_v61 = vadd.f32 %v1452_v54, %v1364_v46  ;;  %v2086_v58 = vadd.f32 %v2054_v48, %v1655_v25  ;;  %v1189_v54 = vadd.f32 %v5090_v22, %v5127_v21 }
 0x2c1   : > { %vm1528_vm9 = vcmp.gt.f32.partialorder %v1273_v57, 0.0  ;;  %v1593_v14 = vmul.f32 %v5125_v18, %v1273_v57 }
 0x2c2   : > { %v1971_v0 = vadd.f32 %v1970_v12, %v1940_v52  ;;  %vm1531_vm10 = vcmp.gt.f32.partialorder %v1453_v61, 0.0  ;;  %v1596_v15 = vmul.f32 %v5125_v18, %v1453_v61  ;;  %v2116_v1 = vpack.c.bf16 %v2086_v58, %v2085_v56 }
 0x2c3   : > { %v1657_v44 = vsel %vm1528_vm9, %v1273_v57, %v1593_v14  ;;  %v3591_v12 = vor.u32 %v3817_v6, %v3588_v2 }
 0x2c4   : > { %v1845_v8 = vmul.f32 %v1657_v44, %v1657_v44  ;;  %v1660_v55 = vsel %vm1531_vm10, %v1453_v61, %v1596_v15  ;;  %2212 = vmatmul.bf16.gmra.mxu2 %v2116_v1  ;;  %v1369_v61 = vadd.f32 %v5143_v62, %v5117_v50  ;;  %v5193_v14 = vpop.f32.mrf.mxu0 }
 0x2c5   : > { %v4192_v11 = vpop.eup %4191  ;;  %v1723_v17 = vmul.f32 1.442695, %v1660_v55  ;;  %v1782_v29 = vmul.f32 2.0, %v1660_v55 }
 0x2c6   : > { %v1877_v5 = vsub.f32 %v1813_v51, %v1845_v8  ;;  %v1909_v19 = vmul.f32 %v4192_v11, %v4192_v11  ;;  %v1274_v23 = vpop.f32.mrf.mxu3  ;;  %v2055_v42 = vmul.f32 %v4192_v11, %v2023_v33  ;;  %v5187_v43 = vpop.f32.mrf.mxu2 }
 0x2c7   : > { %4193 = vpow2.f32 %v1723_v17  ;;  %v1275_v25 = vadd.f32 %v1274_v23, %v1186_v53  ;;  %v1455_v26 = vpop.f32.mrf.mxu1  ;;  %v1814_v46 = vadd.f32 1.0, %v1782_v29  ;;  %v3819_v17 = vld [vmem:[#allocation9 + $0xc4] sm:$0xf] }
 0x2c8   : > { %v1941_v27 = vsub.f32 %v1877_v5, %v1909_v19  ;;  %v1456_v32 = vadd.f32 %v1455_v26, %v1367_v10  ;;  %v2087_v6 = vadd.f32 %v2055_v42, %v1657_v44  ;;  %v3596_v5 = vld [vmem:[#allocation9 + $0xc8] sm:$0xf0]  ;;  %v1372_v44 = vadd.f32 %v5153_v35, %v5117_v50 }
 0x2c9   : > { %vm1530_vm11 = vcmp.gt.f32.partialorder %v1275_v25, 0.0  ;;  %v1595_v31 = vmul.f32 %v5125_v18, %v1275_v25  ;;  %v1191_v26 = vadd.f32 %v5092_v28, %v5127_v21 }
 0x2ca   : > { %v1972_v37 = vadd.f32 %v1971_v0, %v1941_v27  ;;  %vm1533_vm12 = vcmp.gt.f32.partialorder %v1456_v32, 0.0  ;;  %v1598_v20 = vmul.f32 %v5125_v18, %v1456_v32  ;;  %1494 = vmatmul.bf16.gmra.mxu1 %v3591_v12 }
 0x2cb   : > { %v1659_v38 = vsel %vm1530_vm11, %v1275_v25, %v1595_v31  ;;  %1316 = vmatmul.bf16.gmra.mxu3 %v3591_v12 }
 0x2cc   : > { %v1846_v45 = vmul.f32 %v1659_v38, %v1659_v38  ;;  %v1662_v48 = vsel %vm1533_vm12, %v1456_v32, %v1598_v20  ;;  %v5203_v20 = vpop.f32.mrf.mxu0 }
 0x2cd   : > { %v4194_v57 = vpop.eup %4193  ;;  %v1725_v56 = vmul.f32 1.442695, %v1662_v48  ;;  %v1783_v51 = vmul.f32 2.0, %v1662_v48 }
 0x2ce   : > { %v1878_v52 = vsub.f32 %v1814_v46, %v1846_v45  ;;  %v1910_v4 = vmul.f32 %v4194_v57, %v4194_v57  ;;  %v1277_v58 = vpop.f32.mrf.mxu3  ;;  %v2056_v0 = vmul.f32 %v4194_v57, %v2024_v39  ;;  %v5201_v29 = vpop.f32.mrf.mxu2  ;;  %v2025_v45 = vld [vmem:[#allocation13 + $0x30] sm:$0xff] }
 0x2cf   : > { %4195 = vpow2.f32 %v1725_v56  ;;  %v1278_v15 = vadd.f32 %v1277_v58, %v1189_v54  ;;  %v1457_v1 = vpop.f32.mrf.mxu1  ;;  %v1815_v19 = vadd.f32 1.0, %v1783_v51  ;;  %v2026_v56 = vld [vmem:[#allocation13 + $0x38] sm:$0xff]  ;;  %v1374_v51 = vadd.f32 %v5163_v9, %v5117_v50 }
 0x2d0   : > { %v1942_v2 = vsub.f32 %v1878_v52, %v1910_v4  ;;  %v1458_v8 = vadd.f32 %v1457_v1, %v1369_v61  ;;  %v2088_v55 = vadd.f32 %v2056_v0, %v1659_v38 }
 0x2d1   : > { %vm1532_vm13 = vcmp.gt.f32.partialorder %v1278_v15, 0.0  ;;  %v1597_v22 = vmul.f32 %v5125_v18, %v1278_v15 }
 0x2d2   : > { %v1973_v10 = vadd.f32 %v1972_v37, %v1942_v2  ;;  %vm1535_vm14 = vcmp.gt.f32.partialorder %v1458_v8, 0.0  ;;  %v1600_v11 = vmul.f32 %v5125_v18, %v1458_v8  ;;  %v2117_v62 = vpack.c.bf16 %v2088_v55, %v2087_v6 }
 0x2d3   : > { %v1661_v53 = vsel %vm1532_vm13, %v1278_v15, %v1597_v22  ;;  %v3599_v37 = vor.u32 %v3819_v17, %v3596_v5  ;;  %v1194_v15 = vadd.f32 %v5094_v30, %v5127_v21 }
 0x2d4   : > { %v1847_v23 = vmul.f32 %v1661_v53, %v1661_v53  ;;  %v1664_v12 = vsel %vm1535_vm14, %v1458_v8, %v1600_v11  ;;  %2217 = vmatmul.bf16.gmra.mxu2 %v2117_v62 }
 0x2d5   : > { %v4196_v25 = vpop.eup %4195  ;;  %v1727_v27 = vmul.f32 1.442695, %v1664_v12  ;;  %v1784_v46 = vmul.f32 2.0, %v1664_v12 }
 0x2d6   : > { %v1879_v32 = vsub.f32 %v1815_v19, %v1847_v23  ;;  %v1911_v33 = vmul.f32 %v4196_v25, %v4196_v25  ;;  %v1279_v31 = vpop.f32.mrf.mxu3  ;;  %v2057_v52 = vmul.f32 %v4196_v25, %v2025_v45  ;;  %v5211_v62 = vpop.f32.mrf.mxu2 }
 0x2d7   : > { %4197 = vpow2.f32 %v1727_v27  ;;  %v1280_v38 = vadd.f32 %v1279_v31, %v1191_v26  ;;  %v1460_v39 = vpop.f32.mrf.mxu1  ;;  %v1816_v4 = vadd.f32 1.0, %v1784_v46  ;;  %v5213_v23 = vpop.f32.mrf.mxu0  ;;  %v3821_v27 = vld [vmem:[#allocation9 + $0xd4] sm:$0xf] }
 0x2d8   : > { %v1943_v42 = vsub.f32 %v1879_v32, %v1911_v33  ;;  %v1461_v35 = vadd.f32 %v1460_v39, %v1372_v44  ;;  %v2089_v11 = vadd.f32 %v2057_v52, %v1661_v53  ;;  %v3604_v32 = vld [vmem:[#allocation9 + $0xd8] sm:$0xf0]  ;;  %v1196_v39 = vadd.f32 %v5096_v36, %v5127_v21 }
 0x2d9   : > { %vm1534_vm15 = vcmp.gt.f32.partialorder %v1280_v38, 0.0  ;;  %v1599_v48 = vmul.f32 %v5125_v18, %v1280_v38 }
 0x2da   : > { %v1974_v28 = vadd.f32 %v1973_v10, %v1943_v42  ;;  %vm1537_vm0 = vcmp.gt.f32.partialorder %v1461_v35, 0.0  ;;  %v1602_v57 = vmul.f32 %v5125_v18, %v1461_v35  ;;  %1499 = vmatmul.bf16.gmra.mxu1 %v3599_v37 }
 0x2db   : > { %v1663_v54 = vsel %vm1534_vm15, %v1280_v38, %v1599_v48  ;;  %1321 = vmatmul.bf16.gmra.mxu3 %v3599_v37  ;;  %v1377_v37 = vadd.f32 %v5173_v47, %v5117_v50  ;;  %v3607_v48 = vor.u32 %v3821_v27, %v3604_v32 }
 0x2dc   : > { %v1848_v61 = vmul.f32 %v1663_v54, %v1663_v54  ;;  %v1666_v58 = vsel %vm1537_vm0, %v1461_v35, %v1602_v57 }
 0x2dd   : > { %v4198_v0 = vpop.eup %4197  ;;  %v1729_v1 = vmul.f32 1.442695, %v1666_v58  ;;  %v1785_v5 = vmul.f32 2.0, %v1666_v58 }
 0x2de   : > { %v1880_v6 = vsub.f32 %v1816_v4, %v1848_v61  ;;  %v1912_v2 = vmul.f32 %v4198_v0, %v4198_v0  ;;  %v1282_v8 = vpop.f32.mrf.mxu3  ;;  %v2058_v55 = vmul.f32 %v4198_v0, %v2026_v56  ;;  %v2027_v4 = vld [vmem:[#allocation13 + $0x40] sm:$0xff]  ;;  %v5222_v61 = vpop.f32.mrf.mxu2 }
 0x2df   : > { %4199 = vpow2.f32 %v1729_v1  ;;  %v1283_v22 = vadd.f32 %v1282_v8, %v1194_v15  ;;  %v1462_v10 = vpop.f32.mrf.mxu1  ;;  %v1817_v53 = vadd.f32 1.0, %v1785_v5  ;;  %v5225_v0 = vpop.f32.mrf.mxu0  ;;  %v2028_v1 = vld [vmem:[#allocation13 + $0x48] sm:$0xff]  ;;  %v1379_v5 = vadd.f32 %v5183_v24, %v5117_v50  ;;  %v3823_v24 = vld [vmem:[#allocation9 + $0xe4] sm:$0xf] }
 0x2e0   : > { %v1944_v17 = vsub.f32 %v1880_v6, %v1912_v2  ;;  %v1463_v19 = vadd.f32 %v1462_v10, %v1374_v51  ;;  %v2090_v30 = vadd.f32 %v2058_v55, %v1663_v54 }
 0x2e1   : > { %vm1536_vm1 = vcmp.gt.f32.partialorder %v1283_v22, 0.0  ;;  %v1601_v12 = vmul.f32 %v5125_v18, %v1283_v22 }
 0x2e2   : > { %v1975_v44 = vadd.f32 %v1974_v28, %v1944_v17  ;;  %vm1539_vm2 = vcmp.gt.f32.partialorder %v1463_v19, 0.0  ;;  %v1604_v9 = vmul.f32 %v5125_v18, %v1463_v19  ;;  %v2118_v25 = vpack.c.bf16 %v2090_v30, %v2089_v11 }
 0x2e3   : > { %v1665_v26 = vsel %vm1536_vm1, %v1283_v22, %v1601_v12  ;;  %v1199_v22 = vadd.f32 %v5098_v40, %v5127_v21 }
 0x2e4   : > { %v1849_v33 = vmul.f32 %v1665_v26, %v1665_v26  ;;  %v1668_v31 = vsel %vm1539_vm2, %v1463_v19, %v1604_v9  ;;  %2222 = vmatmul.bf16.gmra.mxu2 %v2118_v25 }
 0x2e5   : > { %v4200_v38 = vpop.eup %4199  ;;  %v1731_v42 = vmul.f32 1.442695, %v1668_v31  ;;  %v1786_v56 = vmul.f32 2.0, %v1668_v31 }
 0x2e6   : > { %v1881_v46 = vsub.f32 %v1817_v53, %v1849_v33  ;;  %v1913_v35 = vmul.f32 %v4200_v38, %v4200_v38  ;;  %v1284_v45 = vpop.f32.mrf.mxu3  ;;  %v2059_v6 = vmul.f32 %v4200_v38, %v2027_v4 }
 0x2e7   : > { %4201 = vpow2.f32 %v1731_v42  ;;  %v1285_v28 = vadd.f32 %v1284_v45, %v1196_v39  ;;  %v1465_v57 = vpop.f32.mrf.mxu1  ;;  %v1818_v2 = vadd.f32 1.0, %v1786_v56  ;;  %v3612_v39 = vld [vmem:[#allocation9 + $0xe8] sm:$0xf0]  ;;  %v5233_v42 = vpop.f32.mrf.mxu2  ;;  %v1382_v45 = vadd.f32 %v5193_v14, %v5117_v50 }
 0x2e8   : > { %v1945_v54 = vsub.f32 %v1881_v46, %v1913_v35  ;;  %v1466_v52 = vadd.f32 %v1465_v57, %v1377_v37  ;;  %v2091_v9 = vadd.f32 %v2059_v6, %v1665_v26  ;;  %v1201_v57 = vadd.f32 %v5100_v49, %v5127_v21 }
 0x2e9   : > { %vm1538_vm3 = vcmp.gt.f32.partialorder %v1285_v28, 0.0  ;;  %v1603_v47 = vmul.f32 %v5125_v18, %v1285_v28 }
 0x2ea   : > { %v1976_v58 = vadd.f32 %v1975_v44, %v1945_v54  ;;  %vm1541_vm4 = vcmp.gt.f32.partialorder %v1466_v52, 0.0  ;;  %v1606_v36 = vmul.f32 %v5125_v18, %v1466_v52  ;;  %1504 = vmatmul.bf16.gmra.mxu1 %v3607_v48 }
 0x2eb   : > { %v1667_v15 = vsel %vm1538_vm3, %v1285_v28, %v1603_v47  ;;  %1326 = vmatmul.bf16.gmra.mxu3 %v3607_v48  ;;  %v5237_v48 = vpop.f32.mrf.mxu0  ;;  %v3615_v47 = vor.u32 %v3823_v24, %v3612_v39 }
 0x2ec   : > { %v1850_v51 = vmul.f32 %v1667_v15, %v1667_v15  ;;  %v1670_v8 = vsel %vm1541_vm4, %v1466_v52, %v1606_v36 }
 0x2ed   : > { %v4202_v55 = vpop.eup %4201  ;;  %v1733_v10 = vmul.f32 1.442695, %v1670_v8  ;;  %v1787_v27 = vmul.f32 2.0, %v1670_v8 }
 0x2ee   : > { %v1882_v11 = vsub.f32 %v1818_v2, %v1850_v51  ;;  %v1914_v17 = vmul.f32 %v4202_v55, %v4202_v55  ;;  %v1287_v19 = vpop.f32.mrf.mxu3  ;;  %v2060_v30 = vmul.f32 %v4202_v55, %v2028_v1  ;;  %v2029_v2 = vld [vmem:[#allocation13 + $0x50] sm:$0xff]  ;;  %v2030_v55 = vld [vmem:[#allocation13 + $0x58] sm:$0xff] }
 0x2ef   : > { %4203 = vpow2.f32 %v1733_v10  ;;  %v1288_v12 = vadd.f32 %v1287_v19, %v1199_v22  ;;  %v1467_v44 = vpop.f32.mrf.mxu1  ;;  %v1819_v46 = vadd.f32 1.0, %v1787_v27  ;;  %v1204_v19 = vadd.f32 %v5104_v3, %v5127_v21 }
 0x2f0   : > { %v1946_v25 = vsub.f32 %v1882_v11, %v1914_v17  ;;  %v1468_v32 = vadd.f32 %v1467_v44, %v1379_v5  ;;  %v2092_v53 = vadd.f32 %v2060_v30, %v1667_v15 }
 0x2f1   : > { %vm1540_vm5 = vcmp.gt.f32.partialorder %v1288_v12, 0.0  ;;  %v1605_v33 = vmul.f32 %v5125_v18, %v1288_v12 }
 0x2f2   : > { %v1977_v40 = vadd.f32 %v1976_v58, %v1946_v25  ;;  %vm1543_vm6 = vcmp.gt.f32.partialorder %v1468_v32, 0.0  ;;  %v1608_v31 = vmul.f32 %v5125_v18, %v1468_v32  ;;  %v2119_v37 = vpack.c.bf16 %v2092_v53, %v2091_v9 }
 0x2f3   : > { %v1669_v38 = vsel %vm1540_vm5, %v1288_v12, %v1605_v33  ;;  %v5245_v12 = vpop.f32.mrf.mxu2  ;;  %v1384_v25 = vadd.f32 %v5203_v20, %v5117_v50 }
 0x2f4   : > { %v1851_v35 = vmul.f32 %v1669_v38, %v1669_v38  ;;  %v1672_v26 = vsel %vm1543_vm6, %v1468_v32, %v1608_v31  ;;  %2227 = vmatmul.bf16.gmra.mxu2 %v2119_v37  ;;  %v5249_v32 = vpop.f32.mrf.mxu0 }
 0x2f5   : > { %v4204_v28 = vpop.eup %4203  ;;  %v1735_v54 = vmul.f32 1.442695, %v1672_v26  ;;  %v1788_v1 = vmul.f32 2.0, %v1672_v26 }
 0x2f6   : > { %v1883_v56 = vsub.f32 %v1819_v46, %v1851_v35  ;;  %v1915_v52 = vmul.f32 %v4204_v28, %v4204_v28  ;;  %v1289_v4 = vpop.f32.mrf.mxu3  ;;  %v2061_v22 = vmul.f32 %v4204_v28, %v2029_v2  ;;  %v3825_v28 = vld [vmem:[#allocation9 + $0xf4] sm:$0xf]  ;;  %v3842_v2 = vld [vmem:[#allocation16 + $0x38] sm:$0xff] }
 0x2f7   : > { %4205 = vpow2.f32 %v1735_v54  ;;  %v1290_v58 = vadd.f32 %v1289_v4, %v1201_v57  ;;  %v1470_v36 = vpop.f32.mrf.mxu1  ;;  %v1820_v10 = vadd.f32 1.0, %v1788_v1  ;;  %v3620_v57 = vld [vmem:[#allocation9 + $0xf8] sm:$0xf0]  ;;  %2404 = vmatpush.bf16.msrb.mxu3 %v3842_v2 }
 0x2f8   : > { %v1947_v15 = vsub.f32 %v1883_v56, %v1915_v52  ;;  %v1471_v6 = vadd.f32 %v1470_v36, %v1382_v45  ;;  %v2093_v31 = vadd.f32 %v2061_v22, %v1669_v38  ;;  %v1387_v38 = vadd.f32 %v5213_v23, %v5117_v50 }
 0x2f9   : > { %vm1542_vm7 = vcmp.gt.f32.partialorder %v1290_v58, 0.0  ;;  %v1607_v14 = vmul.f32 %v5125_v18, %v1290_v58 }
 0x2fa   : > { %v1978_v51 = vadd.f32 %v1977_v40, %v1947_v15  ;;  %vm1545_vm8 = vcmp.gt.f32.partialorder %v1471_v6, 0.0  ;;  %v1610_v8 = vmul.f32 %v5125_v18, %v1471_v6  ;;  %1509 = vmatmul.bf16.gmra.mxu1 %v3615_v47 }
 0x2fb   : > { %v1671_v49 = vsel %vm1542_vm7, %v1290_v58, %v1607_v14  ;;  %1331 = vmatmul.bf16.gmra.mxu3 %v3615_v47  ;;  %v1206_v47 = vadd.f32 %v5108_v59, %v5127_v21 }
 0x2fc   : > { %v1852_v11 = vmul.f32 %v1671_v49, %v1671_v49  ;;  %v1674_v17 = vsel %vm1545_vm8, %v1471_v6, %v1610_v8  ;;  %v3623_v6 = vor.u32 %v3825_v28, %v3620_v57  ;;  %v5257_v8 = vpop.f32.mrf.mxu2  ;;  %v5259_v23 = vpop.f32.mrf.mxu0 }
 0x2fd   : > { %v4206_v5 = vpop.eup %4205  ;;  %v1737_v30 = vmul.f32 1.442695, %v1674_v17  ;;  %v1789_v24 = vmul.f32 2.0, %v1674_v17 }
 0x2fe   : > { %v1884_v44 = vsub.f32 %v1820_v10, %v1852_v11  ;;  %v1916_v9 = vmul.f32 %v4206_v5, %v4206_v5  ;;  %v1292_v27 = vpop.f32.mrf.mxu3  ;;  %v2062_v53 = vmul.f32 %v4206_v5, %v2030_v55  ;;  %v2031_v10 = vld [vmem:[#allocation13 + $0x60] sm:$0xff]  ;;  %v3841_v5 = vld [vmem:[#allocation16 + $0x30] sm:$0xff] }
 0x2ff   : > { %4207 = vpow2.f32 %v1737_v30  ;;  %v1293_v33 = vadd.f32 %v1292_v27, %v1204_v19  ;;  %v1472_v40 = vpop.f32.mrf.mxu1  ;;  %v1821_v54 = vadd.f32 1.0, %v1789_v24  ;;  %v2032_v30 = vld [vmem:[#allocation13 + $0x68] sm:$0xff]  ;;  %2405 = vmatpush.bf16.msrb.mxu3 %v3841_v5  ;;  %v1389_v24 = vadd.f32 %v5225_v0, %v5117_v50 }
 0x300   : > { %v1948_v37 = vsub.f32 %v1884_v44, %v1916_v9  ;;  %v1473_v39 = vadd.f32 %v1472_v40, %v1384_v25  ;;  %v2094_v3 = vadd.f32 %v2062_v53, %v1671_v49 }
 0x301   : > { %vm1544_vm9 = vcmp.gt.f32.partialorder %v1293_v33, 0.0  ;;  %v1609_v46 = vmul.f32 %v5125_v18, %v1293_v33 }
 0x302   : > { %v1979_v35 = vadd.f32 %v1978_v51, %v1948_v37  ;;  %vm1547_vm10 = vcmp.gt.f32.partialorder %v1473_v39, 0.0  ;;  %v1612_v26 = vmul.f32 %v5125_v18, %v1473_v39  ;;  %v2120_v20 = vpack.c.bf16 %v2094_v3, %v2093_v31  ;;  %v3840_v3 = vld [vmem:[#allocation16 + $0x28] sm:$0xff] }
 0x303   : > { %v1673_v45 = vsel %vm1544_vm9, %v1293_v33, %v1609_v46  ;;  %v1209_v33 = vadd.f32 %v5112_v7, %v5127_v21  ;;  %2406 = vmatpush.bf16.msrb.mxu3 %v3840_v3  ;;  %v1214_v3 = vadd.f32 %v5135_v34, %v5127_v21 }
 0x304   : > { %v1853_v56 = vmul.f32 %v1673_v45, %v1673_v45  ;;  %v1676_v52 = vsel %vm1547_vm10, %v1473_v39, %v1612_v26  ;;  %2232 = vmatmul.bf16.gmra.mxu2 %v2120_v20 }
 0x305   : > { %v4208_v4 = vpop.eup %4207  ;;  %v1739_v58 = vmul.f32 1.442695, %v1676_v52  ;;  %v1790_v55 = vmul.f32 2.0, %v1676_v52  ;;  %v5268_v52 = vpop.f32.mrf.mxu2 }
 0x306   : > { %v1885_v36 = vsub.f32 %v1821_v54, %v1853_v56  ;;  %v1917_v15 = vmul.f32 %v4208_v4, %v4208_v4  ;;  %v1294_v1 = vpop.f32.mrf.mxu3  ;;  %v2063_v44 = vmul.f32 %v4208_v4, %v2031_v10  ;;  %v5271_v4 = vpop.f32.mrf.mxu0  ;;  %v3838_v10 = vld [vmem:[#allocation16 + $0x18] sm:$0xff] }
 0x307   : > { %4209 = vpow2.f32 %v1739_v58  ;;  %v1295_v14 = vadd.f32 %v1294_v1, %v1206_v47  ;;  %v1475_v51 = vpop.f32.mrf.mxu1  ;;  %v1822_v9 = vadd.f32 1.0, %v1790_v55  ;;  %v3839_v58 = vld [vmem:[#allocation16 + $0x20] sm:$0xff] }
 0x308   : > { %v1949_v49 = vsub.f32 %v1885_v36, %v1917_v15  ;;  %v1476_v22 = vadd.f32 %v1475_v51, %v1387_v38  ;;  %v2095_v20 = vadd.f32 %v2063_v44, %v1673_v45  ;;  %2407 = vmatpush.bf16.msrb.mxu3 %v3839_v58 }
 0x309   : > { %vm1546_vm11 = vcmp.gt.f32.partialorder %v1295_v14, 0.0  ;;  %v1611_v59 = vmul.f32 %v5125_v18, %v1295_v14 }
 0x30a   : > { %v1980_v11 = vadd.f32 %v1979_v35, %v1949_v49  ;;  %vm1549_vm12 = vcmp.gt.f32.partialorder %v1476_v22, 0.0  ;;  %v1614_v17 = vmul.f32 %v5125_v18, %v1476_v22  ;;  %1514 = vmatmul.bf16.gmra.mxu1 %v3623_v6 }
 0x30b   : > { %v1675_v19 = vsel %vm1546_vm11, %v1295_v14, %v1611_v59  ;;  %1336 = vmatmul.bf16.gmra.mxu3 %v3623_v6  ;;  %v1392_v6 = vadd.f32 %v5237_v48, %v5117_v50  ;;  %v1211_v14 = vadd.f32 %v5122_v16, %v5127_v21 }
 0x30c   : > { %v1854_v25 = vmul.f32 %v1675_v19, %v1675_v19  ;;  %v1678_v27 = vsel %vm1549_vm12, %v1476_v22, %v1614_v17  ;;  %2408 = vmatpush.bf16.msrb.mxu3 %v3838_v10 }
 0x30d   : > { %v4210_v53 = vpop.eup %4209  ;;  %v1741_v40 = vmul.f32 1.442695, %v1678_v27  ;;  %v1791_v57 = vmul.f32 2.0, %v1678_v27  ;;  %v5279_v27 = vpop.f32.mrf.mxu2 }
 0x30e   : > { %v1886_v31 = vsub.f32 %v1822_v9, %v1854_v25  ;;  %v1918_v37 = vmul.f32 %v4210_v53, %v4210_v53  ;;  %v1297_v39 = vpop.f32.mrf.mxu3  ;;  %v2064_v46 = vmul.f32 %v4210_v53, %v2032_v30  ;;  %v2033_v30 = vld [vmem:[#allocation13 + $0x70] sm:$0xff]  ;;  %v2034_v53 = vld [vmem:[#allocation13 + $0x78] sm:$0xff] }
 0x30f   : > { %4211 = vpow2.f32 %v1741_v40  ;;  %v1298_v35 = vadd.f32 %v1297_v39, %v1209_v33  ;;  %v1477_v26 = vpop.f32.mrf.mxu1  ;;  %v1823_v45 = vadd.f32 1.0, %v1791_v57  ;;  %v3837_v9 = vld [vmem:[#allocation16 + $0x10] sm:$0xff] }
 0x310   : > { %v1950_v28 = vsub.f32 %v1886_v31, %v1918_v37  ;;  %v1478_v54 = vadd.f32 %v1477_v26, %v1389_v24  ;;  %v2096_v56 = vadd.f32 %v2064_v46, %v1675_v19  ;;  %v5281_v24 = vpop.f32.mrf.mxu0  ;;  %2409 = vmatpush.bf16.msrb.mxu3 %v3837_v9  ;;  %v2035_v9 = vld [vmem:[#allocation13 + $0x80] sm:$0xff] }
 0x311   : > { %vm1548_vm13 = vcmp.gt.f32.partialorder %v1298_v35, 0.0  ;;  %v1613_v7 = vmul.f32 %v5125_v18, %v1298_v35 }
 0x312   : > { %v1981_v38 = vadd.f32 %v1980_v11, %v1950_v28  ;;  %vm1551_vm14 = vcmp.gt.f32.partialorder %v1478_v54, 0.0  ;;  %v1616_v0 = vmul.f32 %v5125_v18, %v1478_v54  ;;  %v2121_v47 = vpack.c.bf16 %v2096_v56, %v2095_v20 }
 0x313   : > { %v1677_v36 = vsel %vm1548_vm13, %v1298_v35, %v1613_v7  ;;  %v1394_v20 = vadd.f32 %v5249_v32, %v5117_v50 }
 0x314   : > { %v1855_v15 = vmul.f32 %v1677_v36, %v1677_v36  ;;  %v1680_v1 = vsel %vm1551_vm14, %v1478_v54, %v1616_v0  ;;  %2237 = vmatmul.bf16.gmra.mxu2 %v2121_v47  ;;  %v3836_v54 = vld [vmem:[#allocation16 + $0x8] sm:$0xff] }
 0x315   : > { %v4212_v2 = vpop.eup %4211  ;;  %v1743_v51 = vmul.f32 1.442695, %v1680_v1  ;;  %v1792_v5 = vmul.f32 2.0, %v1680_v1  ;;  %2410 = vmatpush.bf16.msrb.mxu3 %v3836_v54 }
 0x316   : > { %v1887_v49 = vsub.f32 %v1823_v45, %v1855_v15  ;;  %v1919_v55 = vmul.f32 %v4212_v2, %v4212_v2  ;;  %v1299_v22 = vpop.f32.mrf.mxu3  ;;  %v2065_v33 = vmul.f32 %v4212_v2, %v2033_v30 }
 0x317   : > { %4213 = vpow2.f32 %v1743_v51  ;;  %v1300_v59 = vadd.f32 %v1299_v22, %v1211_v14  ;;  %v1480_v11 = vpop.f32.mrf.mxu1  ;;  %v1824_v40 = vadd.f32 1.0, %v1792_v5  ;;  %v1216_v22 = vadd.f32 %v5145_v63, %v5127_v21 }
 0x318   : > { %v1951_v17 = vsub.f32 %v1887_v49, %v1919_v55  ;;  %v1481_v19 = vadd.f32 %v1480_v11, %v1392_v6  ;;  %v3835_v6 = vld [vmem:[#allocation16] sm:$0xff] }
 0x319   : > { %vm1550_vm15 = vcmp.gt.f32.partialorder %v1300_v59, 0.0  ;;  %v1615_v48 = vmul.f32 %v5125_v18, %v1300_v59  ;;  %2411 = vmatpush.bf16.msrb.mxu3 %v3835_v6 }
 0x31a   : > { %v1982_v44 = vadd.f32 %v1981_v38, %v1951_v17  ;;  %vm1553_vm0 = vcmp.gt.f32.partialorder %v1481_v19, 0.0  ;;  %v1618_v16 = vmul.f32 %v5125_v18, %v1481_v19  ;;  %v2097_v38 = vadd.f32 %v2065_v33, %v1677_v36 }
 0x31b   : > { %v1679_v25 = vsel %vm1550_vm15, %v1300_v59, %v1615_v48  ;;  %v1397_v36 = vadd.f32 %v5259_v23, %v5117_v50  ;;  %v5293_v59 = vpop.f32.mrf.mxu2 }
 0x31c   : > { %v1856_v31 = vmul.f32 %v1679_v25, %v1679_v25  ;;  %v1682_v37 = vsel %vm1553_vm0, %v1481_v19, %v1618_v16  ;;  %v5295_v19 = vpop.f32.mrf.mxu0 }
 0x31d   : > { %v4214_v39 = vpop.eup %4213  ;;  %v1745_v46 = vmul.f32 1.442695, %v1682_v37  ;;  %v1793_v47 = vmul.f32 2.0, %v1682_v37 }
 0x31e   : > { %v1888_v35 = vsub.f32 %v1824_v40, %v1856_v31  ;;  %v1920_v26 = vmul.f32 %v4214_v39, %v4214_v39  ;;  %v1302_v28 = vpop.f32.mrf.mxu3  ;;  %v2066_v57 = vmul.f32 %v4214_v39, %v2034_v53  ;;  %v2036_v40 = vld [vmem:[#allocation13 + $0x88] sm:$0xff] }
 0x31f   : > { %4215 = vpow2.f32 %v1745_v46  ;;  %v1303_v56 = vadd.f32 %v1302_v28, %v1214_v3  ;;  %v1482_v7 = vpop.f32.mrf.mxu1  ;;  %v1825_v14 = vadd.f32 1.0, %v1793_v47 }
 0x320   : > { %v1952_v0 = vsub.f32 %v1888_v35, %v1920_v26  ;;  %v1483_v58 = vadd.f32 %v1482_v7, %v1394_v20  ;;  %v2098_v45 = vadd.f32 %v2066_v57, %v1679_v25  ;;  %v1219_v35 = vadd.f32 %v5155_v41, %v5127_v21 }
 0x321   : > { %vm1552_vm1 = vcmp.gt.f32.partialorder %v1303_v56, 0.0  ;;  %v1617_v34 = vmul.f32 %v5125_v18, %v1303_v56  ;;  %v1399_v57 = vadd.f32 %v5271_v4, %v5117_v50 }
 0x322   : > { %v1983_v15 = vadd.f32 %v1982_v44, %v1952_v0  ;;  %vm1555_vm2 = vcmp.gt.f32.partialorder %v1483_v58, 0.0  ;;  %v1620_v1 = vmul.f32 %v5125_v18, %v1483_v58  ;;  %v2122_v32 = vpack.c.bf16 %v2098_v45, %v2097_v38 }
 0x323   : > { %v1681_v2 = vsel %vm1552_vm1, %v1303_v56, %v1617_v34  ;;  %v5303_v0 = vpop.f32.mrf.mxu2 }
 0x324   : > { %v1857_v51 = vmul.f32 %v1681_v2, %v1681_v2  ;;  %v1684_v49 = vsel %vm1555_vm2, %v1483_v58, %v1620_v1  ;;  %2242 = vmatmul.bf16.gmra.mxu2 %v2122_v32 }
 0x325   : > { %v4216_v55 = vpop.eup %4215  ;;  %v1747_v10 = vmul.f32 1.442695, %v1684_v49  ;;  %v1794_v16 = vmul.f32 2.0, %v1684_v49 }
 0x326   : > { %v1889_v11 = vsub.f32 %v1825_v14, %v1857_v51  ;;  %v1921_v17 = vmul.f32 %v4216_v55, %v4216_v55  ;;  %v1304_v5 = vpop.f32.mrf.mxu3  ;;  %v2067_v31 = vmul.f32 %v4216_v55, %v2035_v9 }
 0x327   : > { %4217 = vpow2.f32 %v1747_v10  ;;  %v1305_v30 = vadd.f32 %v1304_v5, %v1216_v22  ;;  %v1485_v48 = vpop.f32.mrf.mxu1  ;;  %v1826_v37 = vadd.f32 1.0, %v1794_v16  ;;  %v1221_v22 = vadd.f32 %v5165_v13, %v5127_v21 }
 0x328   : > { %v1953_v44 = vsub.f32 %v1889_v11, %v1921_v17  ;;  %v1486_v23 = vadd.f32 %v1485_v48, %v1397_v36  ;;  %v2099_v47 = vadd.f32 %v2067_v31, %v1681_v2  ;;  %v1402_v2 = vadd.f32 %v5281_v24, %v5117_v50  ;;  %v5317_v24 = vld [vmem:[%s6002_s12] ss:$0 sm:$0xff]  ;;  %v2038_v31 = vld [vmem:[#allocation13 + $0x98] sm:$0xff] }
 0x329   : > { %vm1554_vm3 = vcmp.gt.f32.partialorder %v1305_v30, 0.0  ;;  %v1619_v25 = vmul.f32 %v5125_v18, %v1305_v30 }
 0x32a   : > { %v1984_v53 = vadd.f32 %v1983_v15, %v1953_v44  ;;  %vm1557_vm4 = vcmp.gt.f32.partialorder %v1486_v23, 0.0  ;;  %v1622_v63 = vmul.f32 %v5125_v18, %v1486_v23  ;;  %v5305_v15 = vpop.f32.mrf.mxu0 }
 0x32b   : > { %v1683_v33 = vsel %vm1554_vm3, %v1305_v30, %v1619_v25 }
 0x32c   : > { %v1858_v39 = vmul.f32 %v1683_v33, %v1683_v33  ;;  %v1686_v3 = vsel %vm1557_vm4, %v1486_v23, %v1622_v63 }
 0x32d   : > { %v4218_v46 = vpop.eup %4217  ;;  %v1749_v26 = vmul.f32 1.442695, %v1686_v3  ;;  %v1795_v45 = vmul.f32 2.0, %v1686_v3 }
 0x32e   : > { %v1890_v20 = vsub.f32 %v1826_v37, %v1858_v39  ;;  %v1922_v28 = vmul.f32 %v4218_v46, %v4218_v46  ;;  %v1307_v54 = vpop.f32.mrf.mxu3  ;;  %v2068_v56 = vmul.f32 %v4218_v46, %v2036_v40 }
 0x32f   : > { %4219 = vpow2.f32 %v1749_v26  ;;  %v1308_v7 = vadd.f32 %v1307_v54, %v1219_v35  ;;  %v1487_v38 = vpop.f32.mrf.mxu1  ;;  %v1827_v51 = vadd.f32 1.0, %v1795_v45  ;;  %v1224_v35 = vadd.f32 %v5176_v60, %v5127_v21 }
 0x330   : > { %v1954_v58 = vsub.f32 %v1890_v20, %v1922_v28  ;;  %v1488_v34 = vadd.f32 %v1487_v38, %v1399_v57  ;;  %v2100_v41 = vadd.f32 %v2068_v56, %v1683_v33  ;;  %v2037_v33 = vld [vmem:[#allocation13 + $0x90] sm:$0xff]  ;;  %v1404_v56 = vadd.f32 %v5295_v19, %v5117_v50 }
 0x331   : > { %vm1556_vm5 = vcmp.gt.f32.partialorder %v1308_v7, 0.0  ;;  %v1621_v1 = vmul.f32 %v5125_v18, %v1308_v7 }
 0x332   : > { %v1985_v32 = vadd.f32 %v1984_v53, %v1954_v58  ;;  %vm1559_vm6 = vcmp.gt.f32.partialorder %v1488_v34, 0.0  ;;  %v1624_v4 = vmul.f32 %v5125_v18, %v1488_v34  ;;  %v2123_v6 = vpack.c.bf16 %v2100_v41, %v2099_v47  ;;  %v5320_v63 = vpop.f32.mrf.mxu0 }
 0x333   : > { %v1685_v14 = vsel %vm1556_vm5, %v1308_v7, %v1621_v1 }
 0x334   : > { %v1859_v49 = vmul.f32 %v1685_v14, %v1685_v14  ;;  %v1688_v36 = vsel %vm1559_vm6, %v1488_v34, %v1624_v4  ;;  %2247 = vmatmul.bf16.gmra.mxu2 %v2123_v6 }
 0x335   : > { %v4220_v55 = vpop.eup %4219  ;;  %v1751_v10 = vmul.f32 1.442695, %v1688_v36  ;;  %v1796_v23 = vmul.f32 2.0, %v1688_v36 }
 0x336   : > { %v1891_v11 = vsub.f32 %v1827_v51, %v1859_v49  ;;  %v1923_v17 = vmul.f32 %v4220_v55, %v4220_v55  ;;  %v1309_v5 = vpop.f32.mrf.mxu3  ;;  %v2069_v28 = vmul.f32 %v4220_v55, %v2037_v33  ;;  %v1407_v55 = vadd.f32 %v5305_v15, %v5117_v50 }
 0x337   : > { %4221 = vpow2.f32 %v1751_v10  ;;  %v1310_v30 = vadd.f32 %v1309_v5, %v1221_v22  ;;  %v1490_v48 = vpop.f32.mrf.mxu1  ;;  %v2208_v44 = vpop.f32.mrf.mxu2  ;;  %v1828_v37 = vadd.f32 1.0, %v1796_v23 }
 0x338   : > { %v1955_v16 = vsub.f32 %v1891_v11, %v1923_v17  ;;  %v1491_v9 = vadd.f32 %v1490_v48, %v1402_v2  ;;  %v2209_v20 = vadd.f32 %v5317_v24, %v2208_v44  ;;  %v2101_v51 = vadd.f32 %v2069_v28, %v1685_v14 }
 0x339   : > { %vm1558_vm7 = vcmp.gt.f32.partialorder %v1310_v30, 0.0  ;;  %v1623_v25 = vmul.f32 %v5125_v18, %v1310_v30  ;;  %v1226_v44 = vadd.f32 %v5187_v43, %v5127_v21 }
 0x33a   : > { %v1986_v13 = vadd.f32 %v1985_v32, %v1955_v16  ;;  %vm1561_vm8 = vcmp.gt.f32.partialorder %v1491_v9, 0.0  ;;  %v1626_v53 = vmul.f32 %v5125_v18, %v1491_v9  ;;  %v2288_v6 = vmax.f32 %v2209_v20, 0.0  ;;  %v1411_v5 = vpop.f32.mrf.mxu0 }
 0x33b   : > { %v1687_v40 = vsel %vm1558_vm7, %v1310_v30, %v1623_v25 }
 0x33c   : > { %v1860_v39 = vmul.f32 %v1687_v40, %v1687_v40  ;;  %v1690_v3 = vsel %vm1561_vm8, %v1491_v9, %v1626_v53 }
 0x33d   : > { %v4222_v46 = vpop.eup %4221  ;;  %v1753_v26 = vmul.f32 1.442695, %v1690_v3  ;;  %v1797_v47 = vmul.f32 2.0, %v1690_v3 }
 0x33e   : > { %v1892_v57 = vsub.f32 %v1828_v37, %v1860_v39  ;;  %v1924_v54 = vmul.f32 %v4222_v46, %v4222_v46  ;;  %v1312_v7 = vpop.f32.mrf.mxu3  ;;  %v2070_v38 = vmul.f32 %v4222_v46, %v2038_v31  ;;  %v2039_v39 = vld [vmem:[#allocation13 + $0xa0] sm:$0xff]  ;;  %v2040_v46 = vld [vmem:[#allocation13 + $0xa8] sm:$0xff] }
 0x33f   : > { %4223 = vpow2.f32 %v1753_v26  ;;  %v1313_v58 = vadd.f32 %v1312_v7, %v1224_v35  ;;  %v1492_v45 = vpop.f32.mrf.mxu1  ;;  %v2210_v34 = vpop.f32.mrf.mxu2  ;;  %v1829_v10 = vadd.f32 1.0, %v1797_v47 }
 0x340   : > { %v1956_v41 = vsub.f32 %v1892_v57, %v1924_v54  ;;  %v1493_v1 = vadd.f32 %v1492_v45, %v1404_v56  ;;  %v2211_v60 = vadd.f32 %v5317_v24, %v2210_v34  ;;  %v2102_v32 = vadd.f32 %v2070_v38, %v1687_v40 }
 0x341   : > { %vm1560_vm9 = vcmp.gt.f32.partialorder %v1313_v58, 0.0  ;;  %v1625_v4 = vmul.f32 %v5125_v18, %v1313_v58  ;;  %v1229_v57 = vadd.f32 %v5201_v29, %v5127_v21 }
 0x342   : > { %v1987_v49 = vadd.f32 %v1986_v13, %v1956_v41  ;;  %vm1563_vm10 = vcmp.gt.f32.partialorder %v1493_v1, 0.0  ;;  %v1628_v19 = vmul.f32 %v5125_v18, %v1493_v1  ;;  %v2289_v36 = vmax.f32 %v2211_v60, 0.0  ;;  %v1413_v34 = vpop.f32.mrf.mxu0 }
 0x343   : > { %v1689_v2 = vsel %vm1560_vm9, %v1313_v58, %v1625_v4  ;;  %v2124_v22 = vpack.c.bf16 %v2102_v32, %v2101_v51  ;;  %v1409_v58 = vadd.f32 %v5320_v63, %v5117_v50 }
 0x344   : > { %v1861_v11 = vmul.f32 %v1689_v2, %v1689_v2  ;;  %v1692_v17 = vsel %vm1563_vm10, %v1493_v1, %v1628_v19  ;;  %v2320_v30 = vpack.c.bf16 %v2289_v36, %v2288_v6 }
 0x345   : > { %v4224_v48 = vpop.eup %4223  ;;  %v1755_v14 = vmul.f32 1.442695, %v1692_v17  ;;  %2252 = vmatmul.bf16.gmra.mxu2 %v2124_v22  ;;  %v1798_v33 = vmul.f32 2.0, %v1692_v17  ;;  %v1412_v17 = vadd.f32 %v1411_v5, %v5117_v50 }
 0x346   : > { %v1893_v16 = vsub.f32 %v1829_v10, %v1861_v11  ;;  %v1925_v23 = vmul.f32 %v4224_v48, %v4224_v48  ;;  %v1314_v9 = vpop.f32.mrf.mxu3  ;;  %2412 = vmatmul.bf16.vlgmr.msrb.gmra.mxu3 %v2320_v30  ;;  %v2071_v7 = vmul.f32 %v4224_v48, %v2039_v39 }
 0x347   : > { %4225 = vpow2.f32 %v1755_v14  ;;  %v1315_v25 = vadd.f32 %v1314_v9, %v1226_v44  ;;  %v1495_v13 = vpop.f32.mrf.mxu1  ;;  %v2213_v15 = vpop.f32.mrf.mxu2  ;;  %v1830_v35 = vadd.f32 1.0, %v1798_v33  ;;  %v1231_v9 = vadd.f32 %v5211_v62, %v5127_v21 }
 0x348   : > { %v1957_v53 = vsub.f32 %v1893_v16, %v1925_v23  ;;  %v1496_v40 = vadd.f32 %v1495_v13, %v1407_v55  ;;  %v2214_v56 = vadd.f32 %v5317_v24, %v2213_v15  ;;  %v2103_v55 = vadd.f32 %v2071_v7, %v1689_v2 }
 0x349   : > { %vm1562_vm11 = vcmp.gt.f32.partialorder %v1315_v25, 0.0  ;;  %v1627_v31 = vmul.f32 %v5125_v18, %v1315_v25 }
 0x34a   : > { %v1988_v37 = vadd.f32 %v1987_v49, %v1957_v53  ;;  %vm1565_vm12 = vcmp.gt.f32.partialorder %v1496_v40, 0.0  ;;  %v1630_v43 = vmul.f32 %v5125_v18, %v1496_v40  ;;  %v2290_v36 = vmax.f32 %v2214_v56, 0.0 }
 0x34b   : > { %v1691_v3 = vsel %vm1562_vm11, %v1315_v25, %v1627_v31  ;;  %v1234_v56 = vadd.f32 %v5222_v61, %v5127_v21 }
 0x34c   : > { %v1862_v26 = vmul.f32 %v1691_v3, %v1691_v3  ;;  %v1694_v20 = vsel %vm1565_vm12, %v1496_v40, %v1630_v43 }
 0x34d   : > { %v4226_v28 = vpop.eup %4225  ;;  %v1757_v54 = vmul.f32 1.442695, %v1694_v20  ;;  %v1799_v1 = vmul.f32 2.0, %v1694_v20 }
 0x34e   : > { %v1894_v38 = vsub.f32 %v1830_v35, %v1862_v26  ;;  %v1926_v47 = vmul.f32 %v4226_v28, %v4226_v28  ;;  %v1317_v45 = vpop.f32.mrf.mxu3  ;;  %v2072_v41 = vmul.f32 %v4226_v28, %v2040_v46  ;;  %v2041_v46 = vld [vmem:[#allocation13 + $0xb0] sm:$0xff]  ;;  %v2042_v26 = vld [vmem:[#allocation13 + $0xb8] sm:$0xff] }
 0x34f   : > { %4227 = vpow2.f32 %v1757_v54  ;;  %v1318_v60 = vadd.f32 %v1317_v45, %v1229_v57  ;;  %v1497_v32 = vpop.f32.mrf.mxu1  ;;  %v2215_v4 = vpop.f32.mrf.mxu2  ;;  %v1831_v48 = vadd.f32 1.0, %v1799_v1 }
 0x350   : > { %v1958_v6 = vsub.f32 %v1894_v38, %v1926_v47  ;;  %v1498_v51 = vadd.f32 %v1497_v32, %v1409_v58  ;;  %v2216_v29 = vadd.f32 %v5317_v24, %v2215_v4  ;;  %v2104_v49 = vadd.f32 %v2072_v41, %v1691_v3 }
 0x351   : > { %vm1564_vm13 = vcmp.gt.f32.partialorder %v1318_v60, 0.0  ;;  %v1629_v19 = vmul.f32 %v5125_v18, %v1318_v60  ;;  %v1414_v47 = vadd.f32 %v1413_v34, %v5117_v50 }
 0x352   : > { %v1989_v22 = vadd.f32 %v1988_v37, %v1958_v6  ;;  %vm1567_vm14 = vcmp.gt.f32.partialorder %v1498_v51, 0.0  ;;  %v1632_v63 = vmul.f32 %v5125_v18, %v1498_v51  ;;  %v2291_v10 = vmax.f32 %v2216_v29, 0.0  ;;  %v1416_v37 = vpop.f32.mrf.mxu0 }
 0x353   : > { %v1693_v11 = vsel %vm1564_vm13, %v1318_v60, %v1629_v19  ;;  %v2125_v30 = vpack.c.bf16 %v2104_v49, %v2103_v55 }
 0x354   : > { %v1863_v44 = vmul.f32 %v1693_v11, %v1693_v11  ;;  %v1696_v14 = vsel %vm1567_vm14, %v1498_v51, %v1632_v63  ;;  %v2321_v16 = vpack.c.bf16 %v2291_v10, %v2290_v36 }
 0x355   : > { %v4228_v23 = vpop.eup %4227  ;;  %v1759_v25 = vmul.f32 1.442695, %v1696_v14  ;;  %2257 = vmatmul.bf16.gmra.mxu2 %v2125_v30  ;;  %v1800_v43 = vmul.f32 2.0, %v1696_v14  ;;  %v1417_v30 = vadd.f32 %v1416_v37, %v5117_v50 }
 0x356   : > { %v1895_v2 = vsub.f32 %v1831_v48, %v1863_v44  ;;  %v1927_v13 = vmul.f32 %v4228_v23, %v4228_v23  ;;  %v1319_v15 = vpop.f32.mrf.mxu3  ;;  %2417 = vmatmul.bf16.gmra.mxu3 %v2321_v16  ;;  %v2073_v38 = vmul.f32 %v4228_v23, %v2041_v46  ;;  %v2043_v46 = vld [vmem:[#allocation13 + $0xc0] sm:$0xff] }
 0x357   : > { %4229 = vpow2.f32 %v1759_v25  ;;  %v1320_v53 = vadd.f32 %v1319_v15, %v1231_v9  ;;  %v1500_v33 = vpop.f32.mrf.mxu1  ;;  %v2218_v40 = vpop.f32.mrf.mxu2  ;;  %v1832_v54 = vadd.f32 1.0, %v1800_v43  ;;  %v1236_v25 = vadd.f32 %v5233_v42, %v5127_v21 }
 0x358   : > { %v1959_v5 = vsub.f32 %v1895_v2, %v1927_v13  ;;  %v1501_v31 = vadd.f32 %v1500_v33, %v1412_v17  ;;  %v2219_v45 = vadd.f32 %v5317_v24, %v2218_v40  ;;  %v2105_v36 = vadd.f32 %v2073_v38, %v1693_v11 }
 0x359   : > { %vm1566_vm15 = vcmp.gt.f32.partialorder %v1320_v53, 0.0  ;;  %v1631_v39 = vmul.f32 %v5125_v18, %v1320_v53 }
 0x35a   : > { %v1990_v3 = vadd.f32 %v1989_v22, %v1959_v5  ;;  %vm1569_vm0 = vcmp.gt.f32.partialorder %v1501_v31, 0.0  ;;  %v1634_v62 = vmul.f32 %v5125_v18, %v1501_v31  ;;  %v1418_v55 = vpop.f32.mrf.mxu0  ;;  %v2292_v22 = vmax.f32 %v2219_v45, 0.0 }
 0x35b   : > { %v1695_v35 = vsel %vm1566_vm15, %v1320_v53, %v1631_v39 }
 0x35c   : > { %v1864_v20 = vmul.f32 %v1695_v35, %v1695_v35  ;;  %v1698_v28 = vsel %vm1569_vm0, %v1501_v31, %v1634_v62 }
 0x35d   : > { %v4230_v57 = vpop.eup %4229  ;;  %v1761_v7 = vmul.f32 1.442695, %v1698_v28  ;;  %v1801_v60 = vmul.f32 2.0, %v1698_v28 }
 0x35e   : > { %v1322_v58 = vpop.f32.mrf.mxu3  ;;  %v2074_v41 = vmul.f32 %v4230_v57, %v2042_v26  ;;  %v1896_v1 = vsub.f32 %v1832_v54, %v1864_v20  ;;  %v1928_v51 = vmul.f32 %v4230_v57, %v4230_v57  ;;  %v2044_v26 = vld [vmem:[#allocation13 + $0xc8] sm:$0xff] }
 0x35f   : > { %4231 = vpow2.f32 %v1761_v7  ;;  %v1323_v32 = vadd.f32 %v1322_v58, %v1234_v56  ;;  %v1502_v4 = vpop.f32.mrf.mxu1  ;;  %v2220_v6 = vpop.f32.mrf.mxu2  ;;  %v1833_v10 = vadd.f32 1.0, %v1801_v60 }
 0x360   : > { %v1503_v29 = vadd.f32 %v1502_v4, %v1414_v47  ;;  %v2221_v49 = vadd.f32 %v5317_v24, %v2220_v6  ;;  %v2106_v19 = vadd.f32 %v2074_v41, %v1695_v35  ;;  %v1960_v44 = vsub.f32 %v1896_v1, %v1928_v51 }
 0x361   : > { %vm1568_vm1 = vcmp.gt.f32.partialorder %v1323_v32, 0.0  ;;  %v1633_v61 = vmul.f32 %v5125_v18, %v1323_v32  ;;  %v1419_v47 = vadd.f32 %v1418_v55, %v5117_v50 }
 0x362   : > { %vm1571_vm2 = vcmp.gt.f32.partialorder %v1503_v29, 0.0  ;;  %v1636_v34 = vmul.f32 %v5125_v18, %v1503_v29  ;;  %v2293_v63 = vmax.f32 %v2221_v49, 0.0  ;;  %v2126_v48 = vpack.c.bf16 %v2106_v19, %v2105_v36  ;;  %v1421_v57 = vpop.f32.mrf.mxu0 }
 0x363   : > { %v1697_v17 = vsel %vm1568_vm1, %v1323_v32, %v1633_v61  ;;  %v1991_v5 = vadd.f32 %v1990_v3, %v1960_v44  ;;  %v1239_v3 = vadd.f32 %v5245_v12, %v5127_v21 }
 0x364   : > { %v1865_v14 = vmul.f32 %v1697_v17, %v1697_v17  ;;  %v1700_v16 = vsel %vm1571_vm2, %v1503_v29, %v1636_v34  ;;  %v2322_v23 = vpack.c.bf16 %v2293_v63, %v2292_v22 }
 0x365   : > { %v4232_v9 = vpop.eup %4231  ;;  %v1763_v11 = vmul.f32 1.442695, %v1700_v16  ;;  %2262 = vmatmul.bf16.gmra.mxu2 %v2126_v48  ;;  %v1802_v43 = vmul.f32 2.0, %v1700_v16 }
 0x366   : > { %v1897_v2 = vsub.f32 %v1833_v10, %v1865_v14  ;;  %v1929_v13 = vmul.f32 %v4232_v9, %v4232_v9  ;;  %v1324_v15 = vpop.f32.mrf.mxu3  ;;  %2422 = vmatmul.bf16.gmra.mxu3 %v2322_v23  ;;  %v2075_v38 = vmul.f32 %v4232_v9, %v2043_v46  ;;  %v1422_v10 = vadd.f32 %v1421_v57, %v5117_v50 }
 0x367   : > { %4233 = vpow2.f32 %v1763_v11  ;;  %v1325_v53 = vadd.f32 %v1324_v15, %v1236_v25  ;;  %v1505_v33 = vpop.f32.mrf.mxu1  ;;  %v2223_v40 = vpop.f32.mrf.mxu2  ;;  %v1834_v56 = vadd.f32 1.0, %v1802_v43  ;;  %v1241_v9 = vadd.f32 %v5257_v8, %v5127_v21 }
 0x368   : > { %v1961_v31 = vsub.f32 %v1897_v2, %v1929_v13  ;;  %v1506_v37 = vadd.f32 %v1505_v33, %v1417_v30  ;;  %v2224_v45 = vadd.f32 %v5317_v24, %v2223_v40  ;;  %v2107_v61 = vadd.f32 %v2075_v38, %v1697_v17 }
 0x369   : > { %vm1570_vm3 = vcmp.gt.f32.partialorder %v1325_v53, 0.0  ;;  %v1635_v39 = vmul.f32 %v5125_v18, %v1325_v53 }
 0x36a   : > { %v1992_v62 = vadd.f32 %v1991_v5, %v1961_v31  ;;  %vm1573_vm4 = vcmp.gt.f32.partialorder %v1506_v37, 0.0  ;;  %v1638_v42 = vmul.f32 %v5125_v18, %v1506_v37  ;;  %v2294_v34 = vmax.f32 %v2224_v45, 0.0  ;;  %v1423_v13 = vpop.f32.mrf.mxu0 }
 0x36b   : > { %v1699_v35 = vsel %vm1570_vm3, %v1325_v53, %v1635_v39 }
 0x36c   : > { %v1866_v20 = vmul.f32 %v1699_v35, %v1699_v35  ;;  %v1702_v28 = vsel %vm1573_vm4, %v1506_v37, %v1638_v42  ;;  %v2045_v42 = vld [vmem:[#allocation13 + $0xd0] sm:$0xff] }
 0x36d   : > { %v4234_v54 = vpop.eup %4233  ;;  %v1765_v7 = vmul.f32 1.442695, %v1702_v28  ;;  %v1803_v60 = vmul.f32 2.0, %v1702_v28 }
 0x36e   : > { %v1327_v58 = vpop.f32.mrf.mxu3  ;;  %v2076_v41 = vmul.f32 %v4234_v54, %v2044_v26  ;;  %v1898_v1 = vsub.f32 %v1834_v56, %v1866_v20  ;;  %v1930_v51 = vmul.f32 %v4234_v54, %v4234_v54  ;;  %v1244_v54 = vadd.f32 %v5268_v52, %v5127_v21 }
 0x36f   : > { %4235 = vpow2.f32 %v1765_v7  ;;  %v1328_v32 = vadd.f32 %v1327_v58, %v1239_v3  ;;  %v1507_v4 = vpop.f32.mrf.mxu1  ;;  %v2225_v6 = vpop.f32.mrf.mxu2  ;;  %v1835_v22 = vadd.f32 1.0, %v1803_v60  ;;  %v1424_v3 = vadd.f32 %v1423_v13, %v5117_v50 }
 0x370   : > { %v1508_v29 = vadd.f32 %v1507_v4, %v1419_v47  ;;  %v2226_v49 = vadd.f32 %v5317_v24, %v2225_v6  ;;  %v2108_v19 = vadd.f32 %v2076_v41, %v1699_v35  ;;  %v1962_v48 = vsub.f32 %v1898_v1, %v1930_v51  ;;  %v2046_v35 = vld [vmem:[#allocation13 + $0xd8] sm:$0xff] }
 0x371   : > { %vm1572_vm5 = vcmp.gt.f32.partialorder %v1328_v32, 0.0  ;;  %v1637_v12 = vmul.f32 %v5125_v18, %v1328_v32 }
 0x372   : > { %vm1575_vm6 = vcmp.gt.f32.partialorder %v1508_v29, 0.0  ;;  %v1640_v36 = vmul.f32 %v5125_v18, %v1508_v29  ;;  %v2295_v55 = vmax.f32 %v2226_v49, 0.0  ;;  %v2127_v30 = vpack.c.bf16 %v2108_v19, %v2107_v61 }
 0x373   : > { %v1701_v63 = vsel %vm1572_vm5, %v1328_v32, %v1637_v12  ;;  %v1993_v31 = vadd.f32 %v1992_v62, %v1962_v48 }
 0x374   : > { %v1867_v44 = vmul.f32 %v1701_v63, %v1701_v63  ;;  %v1704_v14 = vsel %vm1575_vm6, %v1508_v29, %v1640_v36  ;;  %v2323_v16 = vpack.c.bf16 %v2295_v55, %v2294_v34  ;;  %v1426_v29 = vpop.f32.mrf.mxu0 }
 0x375   : > { %v4236_v23 = vpop.eup %4235  ;;  %v1767_v25 = vmul.f32 1.442695, %v1704_v14  ;;  %2267 = vmatmul.bf16.gmra.mxu2 %v2127_v30  ;;  %v1804_v37 = vmul.f32 2.0, %v1704_v14  ;;  %v1427_v55 = vadd.f32 %v1426_v29, %v5117_v50 }
 0x376   : > { %v1899_v17 = vsub.f32 %v1835_v22, %v1867_v44  ;;  %v1931_v11 = vmul.f32 %v4236_v23, %v4236_v23  ;;  %v1329_v2 = vpop.f32.mrf.mxu3  ;;  %2427 = vmatmul.bf16.gmra.mxu3 %v2323_v16  ;;  %v2077_v62 = vmul.f32 %v4236_v23, %v2045_v42  ;;  %v1246_v16 = vadd.f32 %v5279_v27, %v5127_v21 }
 0x377   : > { %4237 = vpow2.f32 %v1767_v25  ;;  %v1330_v15 = vadd.f32 %v1329_v2, %v1241_v9  ;;  %v1510_v53 = vpop.f32.mrf.mxu1  ;;  %v2228_v33 = vpop.f32.mrf.mxu2  ;;  %v1836_v57 = vadd.f32 1.0, %v1804_v37 }
 0x378   : > { %v1963_v40 = vsub.f32 %v1899_v17, %v1931_v11  ;;  %v1511_v5 = vadd.f32 %v1510_v53, %v1422_v10  ;;  %v2229_v38 = vadd.f32 %v5317_v24, %v2228_v33  ;;  %v2109_v49 = vadd.f32 %v2077_v62, %v1701_v63 }
 0x379   : > { %vm1574_vm7 = vcmp.gt.f32.partialorder %v1330_v15, 0.0  ;;  %v1639_v43 = vmul.f32 %v5125_v18, %v1330_v15 }
 0x37a   : > { %vm1577_vm8 = vcmp.gt.f32.partialorder %v1511_v5, 0.0  ;;  %v1642_v8 = vmul.f32 %v5125_v18, %v1511_v5  ;;  %v1994_v39 = vadd.f32 %v1993_v31, %v1963_v40  ;;  %v2296_v12 = vmax.f32 %v2229_v38, 0.0  ;;  %v2047_v31 = vld [vmem:[#allocation13 + $0xe0] sm:$0xff] }
 0x37b   : > { %v1703_v46 = vsel %vm1574_vm7, %v1330_v15, %v1639_v43 }
 0x37c   : > { %v1868_v26 = vmul.f32 %v1703_v46, %v1703_v46  ;;  %v1706_v20 = vsel %vm1577_vm8, %v1511_v5, %v1642_v8  ;;  %v1428_v43 = vpop.f32.mrf.mxu0  ;;  %v2048_v8 = vld [vmem:[#allocation13 + $0xe8] sm:$0xff] }
 0x37d   : > { %v4238_v28 = vpop.eup %4237  ;;  %v1769_v56 = vmul.f32 1.442695, %v1706_v20  ;;  %v1805_v45 = vmul.f32 2.0, %v1706_v20  ;;  %v1249_v20 = vadd.f32 %v5293_v59, %v5127_v21 }
 0x37e   : > { %v1332_v7 = vpop.f32.mrf.mxu3  ;;  %v2078_v47 = vmul.f32 %v4238_v28, %v2046_v35  ;;  %v1900_v58 = vsub.f32 %v1836_v57, %v1868_v26  ;;  %v1932_v4 = vmul.f32 %v4238_v28, %v4238_v28  ;;  %v1429_v57 = vadd.f32 %v1428_v43, %v5117_v50 }
 0x37f   : > { %4239 = vpow2.f32 %v1769_v56  ;;  %v1333_v41 = vadd.f32 %v1332_v7, %v1244_v54  ;;  %v1512_v1 = vpop.f32.mrf.mxu1  ;;  %v2230_v60 = vpop.f32.mrf.mxu2  ;;  %v1837_v36 = vadd.f32 1.0, %v1805_v45 }
 0x380   : > { %v1513_v32 = vadd.f32 %v1512_v1, %v1424_v3  ;;  %v2231_v6 = vadd.f32 %v5317_v24, %v2230_v60  ;;  %v2110_v51 = vadd.f32 %v2078_v47, %v1703_v46  ;;  %v1964_v48 = vsub.f32 %v1900_v58, %v1932_v4 }
 0x381   : > { %vm1576_vm9 = vcmp.gt.f32.partialorder %v1333_v41, 0.0  ;;  %v1641_v52 = vmul.f32 %v5125_v18, %v1333_v41 }
 0x382   : > { %vm1579_vm10 = vcmp.gt.f32.partialorder %v1513_v32, 0.0  ;;  %v1644_v19 = vmul.f32 %v5125_v18, %v1513_v32  ;;  %v2297_v61 = vmax.f32 %v2231_v6, 0.0  ;;  %v2128_v22 = vpack.c.bf16 %v2110_v51, %v2109_v49 }
 0x383   : > { %v1705_v34 = vsel %vm1576_vm9, %v1333_v41, %v1641_v52  ;;  %v1995_v53 = vadd.f32 %v1994_v39, %v1964_v48 }
 0x384   : > { %v1869_v10 = vmul.f32 %v1705_v34, %v1705_v34  ;;  %v1708_v30 = vsel %vm1579_vm10, %v1513_v32, %v1644_v19  ;;  %v2324_v44 = vpack.c.bf16 %v2297_v61, %v2296_v12 }
 0x385   : > { %v4240_v14 = vpop.eup %4239  ;;  %v1771_v23 = vmul.f32 1.442695, %v1708_v30  ;;  %2272 = vmatmul.bf16.gmra.mxu2 %v2128_v22  ;;  %v1806_v33 = vmul.f32 2.0, %v1708_v30 }
 0x386   : > { %v1901_v63 = vsub.f32 %v1837_v36, %v1869_v10  ;;  %v1334_v9 = vpop.f32.mrf.mxu3  ;;  %v1933_v25 = vmul.f32 %v4240_v14, %v4240_v14  ;;  %2432 = vmatmul.bf16.gmra.mxu3 %v2324_v44  ;;  %v2079_v28 = vmul.f32 %v4240_v14, %v2047_v31 }
 0x387   : > { %4241 = vpow2.f32 %v1771_v23  ;;  %v1335_v17 = vadd.f32 %v1334_v9, %v1246_v16  ;;  %v1515_v11 = vpop.f32.mrf.mxu1  ;;  %v2233_v2 = vpop.f32.mrf.mxu2  ;;  %v1838_v26 = vadd.f32 1.0, %v1806_v33  ;;  %v2049_v9 = vld [vmem:[#allocation13 + $0xf0] sm:$0xff] }
 0x388   : > { %v1516_v13 = vadd.f32 %v1515_v11, %v1427_v55  ;;  %v1965_v15 = vsub.f32 %v1901_v63, %v1933_v25  ;;  %v2234_v56 = vadd.f32 %v5317_v24, %v2233_v2  ;;  %v2111_v32 = vadd.f32 %v2079_v28, %v1705_v34  ;;  %v2050_v11 = vld [vmem:[#allocation13 + $0xf8] sm:$0xff] }
 0x389   : > { %vm1578_vm11 = vcmp.gt.f32.partialorder %v1335_v17, 0.0  ;;  %v1643_v40 = vmul.f32 %v5125_v18, %v1335_v17  ;;  %v1251_v55 = vadd.f32 %v5303_v0, %v5127_v21 }
 0x38a   : > { %vm1581_vm12 = vcmp.gt.f32.partialorder %v1516_v13, 0.0  ;;  %v1646_v27 = vmul.f32 %v5125_v18, %v1516_v13  ;;  %v1996_v5 = vadd.f32 %v1995_v53, %v1965_v15  ;;  %v2298_v4 = vmax.f32 %v2234_v56, 0.0 }
 0x38b   : > { %v1707_v37 = vsel %vm1578_vm11, %v1335_v17, %v1643_v40 }
 0x38c   : > { %v1870_v42 = vmul.f32 %v1707_v37, %v1707_v37  ;;  %v1710_v46 = vsel %vm1581_vm12, %v1516_v13, %v1646_v27 }
 0x38d   : > { %v4242_v35 = vpop.eup %4241  ;;  %v1773_v39 = vmul.f32 1.442695, %v1710_v46  ;;  %v1807_v3 = vmul.f32 2.0, %v1710_v46 }
 0x38e   : > { %v1337_v54 = vpop.f32.mrf.mxu3  ;;  %v2080_v62 = vmul.f32 %v4242_v35, %v2048_v8  ;;  %v1902_v47 = vsub.f32 %v1838_v26, %v1870_v42  ;;  %v1934_v41 = vmul.f32 %v4242_v35, %v4242_v35 }
 0x38f   : > { %4243 = vpow2.f32 %v1773_v39  ;;  %v1338_v7 = vadd.f32 %v1337_v54, %v1249_v20  ;;  %v1517_v38 = vpop.f32.mrf.mxu1  ;;  %v2235_v58 = vpop.f32.mrf.mxu2  ;;  %v1839_v51 = vadd.f32 1.0, %v1807_v3 }
 0x390   : > { %v1518_v45 = vadd.f32 %v1517_v38, %v1429_v57  ;;  %v2236_v1 = vadd.f32 %v5317_v24, %v2235_v58  ;;  %v2112_v60 = vadd.f32 %v2080_v62, %v1707_v37  ;;  %v1966_v12 = vsub.f32 %v1902_v47, %v1934_v41 }
 0x391   : > { %vm1580_vm13 = vcmp.gt.f32.partialorder %v1338_v7, 0.0  ;;  %v1645_v59 = vmul.f32 %v5125_v18, %v1338_v7 }
 0x392   : > { %vm1583_vm14 = vcmp.gt.f32.partialorder %v1518_v45, 0.0  ;;  %v1648_v50 = vmul.f32 %v5125_v18, %v1518_v45  ;;  %v2299_v6 = vmax.f32 %v2236_v1, 0.0  ;;  %v2129_v29 = vpack.c.bf16 %v2112_v60, %v2111_v32  ;;  %v5404_v60 = vld [vmem:[%s6003_s30] ss:$0 sm:$0xff] }
 0x393   : > { %v1709_v52 = vsel %vm1580_vm13, %v1338_v7, %v1645_v59  ;;  %v1997_v23 = vadd.f32 %v1996_v5, %v1966_v12 }
 0x394   : > { %v1871_v49 = vmul.f32 %v1709_v52, %v1709_v52  ;;  %v1712_v19 = vsel %vm1583_vm14, %v1518_v45, %v1648_v50  ;;  %v2325_v61 = vpack.c.bf16 %v2299_v6, %v2298_v4 }
 0x395   : > { %v4244_v36 = vpop.eup %4243  ;;  %v1775_v22 = vmul.f32 1.442695, %v1712_v19  ;;  %2277 = vmatmul.bf16.gmra.mxu2 %v2129_v29  ;;  %v1808_v14 = vmul.f32 2.0, %v1712_v19 }
 0x396   : > { %v1339_v10 = vpop.f32.mrf.mxu3  ;;  %v1903_v34 = vsub.f32 %v1839_v51, %v1871_v49  ;;  %v1935_v30 = vmul.f32 %v4244_v36, %v4244_v36  ;;  %2437 = vmatmul.bf16.gmra.mxu3 %v2325_v61  ;;  %v2081_v2 = vmul.f32 %v4244_v36, %v2049_v9 }
 0x397   : > { %4245 = vpow2.f32 %v1775_v22  ;;  %v1340_v48 = vadd.f32 %v1339_v10, %v1251_v55  ;;  %v2238_v44 = vpop.f32.mrf.mxu2  ;;  %v1840_v21 = vadd.f32 1.0, %v1808_v14 }
 0x398   : > { %v1967_v16 = vsub.f32 %v1903_v34, %v1935_v30  ;;  %v2239_v33 = vadd.f32 %v5317_v24, %v2238_v44  ;;  %v2113_v37 = vadd.f32 %v2081_v2, %v1709_v52 }
 0x399   : > { %vm1582_vm15 = vcmp.gt.f32.partialorder %v1340_v48, 0.0  ;;  %v1647_v63 = vmul.f32 %v5125_v18, %v1340_v48 }
 0x39a   : > { %v1998_v25 = vadd.f32 %v1997_v23, %v1967_v16  ;;  %v2300_v8 = vmax.f32 %v2239_v33, 0.0 }
 0x39b   : > { %v1711_v17 = vsel %vm1582_vm15, %v1340_v48, %v1647_v63 }
 0x39c   : > { %v1872_v0 = vmul.f32 %v1711_v17, %v1711_v17 }
 0x39d   : > { %v4246_v13 = vpop.eup %4245 }
 0x39e   : > { %v1904_v15 = vsub.f32 %v1840_v21, %v1872_v0  ;;  %v1936_v53 = vmul.f32 %v4246_v13, %v4246_v13  ;;  %v2082_v40 = vmul.f32 %v4246_v13, %v2050_v11 }
 0x39f   : > { %v2240_v27 = vpop.f32.mrf.mxu2 }
 0x3a0   : > { %v1968_v31 = vsub.f32 %v1904_v15, %v1936_v53  ;;  %v2241_v5 = vadd.f32 %v5317_v24, %v2240_v27  ;;  %v2114_v43 = vadd.f32 %v2082_v40, %v1711_v17 }
 0x3a2   : > { %v1999_v18 = vadd.f32 %v1998_v25, %v1968_v31  ;;  %v2301_v42 = vmax.f32 %v2241_v5, 0.0  ;;  %v2130_v46 = vpack.c.bf16 %v2114_v43, %v2113_v37 }
 0x3a4   : > { %2000 = vadd.xlane.f32.xlu0 %v1999_v18  ;;  %v2326_v35 = vpack.c.bf16 %v2301_v42, %v2300_v8 }
 0x3a5   : > { %2282 = vmatmul.bf16.gmra.mxu2 %v2130_v46 }
 0x3a6   : > { %2442 = vmatmul.bf16.gmra.mxu3 %v2326_v35 }
 0x3a7   : > { %v2243_v26 = vpop.f32.mrf.mxu2 }
 0x3a8   : > { %v2244_v20 = vadd.f32 %v5317_v24, %v2243_v26 }
 0x3aa   : > { %v2302_v57 = vmax.f32 %v2244_v20, 0.0  ;;  %v4726_v20 = vmov 256.0  }
 0x3ab   : > { %4247 = vrcp.f32 %v4726_v20 }
 0x3af   : > { %v2245_v39 = vpop.f32.mrf.mxu2 }
 0x3b0   : > { %v2246_v28 = vadd.f32 %v5317_v24, %v2245_v39 }
 0x3b2   : > { %v2303_v54 = vmax.f32 %v2246_v28, 0.0  ;;  %v4248_v28 = vpop.eup %4247 }
 0x3b3   : > { %vm2014_vm0 = vweird.f32 %v4248_v28 }
 0x3b4   : > { %v2327_v56 = vpack.c.bf16 %v2303_v54, %v2302_v57 }
 0x3b6   : > { %2447 = vmatmul.bf16.gmra.mxu3 %v2327_v56 }
 0x3b7   : > { %v2248_v62 = vpop.f32.mrf.mxu2 }
 0x3b8   : > { %v2249_v3 = vadd.f32 %v5317_v24, %v2248_v62 }
 0x3ba   : > { %v2304_v47 = vmax.f32 %v2249_v3, 0.0  ;;  %v2010_v3 = vmul.f32 256.0, %v4248_v28 }
 0x3bf   : > { %v2250_v7 = vpop.f32.mrf.mxu2 }
 0x3c0   : > { %v2251_v38 = vadd.f32 %v5317_v24, %v2250_v7 }
 0x3c2   : > { %v2305_v58 = vmax.f32 %v2251_v38, 0.0 }
 0x3c4   : > { %v2328_v45 = vpack.c.bf16 %v2305_v58, %v2304_v47 }
 0x3c6   : > { %2452 = vmatmul.bf16.gmra.mxu3 %v2328_v45 }
 0x3c8   : > { %v2253_v41 = vpop.f32.mrf.mxu2 }
 0x3c9   : > { %v2413_v1 = vpop.f32.mrf.mxu3  ;;  %v2254_v59 = vadd.f32 %v5317_v24, %v2253_v41 }
 0x3ca   : > { %v2414_v6 = vadd.f32 %v5404_v60, %v2413_v1  ;;  %v2011_v1 = vsub.f32 1.0, %v2010_v3 }
 0x3cb   : > { %v2306_v52 = vmax.f32 %v2254_v59, 0.0 }
 0x3d0   : > { %v2255_v32 = vpop.f32.mrf.mxu2 }
 0x3d1   : > { %v2256_v50 = vadd.f32 %v5317_v24, %v2255_v32  ;;  %v2415_v4 = vpop.f32.mrf.mxu3 }
 0x3d2   : > { %v2416_v51 = vadd.f32 %v5404_v60, %v2415_v4 }
 0x3d3   : > { %v2307_v29 = vmax.f32 %v2256_v50, 0.0 }
 0x3d4   : > { %v3862_v49 = vpack.c.bf16 %v2416_v51, %v2414_v6  ;;  %v2012_v51 = vmul.f32 %v4248_v28, %v2011_v1 }
 0x3d5   : > { %v2329_v19 = vpack.c.bf16 %v2307_v29, %v2306_v52 }
 0x3d6   : > { %3863 = vst [vmem:[#allocation2] sm:$0xff] %v3862_v49   ;;  %v2013_v49 = vadd.f32 %v4248_v28, %v2012_v51 }
 0x3d7   : > { %2457 = vmatmul.bf16.gmra.mxu3 %v2329_v19 }
 0x3d8   : > { %v2258_v12 = vpop.f32.mrf.mxu2 }
 0x3d9   : > { %v2418_v61 = vpop.f32.mrf.mxu3  ;;  %v2259_v36 = vadd.f32 %v5317_v24, %v2258_v12 }
 0x3da   : > { %v2419_v34 = vadd.f32 %v5404_v60, %v2418_v61 }
 0x3db   : > { %v2308_v48 = vmax.f32 %v2259_v36, 0.0 }
 0x3e0   : > { %v2260_v55 = vpop.f32.mrf.mxu2 }
 0x3e1   : > { %v2261_v22 = vadd.f32 %v5317_v24, %v2260_v55  ;;  %v2420_v10 = vpop.f32.mrf.mxu3 }
 0x3e2   : > { %v2421_v30 = vadd.f32 %v5404_v60, %v2420_v10  ;;  %v2015_v10 = vsel %vm2014_vm0, %v4248_v28, %v2013_v49 }
 0x3e3   : > { %v2309_v44 = vmax.f32 %v2261_v22, 0.0 }
 0x3e4   : > { %v3867_v14 = vpack.c.bf16 %v2421_v30, %v2419_v34 }
 0x3e5   : > { %v2330_v16 = vpack.c.bf16 %v2309_v44, %v2308_v48 }
 0x3e6   : > { %3971 = vst [vmem:[#allocation2 + $0x8] sm:$0xff] %v3867_v14  }
 0x3e7   : > { %2462 = vmatmul.bf16.gmra.mxu3 %v2330_v16 }
 0x3e8   : > { %v2263_v23 = vpop.f32.mrf.mxu2 }
 0x3e9   : > { %v2423_v63 = vpop.f32.mrf.mxu3  ;;  %v2264_v9 = vadd.f32 %v5317_v24, %v2263_v23 }
 0x3ea   : > { %v2424_v21 = vadd.f32 %v5404_v60, %v2423_v63 }
 0x3eb   : > { %v2310_v2 = vmax.f32 %v2264_v9, 0.0 }
 0x3f0   : > { %v2265_v25 = vpop.f32.mrf.mxu2 }
 0x3f1   : > { %v2266_v17 = vadd.f32 %v5317_v24, %v2265_v25  ;;  %v2425_v11 = vpop.f32.mrf.mxu3 }
 0x3f2   : > { %v2426_v0 = vadd.f32 %v5404_v60, %v2425_v11 }
 0x3f3   : > { %v2311_v13 = vmax.f32 %v2266_v17, 0.0 }
 0x3f4   : > { %v3872_v15 = vpack.c.bf16 %v2426_v0, %v2424_v21 }
 0x3f5   : > { %v2331_v53 = vpack.c.bf16 %v2311_v13, %v2310_v2 }
 0x3f6   : > { %3972 = vst [vmem:[#allocation2 + $0x10] sm:$0xff] %v3872_v15  }
 0x3f7   : > { %2467 = vmatmul.bf16.gmra.mxu3 %v2331_v53 }
 0x3f8   : > { %v2268_v33 = vpop.f32.mrf.mxu2 }
 0x3f9   : > { %v2428_v40 = vpop.f32.mrf.mxu3  ;;  %v2269_v27 = vadd.f32 %v5317_v24, %v2268_v33 }
 0x3fa   : > { %v2429_v43 = vadd.f32 %v5404_v60, %v2428_v40 }
 0x3fb   : > { %v2312_v8 = vmax.f32 %v2269_v27, 0.0 }
 0x400   : > { %v2270_v31 = vpop.f32.mrf.mxu2 }
 0x401   : > { %v2271_v5 = vadd.f32 %v5317_v24, %v2270_v31  ;;  %v2430_v37 = vpop.f32.mrf.mxu3 }
 0x402   : > { %v2431_v18 = vadd.f32 %v5404_v60, %v2430_v37 }
 0x403   : > { %v2313_v42 = vmax.f32 %v2271_v5, 0.0 }
 0x404   : > { %v3877_v46 = vpack.c.bf16 %v2431_v18, %v2429_v43 }
 0x405   : > { %v2332_v35 = vpack.c.bf16 %v2313_v42, %v2312_v8 }
 0x406   : > { %3973 = vst [vmem:[#allocation2 + $0x18] sm:$0xff] %v3877_v46  }
 0x407   : > { %2472 = vmatmul.bf16.gmra.mxu3 %v2332_v35 }
 0x408   : > { %v2273_v26 = vpop.f32.mrf.mxu2 }
 0x409   : > { %v2433_v39 = vpop.f32.mrf.mxu3  ;;  %v2274_v57 = vadd.f32 %v5317_v24, %v2273_v26 }
 0x40a   : > { %v2434_v7 = vadd.f32 %v5404_v60, %v2433_v39 }
 0x40b   : > { %v2314_v47 = vmax.f32 %v2274_v57, 0.0 }
 0x410   : > { %v2275_v54 = vpop.f32.mrf.mxu2 }
 0x411   : > { %v2276_v56 = vadd.f32 %v5317_v24, %v2275_v54  ;;  %v2435_v62 = vpop.f32.mrf.mxu3 }
 0x412   : > { %v2436_v38 = vadd.f32 %v5404_v60, %v2435_v62 }
 0x413   : > { %v2315_v58 = vmax.f32 %v2276_v56, 0.0 }
 0x414   : > { %v3882_v45 = vpack.c.bf16 %v2436_v38, %v2434_v7 }
 0x415   : > { %v2333_v41 = vpack.c.bf16 %v2315_v58, %v2314_v47 }
 0x416   : > { %3974 = vst [vmem:[#allocation2 + $0x20] sm:$0xff] %v3882_v45  }
 0x417   : > { %v2001_v59 = vpop.xlane.xlu0 %2000  ;;  %2477 = vmatmul.bf16.gmra.mxu3 %v2333_v41 }
 0x418   : > { %v2002_v32 = vrot.slane %v2001_v59, 4  ;;  %v2278_v50 = vpop.f32.mrf.mxu2 }
 0x419   : > { %v2438_v4 = vpop.f32.mrf.mxu3  ;;  %v2279_v19 = vadd.f32 %v5317_v24, %v2278_v50 }
 0x41a   : > { %v2003_v6 = vadd.f32 %v2002_v32, %v2001_v59  ;;  %v2439_v34 = vadd.f32 %v5404_v60, %v2438_v4 }
 0x41b   : > { %v2316_v48 = vmax.f32 %v2279_v19, 0.0 }
 0x41c   : > { %v2004_v52 = vrot.slane %v2003_v6, 2 }
 0x41e   : > { %v2005_v29 = vadd.f32 %v2004_v52, %v2003_v6 }
 0x420   : > { %v2006_v12 = vrot.slane %v2005_v29, 1  ;;  %v2280_v61 = vpop.f32.mrf.mxu2 }
 0x421   : > { %v2281_v36 = vadd.f32 %v5317_v24, %v2280_v61  ;;  %v2440_v55 = vpop.f32.mrf.mxu3  ;;  %v4249_v24 = vld [vmem:[%s6002_s12] ss:$0 sm:$0xff] }
 0x422   : > { %v2007_v22 = vadd.f32 %v2006_v12, %v2005_v29  ;;  %v2441_v30 = vadd.f32 %v5404_v60, %v2440_v55 }
 0x423   : > { %v2317_v44 = vmax.f32 %v2281_v36, 0.0 }
 0x424   : > { %4017 = vpush %v2007_v22  ;;  %v3887_v14 = vpack.c.bf16 %v2441_v30, %v2439_v34 }
 0x425   : > { %4019 = vpush %v2015_v10  ;;  %v2334_v16 = vpack.c.bf16 %v2317_v44, %v2316_v48 }
 0x426   : > { %3975 = vst [vmem:[#allocation2 + $0x28] sm:$0xff] %v3887_v14  }
 0x427   : > { %2482 = vmatmul.bf16.gmra.mxu3 %v2334_v16 }
 0x428   : > { %v2283_v23 = vpop.f32.mrf.mxu2 }
 0x429   : > { %v2443_v63 = vpop.f32.mrf.mxu3  ;;  %v2284_v9 = vadd.f32 %v4249_v24, %v2283_v23 }
 0x42a   : > { %v2444_v21 = vadd.f32 %v5404_v60, %v2443_v63 }
 0x42b   : > { %v2318_v2 = vmax.f32 %v2284_v9, 0.0 }
 0x430   : > { %v2285_v25 = vpop.f32.mrf.mxu2 }
 0x431   : > { %v2286_v17 = vadd.f32 %v4249_v24, %v2285_v25  ;;  %v2445_v11 = vpop.f32.mrf.mxu3 }
 0x432   : > { %v2446_v0 = vadd.f32 %v5404_v60, %v2445_v11 }
 0x433   : > { %v2319_v13 = vmax.f32 %v2286_v17, 0.0 }
 0x434   : > { %v3892_v15 = vpack.c.bf16 %v2446_v0, %v2444_v21 }
 0x435   : > { %v2335_v53 = vpack.c.bf16 %v2319_v13, %v2318_v2 }
 0x436   : > { %3976 = vst [vmem:[#allocation2 + $0x30] sm:$0xff] %v3892_v15  }
 0x437   : > { %2487 = vmatmul.bf16.gmra.mxu3 %v2335_v53 }
 0x439   : > { %v2448_v33 = vpop.f32.mrf.mxu3 }
 0x43a   : > { %v2449_v27 = vadd.f32 %v5404_v60, %v2448_v33 }
 0x441   : > { %v2450_v40 = vpop.f32.mrf.mxu3 }
 0x442   : > { %v2451_v31 = vadd.f32 %v5404_v60, %v2450_v40 }
 0x444   : > { %v3897_v5 = vpack.c.bf16 %v2451_v31, %v2449_v27 }
 0x446   : > { %3977 = vst [vmem:[#allocation2 + $0x38] sm:$0xff] %v3897_v5  }
 0x449   : > { %v2453_v37 = vpop.f32.mrf.mxu3 }
 0x44a   : > { %v2454_v18 = vadd.f32 %v5404_v60, %v2453_v37 }
 0x451   : > { %v2455_v43 = vpop.f32.mrf.mxu3 }
 0x452   : > { %v2456_v8 = vadd.f32 %v5404_v60, %v2455_v43 }
 0x454   : > { %v3902_v42 = vpack.c.bf16 %v2456_v8, %v2454_v18 }
 0x455   : > { %s4018_s2 = spop %4017 }
 0x456   : > { %s4020_s0 = spop %4019  ;;  %3978 = vst [vmem:[#allocation2 + $0x40] sm:$0xff] %v3902_v42  }
 0x457   : > { %s2017_s4 = smul.f32 %s4020_s0, %s4018_s2 }
 0x459   : > { %s2018_s5 = smul.f32 -0.5, %s2017_s4 }
 0x45a   : > { %v2458_v46 = vpop.f32.mrf.mxu3 }
 0x45b   : > { %2558 = sst [smem:[#allocation3]] %s2018_s5  ;;  %v2459_v26 = vadd.f32 %v5404_v60, %v2458_v46 }
 0x462   : > { %v2460_v35 = vpop.f32.mrf.mxu3 }
 0x463   : > { %v2461_v20 = vadd.f32 %v5404_v60, %v2460_v35 }
 0x465   : > { %v3907_v39 = vpack.c.bf16 %v2461_v20, %v2459_v26 }
 0x467   : > { %3979 = vst [vmem:[#allocation2 + $0x48] sm:$0xff] %v3907_v39  }
 0x46a   : > { %v2463_v28 = vpop.f32.mrf.mxu3 }
 0x46b   : > { %v2464_v54 = vadd.f32 %v5404_v60, %v2463_v28 }
 0x472   : > { %v2465_v57 = vpop.f32.mrf.mxu3 }
 0x473   : > { %v2466_v56 = vadd.f32 %v5404_v60, %v2465_v57 }
 0x475   : > { %v3912_v62 = vpack.c.bf16 %v2466_v56, %v2464_v54 }
 0x477   : > { %3980 = vst [vmem:[#allocation2 + $0x50] sm:$0xff] %v3912_v62  }
 0x47a   : > { %v2468_v3 = vpop.f32.mrf.mxu3 }
 0x47b   : > { %v2469_v38 = vadd.f32 %v5404_v60, %v2468_v3 }
 0x482   : > { %v2470_v7 = vpop.f32.mrf.mxu3 }
 0x483   : > { %v2471_v47 = vadd.f32 %v5404_v60, %v2470_v7 }
 0x485   : > { %v3917_v58 = vpack.c.bf16 %v2471_v47, %v2469_v38 }
 0x487   : > { %3981 = vst [vmem:[#allocation2 + $0x58] sm:$0xff] %v3917_v58  }
 0x48a   : > { %v2473_v45 = vpop.f32.mrf.mxu3 }
 0x48b   : > { %v2474_v1 = vadd.f32 %v5404_v60, %v2473_v45 }
 0x492   : > { %v2475_v41 = vpop.f32.mrf.mxu3 }
 0x493   : > { %v2476_v59 = vadd.f32 %v5404_v60, %v2475_v41 }
 0x495   : > { %v3922_v32 = vpack.c.bf16 %v2476_v59, %v2474_v1 }
 0x497   : > { %3982 = vst [vmem:[#allocation2 + $0x60] sm:$0xff] %v3922_v32  }
 0x49a   : > { %v2478_v50 = vpop.f32.mrf.mxu3 }
 0x49b   : > { %v2479_v6 = vadd.f32 %v5404_v60, %v2478_v50 }
 0x4a2   : > { %v2480_v4 = vpop.f32.mrf.mxu3 }
 0x4a3   : > { %v2481_v51 = vadd.f32 %v5404_v60, %v2480_v4 }
 0x4a5   : > { %v3927_v52 = vpack.c.bf16 %v2481_v51, %v2479_v6 }
 0x4a7   : > { %3983 = vst [vmem:[#allocation2 + $0x68] sm:$0xff] %v3927_v52  }
 0x4aa   : > { %v2483_v29 = vpop.f32.mrf.mxu3 }
 0x4ab   : > { %v2484_v19 = vadd.f32 %v5404_v60, %v2483_v29 }
 0x4b2   : > { %v2485_v49 = vpop.f32.mrf.mxu3 }
 0x4b3   : > { %v2486_v12 = vadd.f32 %v5404_v60, %v2485_v49 }
 0x4b5   : > { %v3932_v61 = vpack.c.bf16 %v2486_v12, %v2484_v19 }
 0x4b7   : > { %3984 = vst [vmem:[#allocation2 + $0x70] sm:$0xff] %v3932_v61  }
 0x4ba   : > { %v2488_v36 = vpop.f32.mrf.mxu3 }
 0x4bb   : > { %v2489_v22 = vadd.f32 %v5404_v60, %v2488_v36 }
 0x4c2   : > { %v2490_v55 = vpop.f32.mrf.mxu3 }
 0x4c3   : > { %v2491_v10 = vadd.f32 %v5404_v60, %v2490_v55 }
 0x4c5   : > { %v3937_v34 = vpack.c.bf16 %v2491_v10, %v2489_v22 }
 0x4c7   : > { %3985 = vst [vmem:[#allocation2 + $0x78] sm:$0xff] %v3937_v34  }
 0x4c8 PF: > { %s3690_s6 = sshll.u32 %s4697_s20, 7  ;;  %s3688_s10 = sshll.u32 %s4701_s21, 7  ;;  %v5472_v22 = vld [vmem:[%s4959_s7] sm:$0xff]  }
 0x4c9   : > { %s2583_s9 = sshra.s32 %s3690_s6, 3  ;;  %s2562_s1 = sshra.s32 %s3688_s10, 3 }
 0x4ca   : > { %s3691_s8 = sshll.u32 %s2583_s9, 2  ;;  %s3689_s27 = sshll.u32 %s2562_s1, 2 }
 0x4cb   : > { %s5454_s26 = scalar_lea.vmem [#allocation2], %s3691_s8  ;;  %s2565_s15 = scalar_lea.vmem [#allocation2], %s3689_s27 }
 0x4cc   : > { %p3177_p1 = scmp.eq.s32.totalorder %s4701_s21, 1  ;;  %p3178_p6 = scmp.eq.s32.totalorder %s4697_s20, 1 }
 0x4ce   : > { %v3858_v30 = vld [vmem:[%s5454_s26 + $0x38] sm:$0xff]  ;;  %v3857_v60 = vld [vmem:[%s5454_s26 + $0x30] sm:$0xff]  ;;  %v3856_v48 = vld [vmem:[%s5454_s26 + $0x28] sm:$0xff]  ;;  %p3179_p7 = pnand %p3178_p6, %p3177_p1 }
 0x4cf   : > { %2699 = vmatpush.bf16.xpose.msra.mxu0 %v3858_v30  ;;  %3993 = vmatpush.bf16.xpose.msra.mxu1 %v3858_v30  ;;  %v3855_v44 = vld [vmem:[%s5454_s26 + $0x20] sm:$0xff]  ;;  %v3854_v14 = vld [vmem:[%s5454_s26 + $0x18] sm:$0xff]  ;;  %v3853_v16 = vld [vmem:[%s5454_s26 + $0x10] sm:$0xff]  ;;  %s3183_s21 = sld [smem:[#allocation3]] (!%p3179_p7) }
 0x4d0   : > { %3994 = vmatpush.bf16.xpose.msra.mxu2 %v3858_v30  ;;  %3995 = vmatpush.bf16.xpose.msra.mxu3 %v3858_v30  ;;  %v3852_v23 = vld [vmem:[%s5454_s26 + $0x8] sm:$0xff]  ;;  %v3851_v63 = vld [vmem:[%s5454_s26] sm:$0xff]  ;;  %v3845_v9 = vld [vmem:[%s2565_s15 + $0x10] sm:$0xff] }
 0x4d1   : > { %v3843_v24 = vld [vmem:[%s2565_s15] sm:$0xff]  ;;  %v3849_v17 = vld [vmem:[%s2565_s15 + $0x30] sm:$0xff]  ;;  %v3844_v11 = vld [vmem:[%s2565_s15 + $0x8] sm:$0xff] }
 0x4d2   : > { %v3847_v25 = vld [vmem:[%s2565_s15 + $0x20] sm:$0xff]  ;;  %v3846_v21 = vld [vmem:[%s2565_s15 + $0x18] sm:$0xff]  ;;  %v3848_v0 = vld [vmem:[%s2565_s15 + $0x28] sm:$0xff] }
 0x4d3   : > { %v3850_v2 = vld [vmem:[%s2565_s15 + $0x38] sm:$0xff] }
 0x4d7   : > { %2700 = vmatpush.bf16.xpose.msra.mxu0 %v3857_v60  ;;  %3996 = vmatpush.bf16.xpose.msra.mxu1 %v3857_v60 }
 0x4d8   : > { %3997 = vmatpush.bf16.xpose.msra.mxu2 %v3857_v60  ;;  %3998 = vmatpush.bf16.xpose.msra.mxu3 %v3857_v60 }
 0x4df   : > { %2701 = vmatpush.bf16.xpose.msra.mxu0 %v3856_v48  ;;  %3999 = vmatpush.bf16.xpose.msra.mxu1 %v3856_v48 }
 0x4e0   : > { %4000 = vmatpush.bf16.xpose.msra.mxu2 %v3856_v48  ;;  %4001 = vmatpush.bf16.xpose.msra.mxu3 %v3856_v48  ;;  %v5477_v48 = vld [vmem:[%s4959_s7 + $0x10] sm:$0xff]  }
 0x4e7   : > { %2702 = vmatpush.bf16.xpose.msra.mxu0 %v3855_v44  ;;  %4002 = vmatpush.bf16.xpose.msra.mxu1 %v3855_v44 }
 0x4e8   : > { %4003 = vmatpush.bf16.xpose.msra.mxu2 %v3855_v44  ;;  %4004 = vmatpush.bf16.xpose.msra.mxu3 %v3855_v44 }
 0x4ef   : > { %2703 = vmatpush.bf16.xpose.msra.mxu0 %v3854_v14  ;;  %4005 = vmatpush.bf16.xpose.msra.mxu1 %v3854_v14 }
 0x4f0   : > { %4006 = vmatpush.bf16.xpose.msra.mxu2 %v3854_v14  ;;  %4007 = vmatpush.bf16.xpose.msra.mxu3 %v3854_v14 }
 0x4f7   : > { %2704 = vmatpush.bf16.xpose.msra.mxu0 %v3853_v16  ;;  %4008 = vmatpush.bf16.xpose.msra.mxu1 %v3853_v16 }
 0x4f8   : > { %4009 = vmatpush.bf16.xpose.msra.mxu2 %v3853_v16  ;;  %4010 = vmatpush.bf16.xpose.msra.mxu3 %v3853_v16  ;;  %v3941_v16 = vunpack.c.l.bf16 %v5472_v22 }
 0x4ff   : > { %2705 = vmatpush.bf16.xpose.msra.mxu0 %v3852_v23  ;;  %4011 = vmatpush.bf16.xpose.msra.mxu1 %v3852_v23 }
 0x500   : > { %4012 = vmatpush.bf16.xpose.msra.mxu2 %v3852_v23  ;;  %4013 = vmatpush.bf16.xpose.msra.mxu3 %v3852_v23  ;;  %v5481_v23 = vld [vmem:[%s4959_s7 + $0x20] sm:$0xff]  }
 0x507   : > { %2706 = vmatpush.bf16.xpose.msra.mxu0 %v3851_v63  ;;  %4014 = vmatpush.bf16.xpose.msra.mxu1 %v3851_v63 }
 0x508   : > { %4015 = vmatpush.bf16.xpose.msra.mxu2 %v3851_v63  ;;  %4016 = vmatpush.bf16.xpose.msra.mxu3 %v3851_v63 }
 0x50e   : > { %2707 = vmatmul.bf16.vlgmr.msra.gmra.mxu0 %v3843_v24  ;;  %2717 = vmatmul.bf16.vlgmr.msra.gmra.mxu1 %v3845_v9  ;;  %v5486_v9 = vstv %s4980_s29 }
 0x50f   : > { %2727 = vmatmul.bf16.vlgmr.msra.gmra.mxu2 %v3847_v25  ;;  %2737 = vmatmul.bf16.vlgmr.msra.gmra.mxu3 %v3849_v17 }
 0x51e   : > { %2712 = vmatmul.bf16.gmra.mxu0 %v3844_v11  ;;  %2722 = vmatmul.bf16.gmra.mxu1 %v3846_v21  ;;  %v3949_v11 = vunpack.c.l.bf16 %v5477_v48  ;;  %v3942_v21 = vunpack.c.h.bf16 %v5472_v22 }
 0x51f   : > { %2732 = vmatmul.bf16.gmra.mxu2 %v3848_v0  ;;  %2742 = vmatmul.bf16.gmra.mxu3 %v3850_v2  ;;  %v3950_v0 = vunpack.c.h.bf16 %v5477_v48 }
 0x58b   : > { %v2708_v13 = vpop.f32.mrf.mxu0  ;;  %v2718_v15 = vpop.f32.mrf.mxu1 }
 0x58c   : > { %v2748_v53 = vsub.f32 0.0, %v2708_v13  ;;  %v2752_v33 = vsub.f32 0.0, %v2718_v15  ;;  %v3957_v13 = vunpack.c.l.bf16 %v5481_v23 }
 0x58e   : > { %v2764_v40 = vmul.f32 1.442695, %v2748_v53  ;;  %v2772_v27 = vmul.f32 1.442695, %v2752_v33  ;;  %v5499_v33 = vld [vmem:[%s4959_s7 + $0x8] sm:$0xff]  }
 0x590   : > { %4250 = vpow2.f32 %v2764_v40  ;;  %v2860_v40 = vsub.f32 1.0, %v3941_v16 }
 0x591   : > { %4252 = vpow2.f32 %v2772_v27  ;;  %v3070_v27 = vmul.f32 %v3941_v16, %v5486_v9 }
 0x592   : > { %v2728_v31 = vpop.f32.mrf.mxu2  ;;  %v2738_v5 = vpop.f32.mrf.mxu3 }
 0x593   : > { %v2756_v37 = vsub.f32 0.0, %v2728_v31  ;;  %v2760_v43 = vsub.f32 0.0, %v2738_v5  ;;  %v2710_v18 = vpop.f32.mrf.mxu0  ;;  %v2720_v8 = vpop.f32.mrf.mxu1  ;;  %v3074_v31 = vmul.f32 %v3949_v11, %v5486_v9 }
 0x594   : > { %v2749_v42 = vsub.f32 0.0, %v2710_v18  ;;  %v2753_v46 = vsub.f32 0.0, %v2720_v8  ;;  %v3078_v18 = vmul.f32 %v3957_v13, %v5486_v9 }
 0x595   : > { %v2780_v35 = vmul.f32 1.442695, %v2756_v37  ;;  %v2788_v26 = vmul.f32 1.442695, %v2760_v43 }
 0x596   : > { %v4251_v20 = vpop.eup %4250  ;;  %v2766_v57 = vmul.f32 1.442695, %v2749_v42  ;;  %v2774_v56 = vmul.f32 1.442695, %v2753_v46  ;;  %v3958_v42 = vunpack.c.h.bf16 %v5481_v23 }
 0x597   : > { %v4253_v39 = vpop.eup %4252  ;;  %v2796_v28 = vadd.f32 1.0, %v4251_v20  ;;  %4254 = vpow2.f32 %v2780_v35  ;;  %v5509_v20 = vsub.f32 1.0, %v3942_v21 }
 0x598   : > { %v2800_v54 = vadd.f32 1.0, %v4253_v39  ;;  %4256 = vpow2.f32 %v2788_v26  ;;  %v2864_v26 = vsub.f32 1.0, %v3949_v11  ;;  %v3945_v39 = vunpack.c.l.bf16 %v5499_v33 }
 0x599   : > { %4258 = vrcp.f32 %v2796_v28 }
 0x59a   : > { %4260 = vrcp.f32 %v2800_v54  ;;  %v2730_v62 = vpop.f32.mrf.mxu2  ;;  %v2740_v36 = vpop.f32.mrf.mxu3 }
 0x59b   : > { %4262 = vpow2.f32 %v2766_v57  ;;  %v2757_v3 = vsub.f32 0.0, %v2730_v62  ;;  %v2713_v41 = vpop.f32.mrf.mxu0  ;;  %v2723_v52 = vpop.f32.mrf.mxu1  ;;  %v2761_v44 = vsub.f32 0.0, %v2740_v36  ;;  %v2868_v57 = vsub.f32 1.0, %v3957_v13 }
 0x59c   : > { %4264 = vpow2.f32 %v2774_v56  ;;  %v2750_v51 = vsub.f32 0.0, %v2713_v41  ;;  %v2754_v61 = vsub.f32 0.0, %v2723_v52  ;;  %v5514_v56 = vsub.f32 1.0, %v3950_v0 }
 0x59d   : > { %v4255_v7 = vpop.eup %4254  ;;  %v2782_v38 = vmul.f32 1.442695, %v2757_v3  ;;  %v2790_v53 = vmul.f32 1.442695, %v2761_v44  ;;  %v5518_v3 = vadd.f32 %v3070_v27, %v2860_v40  ;;  %v5526_v41 = vsub.f32 1.0, %v3958_v42 }
 0x59e   : > { %v4257_v47 = vpop.eup %4256  ;;  %v2804_v58 = vadd.f32 1.0, %v4255_v7  ;;  %v2768_v55 = vmul.f32 1.442695, %v2750_v51  ;;  %v2776_v14 = vmul.f32 1.442695, %v2754_v61  ;;  %v5520_v7 = vadd.f32 %v3074_v31, %v2864_v26 }
 0x59f   : > { %v5465_v45 = vpop.eup %4258  ;;  %4266 = vpow2.f32 %v2782_v38  ;;  %v2808_v12 = vadd.f32 1.0, %v4257_v47  ;;  %v3075_v36 = vmul.f32 %v3950_v0, %v5486_v9 }
 0x5a0   : > { %v5467_v1 = vpop.eup %4260  ;;  %v2876_v59 = vsub.f32 0.0, %v5465_v45  ;;  %4268 = vrcp.f32 %v2804_v58  ;;  %v5522_v58 = vadd.f32 %v3078_v18, %v2868_v57 }
 0x5a1   : > { %v4263_v32 = vpop.eup %4262  ;;  %v2880_v29 = vsub.f32 0.0, %v5467_v1  ;;  %v5546_v48 = vmul.f32 %v5467_v1, %v2864_v26 }
 0x5a2   : > { %v4265_v50 = vpop.eup %4264  ;;  %v2892_v4 = vmul.f32 1.442695, %v2876_v59  ;;  %v2797_v6 = vadd.f32 1.0, %v4263_v32  ;;  %v2733_v34 = vpop.f32.mrf.mxu2 }
 0x5a3   : > { %v2801_v49 = vadd.f32 1.0, %v4265_v50  ;;  %v2900_v10 = vmul.f32 1.442695, %v2880_v29  ;;  %v2758_v63 = vsub.f32 0.0, %v2733_v34  ;;  %v2743_v51 = vpop.f32.mrf.mxu3  ;;  %v2715_v52 = vpop.f32.mrf.mxu0  ;;  %v5538_v29 = vmul.f32 %v5465_v45, %v2860_v40 }
 0x5a4   : > { %4270 = vpow2.f32 %v2892_v4  ;;  %v5532_v4 = vsub.f32 1.0, %v3945_v39  ;;  %v2762_v34 = vsub.f32 0.0, %v2743_v51 }
 0x5a5   : > { %v4267_v19 = vpop.eup %4266  ;;  %4272 = vrcp.f32 %v2797_v6  ;;  %v2784_v5 = vmul.f32 1.442695, %v2758_v63  ;;  %v5535_v6 = vld [vmem:[%s4959_s7 + $0x18] sm:$0xff]  }
 0x5a6   : > { %4274 = vrcp.f32 %v2801_v49  ;;  %v5474_v30 = vpop.eup %4268  ;;  %v2805_v60 = vadd.f32 1.0, %v4267_v19  ;;  %v3071_v49 = vmul.f32 %v3942_v21, %v5486_v9  ;;  %v2792_v31 = vmul.f32 1.442695, %v2762_v34 }
 0x5a7   : > { %4276 = vrcp.f32 %v2808_v12  ;;  %v2884_v25 = vsub.f32 0.0, %v5474_v30  ;;  %v2725_v12 = vpop.f32.mrf.mxu1  ;;  %v5562_v40 = vmul.f32 %v5474_v30, %v2868_v57 }
 0x5a8   : > { %4278 = vpow2.f32 %v2768_v55  ;;  %v5553_v11 = vadd.f32 %v3071_v49, %v5509_v20 }
 0x5a9   : > { %4280 = vpow2.f32 %v2900_v10  ;;  %v2908_v43 = vmul.f32 1.442695, %v2884_v25  ;;  %v3953_v10 = vunpack.c.l.bf16 %v5535_v6 }
 0x5aa   : > { %v5483_v24 = vpop.eup %4270  ;;  %4282 = vrcp.f32 %v2805_v60  ;;  %v2751_v60 = vsub.f32 0.0, %v2715_v52  ;;  %v5597_v52 = vld [vmem:[%s4959_s7 + $0x28] sm:$0xff]  }
 0x5ab   : > { %v5489_v17 = vpop.eup %4272  ;;  %4284 = vpow2.f32 %v2776_v14  ;;  %v2924_v35 = vadd.f32 1.0, %v5483_v24  ;;  %v2927_v61 = vmul.f32 -0.5, %v5483_v24  ;;  %v2755_v14 = vsub.f32 0.0, %v2725_v12 }
 0x5ac   : > { %v5494_v2 = vpop.eup %4274  ;;  %v2877_v15 = vsub.f32 0.0, %v5489_v17  ;;  %4286 = vpow2.f32 %v2790_v53  ;;  %v2930_v63 = vand.u32 2147483647, %v5483_v24  ;;  %v5557_v53 = vadd.f32 %v3075_v36, %v5514_v56 }
 0x5ad   : > { %v5503_v37 = vpop.eup %4276  ;;  %v2881_v8 = vsub.f32 0.0, %v5494_v2  ;;  %4288 = vpow2.f32 %v2784_v5  ;;  %v2928_v13 = vadd.f32 1.0, %v2927_v61  ;;  %v5566_v27 = vsub.f32 1.0, %v3953_v10 }
 0x5ae   : > { %v4279_v46 = vpop.eup %4278  ;;  %v2894_v54 = vmul.f32 1.442695, %v2877_v15  ;;  %4290 = vpow2.f32 %v2908_v43  ;;  %v2888_v50 = vsub.f32 0.0, %v5503_v37  ;;  %v2770_v5 = vmul.f32 1.442695, %v2751_v60 }
 0x5af   : > { %v5512_v28 = vpop.eup %4280  ;;  %v2902_v38 = vmul.f32 1.442695, %v2881_v8  ;;  %v2798_v59 = vadd.f32 1.0, %v4279_v46  ;;  %4292 = vlog2.f32 %v2924_v35  ;;  %v3079_v8 = vmul.f32 %v3958_v42, %v5486_v9 }
 0x5b0   : > { %v5516_v62 = vpop.eup %4282  ;;  %v2960_v32 = vadd.f32 1.0, %v5512_v28  ;;  %4294 = vpow2.f32 %v2894_v54  ;;  %v2916_v44 = vmul.f32 1.442695, %v2888_v50  ;;  %v2963_v25 = vmul.f32 -0.5, %v5512_v28 }
 0x5b1   : > { %v4285_v47 = vpop.eup %4284  ;;  %v2885_v19 = vsub.f32 0.0, %v5516_v62  ;;  %4296 = vpow2.f32 %v2902_v38  ;;  %v2966_v15 = vand.u32 2147483647, %v5512_v28  ;;  %v2778_v46 = vmul.f32 1.442695, %v2755_v14 }
 0x5b2   : > { %v2802_v55 = vadd.f32 1.0, %v4285_v47  ;;  %v4287_v22 = vpop.eup %4286  ;;  %4298 = vrcp.f32 %v2798_v59  ;;  %vm5576_vm1 = vcmp.lt.f32.partialorder %v2930_v63, 0.0004427343  ;;  %v2964_v26 = vadd.f32 1.0, %v2963_v25  ;;  %v2735_v59 = vpop.f32.mrf.mxu2 }
 0x5b3   : > { %v4289_v45 = vpop.eup %4288  ;;  %4300 = vlog2.f32 %v2960_v32  ;;  %v2910_v21 = vmul.f32 1.442695, %v2885_v19  ;;  %v2809_v57 = vadd.f32 1.0, %v4287_v22  ;;  %v2929_v38 = vmul.f32 %v5483_v24, %v2928_v13 }
 0x5b4   : > { %v5548_v16 = vpop.eup %4290  ;;  %4302 = vrcp.f32 %v2802_v55  ;;  %vm5581_vm2 = vcmp.lt.f32.partialorder %v2966_v15, 0.0004427343  ;;  %v5588_v42 = vmul.f32 %v5489_v17, %v5509_v20  ;;  %v5594_v51 = vmul.f32 %v5494_v2, %v5514_v56 }
 0x5b5   : > { %v4293_v0 = vpop.eup %4292  ;;  %v2996_v18 = vadd.f32 1.0, %v5548_v16  ;;  %4304 = vpow2.f32 %v2916_v44  ;;  %v2999_v32 = vmul.f32 -0.5, %v5548_v16  ;;  %v2806_v24 = vadd.f32 1.0, %v4289_v45 }
 0x5b6   : > { %v5559_v1 = vpop.eup %4294  ;;  %4306 = vpow2.f32 %v2910_v21  ;;  %v2926_v19 = vmul.f32 0.6931472, %v4293_v0  ;;  %v3002_v12 = vand.u32 2147483647, %v5548_v16  ;;  %v2965_v61 = vmul.f32 %v5512_v28, %v2964_v26  ;;  %v2745_v21 = vpop.f32.mrf.mxu3 }
 0x5b7   : > { %v5568_v43 = vpop.eup %4296  ;;  %v2933_v23 = vadd.f32 1.0, %v5559_v1  ;;  %4308 = vlog2.f32 %v2996_v18  ;;  %v2759_v36 = vsub.f32 0.0, %v2735_v59  ;;  %v5607_v2 = vadd.f32 %v3079_v8, %v5526_v41 }
 0x5b8   : > { %v5574_v35 = vpop.eup %4298  ;;  %v2969_v50 = vadd.f32 1.0, %v5568_v43  ;;  %4310 = vrcp.f32 %v2809_v57  ;;  %v5611_v56 = vmul.f32 %v5516_v62, %v5526_v41  ;;  %v3961_v22 = vunpack.c.l.bf16 %v5597_v52 }
 0x5b9   : > { %v4301_v54 = vpop.eup %4300  ;;  %v2878_v17 = vsub.f32 0.0, %v5574_v35  ;;  %4312 = vlog2.f32 %v2933_v23  ;;  %v3000_v60 = vadd.f32 1.0, %v2999_v32  ;;  %v3946_v45 = vunpack.c.h.bf16 %v5499_v33 }
 0x5ba   : > { %v5599_v49 = vpop.eup %4302  ;;  %v2962_v20 = vmul.f32 0.6931472, %v4301_v54  ;;  %4314 = vlog2.f32 %v2969_v50  ;;  %v2932_v44 = vsel %vm5576_vm1, %v2929_v38, %v2926_v19  ;;  %vm5620_vm3 = vcmp.lt.f32.partialorder %v3002_v12, 0.0004427343 }
 0x5bb   : > { %v5604_v55 = vpop.eup %4304  ;;  %v2882_v28 = vsub.f32 0.0, %v5599_v49  ;;  %v2896_v63 = vmul.f32 1.442695, %v2878_v17  ;;  %4316 = vrcp.f32 %v2806_v24  ;;  %v3072_v41 = vmul.f32 %v3945_v39, %v5486_v9 }
 0x5bc   : > { %v5614_v34 = vpop.eup %4306  ;;  %v2968_v62 = vsel %vm5581_vm2, %v2965_v61, %v2962_v20  ;;  %4318 = vpow2.f32 %v2792_v31  ;;  %v2786_v25 = vmul.f32 1.442695, %v2759_v36  ;;  %v2936_v13 = vmul.f32 -0.5, %v5559_v1 }
 0x5bd   : > { %v4309_v0 = vpop.eup %4308  ;;  %v3005_v15 = vadd.f32 1.0, %v5614_v34  ;;  %v3076_v18 = vmul.f32 %v3953_v10, %v5486_v9  ;;  %4320 = vpow2.f32 %v2770_v5  ;;  %v3102_v30 = vmul.f32 %v5518_v3, %v2932_v44 }
 0x5be   : > { %v5634_v8 = vpop.eup %4310  ;;  %v3001_v26 = vmul.f32 %v5548_v16, %v3000_v60  ;;  %v2904_v39 = vmul.f32 1.442695, %v2882_v28  ;;  %4322 = vpow2.f32 %v2778_v46  ;;  %v3106_v57 = vmul.f32 %v5520_v7, %v2968_v62 }
 0x5bf   : > { %v4313_v31 = vpop.eup %4312  ;;  %v2939_v54 = vand.u32 2147483647, %v5559_v1  ;;  %4324 = vpow2.f32 %v2896_v63  ;;  %v2763_v38 = vsub.f32 0.0, %v2745_v21  ;;  %v2998_v23 = vmul.f32 0.6931472, %v4309_v0 }
 0x5c0   : > { %v4315_v47 = vpop.eup %4314  ;;  %v2972_v10 = vmul.f32 -0.5, %v5568_v43  ;;  %v5643_v5 = vsub.f32 1.0, %v3961_v22  ;;  %4326 = vpow2.f32 %v2786_v25  ;;  %v2937_v16 = vadd.f32 1.0, %v2936_v13 }
 0x5c1   : > { %v5645_v3 = vpop.eup %4316  ;;  %v2975_v46 = vand.u32 2147483647, %v5568_v43  ;;  %4328 = vlog2.f32 %v3005_v15  ;;  %v5649_v7 = vadd.f32 %v3072_v41, %v5532_v4  ;;  %v5652_v32 = vadd.f32 %v5538_v29, %v3102_v30 }
 0x5c2   : > { %v4319_v59 = vpop.eup %4318  ;;  %4330 = vpow2.f32 %v2904_v39  ;;  %v5655_v50 = vadd.f32 %v3076_v18, %v5566_v27  ;;  %v5659_v24 = vsub.f32 1.0, %v3946_v45  ;;  %v5662_v12 = vadd.f32 %v5546_v48, %v3106_v57 }
 0x5c3   : > { %v4321_v19 = vpop.eup %4320  ;;  %vm5664_vm4 = vcmp.lt.f32.partialorder %v2939_v54, 0.0004427343  ;;  %v3008_v20 = vmul.f32 -0.5, %v5614_v34  ;;  %v2794_v29 = vmul.f32 1.442695, %v2763_v38  ;;  %v3004_v36 = vsel %vm5620_vm3, %v3001_v26, %v2998_v23 }
 0x5c4   : > { %v4323_v61 = vpop.eup %4322  ;;  %v2973_v60 = vadd.f32 1.0, %v2972_v10  ;;  %v3011_v28 = vand.u32 2147483647, %v5614_v34  ;;  %v2799_v44 = vadd.f32 1.0, %v4321_v19  ;;  %v2935_v62 = vmul.f32 0.6931472, %v4313_v31 }
 0x5c5   : > { %v5672_v63 = vpop.eup %4324  ;;  %v2938_v48 = vmul.f32 %v5559_v1, %v2937_v16  ;;  %vm5675_vm5 = vcmp.lt.f32.partialorder %v2975_v46, 0.0004427343  ;;  %v2889_v25 = vsub.f32 0.0, %v5634_v8  ;;  %v2886_v0 = vsub.f32 0.0, %v5645_v3 }
 0x5c6   : > { %v4327_v21 = vpop.eup %4326  ;;  %v2810_v14 = vadd.f32 1.0, %v4319_v59  ;;  %4332 = vrcp.f32 %v2799_v44  ;;  %v2803_v13 = vadd.f32 1.0, %v4323_v61  ;;  %v3110_v18 = vmul.f32 %v5522_v58, %v3004_v36 }
 0x5c7   : > { %v4329_v15 = vpop.eup %4328  ;;  %v3009_v30 = vadd.f32 1.0, %v3008_v20  ;;  %v2807_v26 = vadd.f32 1.0, %v4327_v21  ;;  %4334 = vpow2.f32 %v2794_v29  ;;  %v2974_v1 = vmul.f32 %v5568_v43, %v2973_v60 }
 0x5c8   : > { %v5682_v39 = vpop.eup %4330  ;;  %vm5685_vm6 = vcmp.lt.f32.partialorder %v3011_v28, 0.0004427343  ;;  %v2942_v57 = vadd.f32 1.0, %v5672_v63  ;;  %4336 = vrcp.f32 %v2803_v13  ;;  %v2941_v54 = vsel %vm5664_vm4, %v2938_v48, %v2935_v62 }
 0x5c9   : > { %v2918_v38 = vmul.f32 1.442695, %v2889_v25  ;;  %v3080_v58 = vmul.f32 %v3961_v22, %v5486_v9  ;;  %4338 = vrcp.f32 %v2807_v26  ;;  %v2971_v23 = vmul.f32 0.6931472, %v4315_v47 }
 0x5ca   : > { %v3007_v10 = vmul.f32 0.6931472, %v4329_v15  ;;  %v2912_v16 = vmul.f32 1.442695, %v2886_v0  ;;  %4340 = vrcp.f32 %v2810_v14  ;;  %v5696_v43 = vadd.f32 %v5562_v40, %v3110_v18  ;;  %v5736_v0 = vld [vmem:[%s4959_s7 + $0x30] sm:$0xff]  }
 0x5cb   : > { %v3010_v46 = vmul.f32 %v5614_v34, %v3009_v30  ;;  %v5701_v59 = vmul.f32 %v5574_v35, %v5532_v4  ;;  %v2978_v19 = vadd.f32 1.0, %v5682_v39  ;;  %v3103_v22 = vmul.f32 %v5553_v11, %v2941_v54 }
 0x5cc   : > { %v5704_v17 = vpop.eup %4332  ;;  %4342 = vlog2.f32 %v2942_v57  ;;  %v5709_v47 = vmul.f32 %v5599_v49, %v5566_v27  ;;  %v3954_v40 = vunpack.c.h.bf16 %v5535_v6  ;;  %v5713_v34 = vadd.f32 %v3080_v58, %v5643_v5 }
 0x5cd   : > { %v4335_v20 = vpop.eup %4334  ;;  %4344 = vpow2.f32 %v2918_v38  ;;  %v2879_v4 = vsub.f32 0.0, %v5704_v17  ;;  %v3962_v35 = vunpack.c.h.bf16 %v5597_v52  ;;  %v2977_v11 = vsel %vm5675_vm5, %v2974_v1, %v2971_v23 }
 0x5ce   : > { %v5717_v29 = vpop.eup %4336  ;;  %v3013_v27 = vsel %vm5685_vm6, %v3010_v46, %v3007_v10  ;;  %4346 = vpow2.f32 %v2912_v16  ;;  %v2811_v6 = vadd.f32 1.0, %v4335_v20  ;;  %v2945_v61 = vmul.f32 -0.5, %v5672_v63 }
 0x5cf   : > { %v5723_v49 = vpop.eup %4338  ;;  %4348 = vlog2.f32 %v2978_v19  ;;  %v2898_v36 = vmul.f32 1.442695, %v2879_v4  ;;  %v2883_v60 = vsub.f32 0.0, %v5717_v29  ;;  %v3135_v44 = vadd.f32 %v5588_v42, %v3103_v22 }
 0x5d0   : > { %v5727_v28 = vpop.eup %4340  ;;  %v2981_v62 = vmul.f32 -0.5, %v5682_v39  ;;  %v2887_v48 = vsub.f32 0.0, %v5723_v49  ;;  %4350 = vrcp.f32 %v2811_v6  ;;  %v3107_v41 = vmul.f32 %v5557_v53, %v2977_v11 }
 0x5d1   : > { %4352 = vpow2.f32 %v2898_v36  ;;  %v5733_v25 = vsub.f32 1.0, %v3954_v40  ;;  %v2906_v21 = vmul.f32 1.442695, %v2883_v60  ;;  %v3111_v13 = vmul.f32 %v5607_v2, %v3013_v27 }
 0x5d2   : > { %v4343_v14 = vpop.eup %4342  ;;  %v2948_v15 = vand.u32 2147483647, %v5672_v63  ;;  %v2984_v42 = vand.u32 2147483647, %v5682_v39  ;;  %v2914_v18 = vmul.f32 1.442695, %v2887_v48  ;;  %v5749_v57 = vadd.f32 %v3135_v44, %v5652_v32 }
 0x5d3   : > { %v5741_v30 = vpop.eup %4344  ;;  %v2946_v26 = vadd.f32 1.0, %v2945_v61  ;;  %v2890_v1 = vsub.f32 0.0, %v5727_v28  ;;  %4354 = vpow2.f32 %v2906_v21  ;;  %v5746_v53 = vsub.f32 1.0, %v3962_v35 }
 0x5d4   : > { %v4347_v31 = vpop.eup %4346  ;;  %v2982_v2 = vadd.f32 1.0, %v2981_v62  ;;  %v3073_v54 = vmul.f32 %v3946_v45, %v5486_v9  ;;  %v3965_v38 = vunpack.c.l.bf16 %v5736_v0  ;;  %v5756_v23 = vadd.f32 %v5594_v51, %v3107_v41 }
 0x5d5   : > { %v4349_v58 = vpop.eup %4348  ;;  %v2944_v10 = vmul.f32 0.6931472, %v4343_v14  ;;  %v5760_v16 = vmul.f32 %v5645_v3, %v5643_v5  ;;  %4356 = vpow2.f32 %v2914_v18  ;;  %v5765_v46 = vadd.f32 %v5611_v56, %v3111_v13  ;;  %v5780_v56 = vld [vmem:[%s4959_s7 + $0x38] sm:$0xff]   ;;  %s3756_s7 = sld [smem:[#allocation3 + $0x1]] }
 0x5d6   : > { %v5762_v32 = vpop.eup %4350  ;;  %vm5767_vm7 = vcmp.lt.f32.partialorder %v2948_v15, 0.0004427343  ;;  %vm5771_vm8 = vcmp.lt.f32.partialorder %v2984_v42, 0.0004427343  ;;  %v3966_v51 = vunpack.c.h.bf16 %v5736_v0  ;;  %v2947_v5 = vmul.f32 %v5672_v63, %v2946_v26 }
 0x5d7   : > { %v4353_v19 = vpop.eup %4352  ;;  %v2920_v3 = vmul.f32 1.442695, %v2890_v1  ;;  %v3077_v22 = vmul.f32 %v3954_v40, %v5486_v9  ;;  %v2891_v20 = vsub.f32 0.0, %v5762_v32  ;;  %v2983_v4 = vmul.f32 %v5682_v39, %v2982_v2 }
 0x5d8   : > { %v2951_v11 = vadd.f32 1.0, %v4353_v19  ;;  %v3089_v27 = vadd.f32 %v3073_v54, %v5659_v24  ;;  %v3017_v6 = vmul.f32 -0.5, %v4347_v31  ;;  %v2950_v36 = vsel %vm5767_vm7, %v2947_v5, %v2944_v10 }
 0x5d9   : > { %v4355_v61 = vpop.eup %4354  ;;  %v2980_v60 = vmul.f32 0.6931472, %v4349_v58  ;;  %v2954_v44 = vmul.f32 -0.5, %v4353_v19  ;;  %v2922_v63 = vmul.f32 1.442695, %v2891_v20  ;;  %v3969_v40 = vunpack.c.l.bf16 %v5780_v56 }
 0x5da   : > { %4358 = vlog2.f32 %v2951_v11  ;;  %v2987_v62 = vadd.f32 1.0, %v4355_v61  ;;  %v3014_v48 = vadd.f32 1.0, %v4347_v31  ;;  %v5790_v39 = vadd.f32 %v3077_v22, %v5733_v25 }
 0x5db   : > { %v5787_v41 = vpop.eup %4356  ;;  %4360 = vpow2.f32 %v2920_v3  ;;  %v3970_v21 = vunpack.c.h.bf16 %v5780_v56  ;;  %v5795_v14 = vsub.f32 1.0, %v3965_v38  ;;  %v3104_v13 = vmul.f32 %v5649_v7, %v2950_v36 }
 0x5dc   : > { %4362 = vlog2.f32 %v2987_v62  ;;  %v3018_v15 = vadd.f32 1.0, %v3017_v6  ;;  %v3020_v42 = vand.u32 2147483647, %v4347_v31  ;;  %v2986_v18 = vsel %vm5771_vm8, %v2983_v4, %v2980_v60 }
 0x5dd   : > { %v2955_v26 = vadd.f32 1.0, %v2954_v44  ;;  %v2990_v1 = vmul.f32 -0.5, %v4355_v61  ;;  %4364 = vpow2.f32 %v2922_v63  ;;  %v2957_v2 = vand.u32 2147483647, %v4353_v19 }
 0x5de   : > { %v5802_v54 = vsub.f32 1.0, %v3966_v51  ;;  %4366 = vlog2.f32 %v3014_v48  ;;  %v3023_v58 = vadd.f32 1.0, %v5787_v41  ;;  %v5807_v7 = vsub.f32 1.0, %v3969_v40 }
 0x5df   : > { %v5811_v10 = vsub.f32 1.0, %v3970_v21  ;;  %v3032_v33 = vadd.f32 1.0, %v5604_v55  ;;  %v3035_v45 = vmul.f32 -0.5, %v5604_v55  ;;  %v3136_v3 = vadd.f32 %v5701_v59, %v3104_v13 }
 0x5e0   : > { %v4359_v5 = vpop.eup %4358  ;;  %v3108_v22 = vmul.f32 %v5655_v50, %v2986_v18  ;;  %v3121_v20 = vmul.f32 %v5704_v17, %v5659_v24  ;;  %v5819_v4 = vmul.f32 %v4347_v31, %v3018_v15  ;;  %vm5821_vm9 = vcmp.lt.f32.partialorder %v3020_v42, 0.0004427343 }
 0x5e1   : > { %v5825_v6 = vpop.eup %4360  ;;  %v2953_v36 = vmul.f32 0.6931472, %v4359_v5  ;;  %v2956_v60 = vmul.f32 %v4353_v19, %v2955_v26  ;;  %v2991_v44 = vadd.f32 1.0, %v2990_v1  ;;  %v3125_v63 = vmul.f32 %v5717_v29, %v5733_v25 }
 0x5e2   : > { %v4363_v59 = vpop.eup %4362  ;;  %vm2958_vm10 = vcmp.lt.f32.partialorder %v2957_v2, 0.0004427343  ;;  %v2993_v50 = vand.u32 2147483647, %v4355_v61  ;;  %4368 = vlog2.f32 %v3023_v58  ;;  %v3041_v24 = vadd.f32 1.0, %v5741_v30 }
 0x5e3   : > { %v5830_v17 = vpop.eup %4364  ;;  %v2959_v31 = vsel %vm2958_vm10, %v2956_v60, %v2953_v36  ;;  %v2989_v62 = vmul.f32 0.6931472, %v4363_v59  ;;  %v5834_v48 = vmul.f32 %v5723_v49, %v5746_v53  ;;  %v3036_v13 = vadd.f32 1.0, %v3035_v45 }
 0x5e4   : > { %v4367_v19 = vpop.eup %4366  ;;  %v3151_v15 = vadd.f32 %v5749_v57, %v3136_v3  ;;  %v3105_v42 = vmul.f32 %v3089_v27, %v2959_v31  ;;  %4370 = vlog2.f32 %v3032_v33  ;;  %v3050_v29 = vadd.f32 1.0, %v5825_v6 }
 0x5e5   : > { %v2992_v25 = vmul.f32 %v4355_v61, %v2991_v44  ;;  %v3026_v18 = vmul.f32 -0.5, %v5787_v41  ;;  %v3038_v26 = vand.u32 2147483647, %v5604_v55  ;;  %v3044_v1 = vmul.f32 -0.5, %v5741_v30 }
 0x5e6   : > { %v3137_v2 = vadd.f32 %v3121_v20, %v3105_v42  ;;  %vm5841_vm11 = vcmp.lt.f32.partialorder %v2993_v50, 0.0004427343  ;;  %4372 = vlog2.f32 %v3041_v24  ;;  %v3059_v49 = vadd.f32 1.0, %v5830_v17 }
 0x5e7   : > { %v3140_v57 = vadd.f32 %v5709_v47, %v3108_v22  ;;  %v2995_v27 = vsel %vm5841_vm11, %v2992_v25, %v2989_v62  ;;  %v3016_v61 = vmul.f32 0.6931472, %v4367_v19  ;;  %v3047_v33 = vand.u32 2147483647, %v5741_v30 }
 0x5e8   : > { %v4369_v45 = vpop.eup %4368  ;;  %v3152_v5 = vadd.f32 %v3151_v15, %v3137_v2  ;;  %v3037_v3 = vmul.f32 %v5604_v55, %v3036_v13  ;;  %4374 = vlog2.f32 %v3050_v29  ;;  %v3053_v20 = vmul.f32 -0.5, %v5825_v6 }
 0x5e9   : > { %v3027_v36 = vadd.f32 1.0, %v3026_v18  ;;  %v3029_v60 = vand.u32 2147483647, %v5787_v41  ;;  %vm5853_vm12 = vcmp.lt.f32.partialorder %v3038_v26, 0.0004427343  ;;  %v3045_v47 = vadd.f32 1.0, %v3044_v1 }
 0x5ea   : > { %v4371_v22 = vpop.eup %4370  ;;  %v3153_v59 = vadd.f32 %v3152_v5, %v5662_v12  ;;  %v3109_v50 = vmul.f32 %v5790_v39, %v2995_v27  ;;  %4376 = vlog2.f32 %v3059_v49  ;;  %v3081_v55 = vmul.f32 %v3962_v35, %v5486_v9 }
 0x5eb   : > { %v3022_v24 = vsel %vm5821_vm9, %v5819_v4, %v3016_v61  ;;  %v3025_v31 = vmul.f32 0.6931472, %v4369_v45  ;;  %vm5865_vm13 = vcmp.lt.f32.partialorder %v3047_v33, 0.0004427343  ;;  %v3062_v13 = vmul.f32 -0.5, %v5830_v17 }
 0x5ec   : > { %v4373_v19 = vpop.eup %4372  ;;  %v3154_v12 = vadd.f32 %v3153_v59, %v5756_v23  ;;  %v3054_v39 = vadd.f32 1.0, %v3053_v20  ;;  %v3056_v15 = vand.u32 2147483647, %v5825_v6  ;;  %v3082_v52 = vmul.f32 %v3965_v38, %v5486_v9 }
 0x5ed   : > { %v3028_v35 = vmul.f32 %v5787_v41, %v3027_v36  ;;  %vm5876_vm14 = vcmp.lt.f32.partialorder %v3029_v60, 0.0004427343  ;;  %v3034_v11 = vmul.f32 0.6931472, %v4371_v22  ;;  %v3046_v42 = vmul.f32 %v5741_v30, %v3045_v47 }
 0x5ee   : > { %v4375_v29 = vpop.eup %4374  ;;  %v3141_v25 = vadd.f32 %v3125_v63, %v3109_v50  ;;  %v3155_v18 = vadd.f32 %v3154_v12, %v3140_v57  ;;  %v3083_v23 = vmul.f32 %v3966_v51, %v5486_v9  ;;  %v3097_v26 = vadd.f32 %v3081_v55, %v5746_v53 }
 0x5ef   : > { %v3031_v38 = vsel %vm5876_vm14, %v3028_v35, %v3025_v31  ;;  %v3043_v41 = vmul.f32 0.6931472, %v4373_v19  ;;  %v3063_v1 = vadd.f32 1.0, %v3062_v13  ;;  %v3084_v2 = vmul.f32 %v3969_v40, %v5486_v9 }
 0x5f0   : > { %v4377_v58 = vpop.eup %4376  ;;  %v3156_v30 = vadd.f32 %v3155_v18, %v3141_v25  ;;  %v3065_v63 = vand.u32 2147483647, %v5830_v17  ;;  %v3098_v49 = vadd.f32 %v3082_v52, %v5795_v14  ;;  %v3112_v0 = vmul.f32 %v5713_v34, %v3022_v24 }
 0x5f1   : > { %v3040_v53 = vsel %vm5853_vm12, %v3037_v3, %v3034_v11  ;;  %v3052_v51 = vmul.f32 0.6931472, %v4375_v29  ;;  %v3055_v57 = vmul.f32 %v5825_v6, %v3054_v39  ;;  %v3085_v27 = vmul.f32 %v3970_v21, %v5486_v9 }
 0x5f2   : > { %vm5899_vm15 = vcmp.lt.f32.partialorder %v3056_v15, 0.0004427343  ;;  %v3099_v61 = vadd.f32 %v3083_v23, %v5802_v54  ;;  %v3113_v33 = vmul.f32 %v3097_v26, %v3031_v38  ;;  %v3157_v45 = vadd.f32 %v3156_v30, %v5696_v43 }
 0x5f3   : > { %v3049_v34 = vsel %vm5865_vm13, %v3046_v42, %v3043_v41  ;;  %v3061_v5 = vmul.f32 0.6931472, %v4377_v58  ;;  %v3064_v3 = vmul.f32 %v5830_v17, %v3063_v1  ;;  %v3100_v6 = vadd.f32 %v3084_v2, %v5807_v7 }
 0x5f4   : > { %vm3066_vm0 = vcmp.lt.f32.partialorder %v3065_v63, 0.0004427343  ;;  %v3114_v56 = vmul.f32 %v3098_v49, %v3040_v53  ;;  %v3144_v9 = vadd.f32 %v5760_v16, %v3112_v0  ;;  %v3158_v21 = vadd.f32 %v3157_v45, %v5765_v46 }
 0x5f5   : > { %v3058_v20 = vsel %vm5899_vm15, %v3055_v57, %v3052_v51  ;;  %v3101_v36 = vadd.f32 %v3085_v27, %v5811_v10  ;;  %v3115_v43 = vmul.f32 %v3099_v61, %v3049_v34  ;;  %v3130_v60 = vmul.f32 %v5503_v37, %v5795_v14 }
 0x5f6   : > { %v3145_v44 = vadd.f32 %v5834_v48, %v3113_v33  ;;  %v3159_v17 = vadd.f32 %v3158_v21, %v3144_v9  ;;  %v3067_v47 = vsel %vm3066_vm0, %v3064_v3, %v3061_v5  ;;  %v3116_v22 = vmul.f32 %v3100_v6, %v3058_v20 }
 0x5f7   : > { %v3131_v16 = vmul.f32 %v5634_v8, %v5802_v54  ;;  %v3146_v46 = vadd.f32 %v3130_v60, %v3114_v56  ;;  %v3117_v50 = vmul.f32 %v3101_v36, %v3067_v47  ;;  %v3132_v55 = vmul.f32 %v5727_v28, %v5807_v7 }
 0x5f8   : > { %v3160_v59 = vadd.f32 %v3159_v17, %v3145_v44  ;;  %v3133_v37 = vmul.f32 %v5762_v32, %v5811_v10 }
 0x5f9   : > { %v3147_v24 = vadd.f32 %v3131_v16, %v3115_v43  ;;  %v3148_v14 = vadd.f32 %v3132_v55, %v3116_v22 }
 0x5fa   : > { %v3161_v31 = vadd.f32 %v3160_v59, %v3146_v46  ;;  %v3149_v62 = vadd.f32 %v3133_v37, %v3117_v50 }
 0x5fc   : > { %v3162_v48 = vadd.f32 %v3161_v31, %v3147_v24 }
 0x5fe   : > { %v3163_v13 = vadd.f32 %v3162_v48, %v3148_v14 }
 0x600   : > { %v3164_v19 = vadd.f32 %v3163_v13, %v3149_v62 }
 0x602   : > { %3165 = vadd.xlane.f32.xlu0 %v3164_v19 }
 0x675   : > { %v3166_v8 = vpop.xlane.xlu0 %3165 }
 0x676   : > { %v3167_v54 = vrot.slane %v3166_v8, 4 }
 0x678   : > { %v3168_v12 = vadd.f32 %v3167_v54, %v3166_v8 }
 0x67a   : > { %v3169_v39 = vrot.slane %v3168_v12, 2 }
 0x67c   : > { %v3170_v15 = vadd.f32 %v3169_v39, %v3168_v12 }
 0x67e   : > { %v3171_v28 = vrot.slane %v3170_v15, 1 }
 0x680   : > { %v3172_v7 = vadd.f32 %v3171_v28, %v3170_v15 }
 0x682   : > { %4021 = vpush %v3172_v7 }
 0x6b2   : > { %3182 = sbr.rel (%p3179_p7) target bundleno = 1793 (0x701), region = 104 }
 0x6b3   : > { %s4022_s29 = spop %4021 }
 0x6b4   : > { %s3174_s11 = sadd.f32 %s4022_s29, %s3756_s7 }
 0x6b6   : > { %3176 = sst [smem:[#allocation3 + $0x1]] %s3174_s11 }
 0x6b7   : > { %v4728_v32 = vmov 65536.0   ;;  %s3757_s20 = sld [smem:[#allocation3 + $0x1]] }
 0x6b8   : > { %4378 = vrcp.f32 %v4728_v32 }
 0x6be   : > { %v4379_v10 = vpop.eup %4378 }
 0x6bf   : > { %v3186_v52 = vmul.f32 65536.0, %v4379_v10  ;;  %vm3190_vm1 = vweird.f32 %v4379_v10 }
 0x6c1   : > { %v3187_v35 = vsub.f32 1.0, %v3186_v52 }
 0x6c3   : > { %v3188_v4 = vmul.f32 %v4379_v10, %v3187_v35 }
 0x6c5   : > { %v3189_v11 = vadd.f32 %v4379_v10, %v3188_v4 }
 0x6c7   : > { %v3191_v42 = vsel %vm3190_vm1, %v4379_v10, %v3189_v11 }
 0x6c8   : > { %4023 = vpush %v3191_v42 }
 0x6f9   : > { %s4024_s30 = spop %4023 }
 0x6fa   : > { %s3193_s17 = smul.f32 %s4024_s30, %s3757_s20 }
 0x6fc   : > { %s3194_s14 = smul.f32 %s4983_s25, %s3193_s17 }
 0x6fe   : > { %s3195_s16 = sadd.f32 %s3194_s14, %s3183_s21 }
 0x700   : > { %3197 = sst [smem:[#allocation18]] %s3195_s16 }
 0x701 PF: > { %p4100_p8 = scmp.eq.s32.totalorder %s4834_s28, 3  ;;  %s6032_s4 = sld [smem:[#allocation39_spill]] }
 0x702   : > { %s4729_s6 = smov [#allocation18]  }
 0x707   : > { %s3204_s5 = sshll.u32 %s6032_s4, 4  ;;  %s3205_s5 = int_to_ptr.hbm [resolvable:$true] %s3204_s5 }
 0x708   : > { %4056 = dma.smem_to_hbm (%p4100_p8), %s4729_s6, 16, %s3205_s5, [#allocation7]  }
 0x709   : > { %4680 = dma.done.wait (%p4100_p8), [#allocation7], 16  }
 0x70a   : > { %4682 = vsyncadd (%p4100_p8), [#allocation7], 4294967280 }
 0x70b   : > { %3213 = sfence }
 0x70c PF: > { %s27_s24 = sadd.s32 1, %s4713_s24   ;;  %s6033_s28 = sld [smem:[#allocation27_spill]] }
 0x70d   : > { %p24_p9 = scmp.ge.s32.totalorder %s27_s24, 6   ;;  %s6034_s25 = sld [smem:[#allocation28_spill]] }
 0x70e   : > { %s6035_s17 = smov %s4689_s18  ;;  %s6036_s18 = smov %s4693_s19 }
 0x70f   : > { %s6037_s19 = smov %s4930_s13  ;;  %s6038_s20 = smov %s4705_s22 }
 0x710   : > { %s6039_s21 = smov %s4709_s23  ;;  %26 = sbr.rel (!%p24_p9) target bundleno = 21 (0x15), region = 143 }
 0x712   : > { %s6040_s22 = smov %s6033_s28 }
 0x713   : > { %s6041_s23 = smov %s6034_s25 }
 0x715   :  { %3219 = vsyncpa [#allocation5], 1 }
 0x716   :  { %3221 = vsyncpa [#allocation5 + $0x1], 1 }
 0x717   :  { %3222 = vsyncpa [#allocation10], 1 }
 0x718   :  { %3223 = vsyncpa [#allocation14], 1 }
 0x719   :  { %3224 = vsyncpa [#allocation17], 1 }
 0x71a   :  { %3225 = vsyncpa [#allocation6], 1 }
 0x71b   :  { %3227 = vsyncpa [#allocation6 + $0x1], 1 }
 0x71c   :  { %3228 = vsyncpa [#allocation7], 1 }
 0x71d   :  { %3230 = vsyncpa [#allocation7 + $0x1], 1 }

</bundles_post_ra>
